<compile_context>
chip_gen: v7x
topology: tpu7x:2x2x1
jax: 0.10.0
libtpu: 0.0.40
codegen_flags: <defaults>
</compile_context>

<pallas_src>
import jax
import jax.numpy as jnp
from jax.experimental import pallas as pl
from jax.experimental.pallas import tpu as pltpu

IN_FEATURES = 3 * 224 * 224   # 150528 = 1024 * 3 * 7 * 7
HIDDEN = 100
OUT = 3


def _select_config():
    """Per-generation (K-split across cores, K tile, scoped-VMEM cap)."""
    # Previously validated everywhere; bf16 W1 makes it ~14 MiB of VMEM.
    fallback = dict(split=1, tk=21504, vmem_cap=40 * 1024 * 1024)   # 7 steps
    try:
        info = pltpu.get_tpu_info()
        vmem_bytes = getattr(info, "vmem_capacity_bytes", None)
    except Exception:
        return fallback
    if not vmem_bytes:
        return fallback
    if vmem_bytes <= 64 * 1024 * 1024:
        # v7x-class: 64 MiB VMEM per TC, 2 TensorCores per chip.
        # Split K across the two cores: 3 steps/core, ~13 MiB bf16 W1 double
        # buffer + ~1.6 MiB x per core.
        return dict(split=2, tk=25088, vmem_cap=40 * 1024 * 1024)
    # v5e/v6e-class: 128 MiB VMEM, single TC.  Biggest tile that divides K:
    # 3 steps, ~26 MiB bf16 W1 double buffer + ~3.2 MiB x.
    return dict(split=1, tk=50176, vmem_cap=64 * 1024 * 1024)


def _fc1_partial_kernel(x_ref, w1_ref, o_ref):
    """Streams (B, TK) x (TK, HIDDEN) partial products into a resident f32 block.

    Grid is (SPLIT, K_STEPS); the SPLIT axis is "parallel" (one output block
    per split index, so the two v7x TensorCores never touch the same block),
    the K axis is an "arbitrary" reduction revisiting that block.
    """
    k = pl.program_id(1)

    @pl.when(k == 0)
    def _():
        o_ref[...] = jnp.zeros_like(o_ref)

    # bf16 x bf16 -> f32 on the MXU; x cast is a cheap VPU op on a tiny tile.
    part = jnp.dot(
        x_ref[...].astype(jnp.bfloat16),
        w1_ref[...],
        preferred_element_type=jnp.float32,
    )
    o_ref[...] += part[None, :, :]


def _head_kernel(p_ref, b1_ref, w2_ref, b2_ref, o_ref):
    """Tiny epilogue: sum partials, bias+ReLU, fc2, numerically stable softmax."""
    h = jnp.maximum(jnp.sum(p_ref[...], axis=0) + b1_ref[...], 0.0)
    logits = (
        jnp.dot(h, w2_ref[...], preferred_element_type=jnp.float32)
        + b2_ref[...]
    )
    m = jnp.max(logits, axis=-1, keepdims=True)
    e = jnp.exp(logits - m)
    o_ref[...] = (e / jnp.sum(e, axis=-1, keepdims=True)).astype(o_ref.dtype)


def network_linear_forward(x, w1, b1, w2, b2):
    """x: (B, 3, 224, 224) float32 -> (B, 3) float32 softmax probabilities."""
    B = x.shape[0]
    x2d = x.reshape(B, IN_FEATURES)          # torch x.view(-1, 3*224*224)

    # Stream the dominant fc1 weight in bf16 (in production store it as bf16
    # so this cast disappears).  Everything else stays f32.
    w1_stream = w1 if w1.dtype == jnp.bfloat16 else w1.astype(jnp.bfloat16)
    b1_2d = b1.reshape(1, HIDDEN).astype(jnp.float32)
    b2_2d = b2.reshape(1, OUT).astype(jnp.float32)

    cfg = _select_config()
    split, tk = cfg["split"], cfg["tk"]
    assert IN_FEATURES % (split * tk) == 0, "tile must evenly divide 150528"
    k_steps = IN_FEATURES // (split * tk)

    # Advisory hint: memory-bound on the bf16 W1 stream.
    cost = pl.CostEstimate(
        flops=2 * B * IN_FEATURES * HIDDEN,
        transcendentals=0,
        bytes_accessed=(
            2 * IN_FEATURES * HIDDEN      # bf16 W1 stream (dominant)
            + 4 * B * IN_FEATURES         # f32 x stream
            + 4 * split * B * HIDDEN      # partial-sum writeback
        ),
    )

    x_map = lambda c, k: (0, c * k_steps + k)
    w1_map = lambda c, k: (c * k_steps + k, 0)

    partials = pl.pallas_call(
        _fc1_partial_kernel,
        out_shape=jax.ShapeDtypeStruct((split, B, HIDDEN), jnp.float32),
        grid_spec=pltpu.PrefetchScalarGridSpec(
            num_scalar_prefetch=0,
            grid=(split, k_steps),
            in_specs=[
                pl.BlockSpec((B, tk), x_map),          # x slab
                pl.BlockSpec((tk, HIDDEN), w1_map),    # bf16 W1 slab
            ],
            out_specs=pl.BlockSpec((1, B, HIDDEN), lambda c, k: (c, 0, 0)),
        ),
        compiler_params=pltpu.CompilerParams(
            dimension_semantics=("parallel", "arbitrary"),
            vmem_limit_bytes=cfg["vmem_cap"],
        ),
        cost_estimate=cost,
    )(x2d, w1_stream)

    # Tiny combine + head: O(B*100) work, whole arrays fit in VMEM (no grid).
    return pl.pallas_call(
        _head_kernel,
        out_shape=jax.ShapeDtypeStruct((B, OUT), jnp.float32),
    )(partials, b1_2d, w2.astype(jnp.float32), b2_2d)


def init_params(key):
    """Deterministic init matching nn.Linear default (uniform +/- 1/sqrt(fan_in))."""
    k1, k2, k3, k4 = jax.random.split(key, 4)
    bound1 = 1.0 / jnp.sqrt(float(IN_FEATURES))
    bound2 = 1.0 / jnp.sqrt(float(HIDDEN))
    # Stored as (in_features, out_features) so the kernels compute x @ W + b.
    w1 = jax.random.uniform(k1, (IN_FEATURES, HIDDEN), jnp.float32, -bound1, bound1)
    b1 = jax.random.uniform(k2, (HIDDEN,), jnp.float32, -bound1, bound1)
    w2 = jax.random.uniform(k3, (HIDDEN, OUT), jnp.float32, -bound2, bound2)
    b2 = jax.random.uniform(k4, (OUT,), jnp.float32, -bound2, bound2)
    return w1, b1, w2, b2


def _reference(x, w1, b1, w2, b2):
    x2d = x.reshape(x.shape[0], IN_FEATURES)
    h = jnp.maximum(x2d @ w1 + b1, 0.0)
    logits = h @ w2 + b2
    return jax.nn.softmax(logits, axis=1)


if __name__ == "__main__":
    key = jax.random.PRNGKey(0)
    kx, kp = jax.random.split(key)

    B = 2
    x = jax.random.normal(kx, (B, 3, 224, 224), jnp.float32)
    w1, b1, w2, b2 = init_params(kp)

    out = jax.block_until_ready(network_linear_forward(x, w1, b1, w2, b2))
    ref = _reference(x, w1, b1, w2, b2)

    assert out.shape == (B, OUT)
    # bf16 W1 streaming => ~1e-3-level deviation from the all-f32 reference.
    assert jnp.allclose(out, ref, atol=3e-3, rtol=3e-2), (out, ref)
    assert jnp.allclose(jnp.sum(out, axis=1), 1.0, atol=1e-5)

    print("KERNEL_OK")
</pallas_src>

<mosaic_0001>
module attributes {stable_mosaic.version = 11 : i64} {
  func.func @_fc1_partial_kernel(%arg0: i32, %arg1: i32, %arg2: memref<2x21504xf32, #tpu.memory_space<vmem>>, %arg3: memref<21504x100xbf16, #tpu.memory_space<vmem>>, %arg4: memref<1x2x100xf32, #tpu.memory_space<vmem>>) attributes {dimension_semantics = [#tpu.dimension_semantics<parallel>, #tpu.dimension_semantics<arbitrary>], iteration_bounds = array<i64: 1, 7>, scalar_prefetch = 0 : i64, scratch_operands = 0 : i64, tpu.core_type = #tpu.core_type<tc>, window_params = [{transform_indices = @transform_0, window_bounds = array<i64: 2, 21504>}, {transform_indices = @transform_1, window_bounds = array<i64: 21504, 100>}, {transform_indices = @transform_2, window_bounds = array<i64: 1, 2, 100>}]} {
    %c0_i32 = arith.constant 0 : i32
    %0 = arith.cmpi eq, %arg1, %c0_i32 : i32
    %1 = arith.extui %0 : i1 to i32
    %c0_i32_0 = arith.constant 0 : i32
    %2 = arith.cmpi ne, %1, %c0_i32_0 : i32
    scf.if %2 {
      %cst_10 = arith.constant 0.000000e+00 : f32
      %11 = vector.broadcast %cst_10 : f32 to vector<1x2x100xf32>
      %c0_11 = arith.constant 0 : index
      %c0_12 = arith.constant 0 : index
      %c0_13 = arith.constant 0 : index
      %12 = vector.load %arg4[%c0_11, %c0_12, %c0_13] : memref<1x2x100xf32, #tpu.memory_space<vmem>>, vector<1x2x100xf32>
      tpu.vector_store %arg4[%c0_11, %c0_12, %c0_13], %11 {strides = array<i32>} : memref<1x2x100xf32, #tpu.memory_space<vmem>>, vector<1x2x100xf32>,
    } else {
    }
    %c0 = arith.constant 0 : index
    %c0_1 = arith.constant 0 : index
    %3 = vector.load %arg2[%c0, %c0_1] : memref<2x21504xf32, #tpu.memory_space<vmem>>, vector<2x21504xf32>
    %4 = arith.truncf %3 : vector<2x21504xf32> to vector<2x21504xbf16>
    %c0_2 = arith.constant 0 : index
    %c0_3 = arith.constant 0 : index
    %5 = vector.load %arg3[%c0_2, %c0_3] : memref<21504x100xbf16, #tpu.memory_space<vmem>>, vector<21504x100xbf16>
    %cst = arith.constant dense<0.000000e+00> : vector<2x100xf32>
    %6 = tpu.matmul %4, %5, %cst {dimension_numbers = #tpu.dot_dimension_numbers<[1], [0], [0], [1], [0, 0, 1, 1], [], []>} : vector<2x21504xbf16>, vector<21504x100xbf16>, vector<2x100xf32> -> vector<2x100xf32>
    %c0_4 = arith.constant 0 : index
    %c0_5 = arith.constant 0 : index
    %c0_6 = arith.constant 0 : index
    %7 = vector.load %arg4[%c0_4, %c0_5, %c0_6] : memref<1x2x100xf32, #tpu.memory_space<vmem>>, vector<1x2x100xf32>
    %8 = vector.shape_cast %6 : vector<2x100xf32> to vector<1x2x100xf32>
    %9 = arith.addf %7, %8 : vector<1x2x100xf32>
    %c0_7 = arith.constant 0 : index
    %c0_8 = arith.constant 0 : index
    %c0_9 = arith.constant 0 : index
    %10 = vector.load %arg4[%c0_7, %c0_8, %c0_9] : memref<1x2x100xf32, #tpu.memory_space<vmem>>, vector<1x2x100xf32>
    tpu.vector_store %arg4[%c0_7, %c0_8, %c0_9], %9 {strides = array<i32>} : memref<1x2x100xf32, #tpu.memory_space<vmem>>, vector<1x2x100xf32>,
    return
  }
  func.func @transform_0(%arg0: i32, %arg1: i32) -> (i32, i32) {
    %c7_i32 = arith.constant 7 : i32
    %0 = arith.muli %arg0, %c7_i32 : i32
    %1 = arith.addi %0, %arg1 : i32
    %c0_i32 = arith.constant 0 : i32
    %c0_i32_0 = arith.constant 0 : i32
    return %c0_i32, %1 : i32, i32
  }
  func.func @transform_1(%arg0: i32, %arg1: i32) -> (i32, i32) {
    %c7_i32 = arith.constant 7 : i32
    %0 = arith.muli %arg0, %c7_i32 : i32
    %1 = arith.addi %0, %arg1 : i32
    %c0_i32 = arith.constant 0 : i32
    %c0_i32_0 = arith.constant 0 : i32
    return %1, %c0_i32 : i32, i32
  }
  func.func @transform_2(%arg0: i32, %arg1: i32) -> (i32, i32, i32) {
    %c0_i32 = arith.constant 0 : i32
    %c0_i32_0 = arith.constant 0 : i32
    %c0_i32_1 = arith.constant 0 : i32
    return %arg0, %c0_i32, %c0_i32_0 : i32, i32, i32
  }
}

</mosaic_0001>

<bundles_post_ra>
// kernel: tpu_custom_call.1
= control target key start
LH: loop header
LB: loop body
LE: loop exit
PB: predicated region body
PF: predicated region fallthrough
CT: control target
= control target key end

     0   :  { %7 = vsyncpa [#allocation3], 0  ;;  %s22070_s0 = inlined_call_operand.vmem [shape: f32[2,150528], index: 0, kind: input, shape index: {}]   ;;  %s22071_s1 = inlined_call_operand.hbm [shape: bf16[150528,100], index: 1, kind: input, shape index: {}]   ;;  %s22072_s2 = inlined_call_operand.hbm [shape: f32[1,2,100], index: 2, kind: output, shape index: {}]  }
   0x1   :  { %9 = vsyncpa [#allocation3 + $0x1], 0 }
   0x2   :  { %10 = vsyncpa [#allocation4], 0  ;;  %s20344_s9 = smov 0   ;;  %s20346_s10 = smov 0  }
   0x3   :  { %s20348_s11 = smov 0   ;;  %s20350_s12 = smov 0  }
   0x4   :  { %s20352_s13 = smov 0   ;;  %s20354_s14 = smov 0  }
   0x5 LB: > { %s15553_s15 = sadd.s32 4294967295, %s20321_s14   ;;  %s25_s16 = sadd.s32 1, %s20317_s13  ;;  %s20321_s14 = sphi %s20354_s14, %s16_s14   ;;  %s20317_s13 = sphi %s20352_s13, %s22080_s13   ;;  %s20313_s12 = sphi %s20350_s12, %s22079_s12   ;;  %s20309_s11 = sphi %s20348_s11, %s22078_s11   ;;  %s20305_s10 = sphi %s20346_s10, %s22077_s10   ;;  %s20301_s9 = sphi %s20344_s9, %s22076_s9  }
   0x6   : > { %p26_p0 = scmp.ge.s32.totalorder %s25_s16, 7  ;;  %s69_s17 = sadd.s32 1, %s20309_s11 }
   0x7   : > { %p76_p1 = scmp.ne.s32.totalorder %s20309_s11, %s20305_s10  ;;  %p77_p2 = scmp.eq.s32.totalorder %s20321_s14, 0 }
   0x8   : > { %s22082_s16 = smov (%p26_p0, %s25_s16), 0  ;;  %p82_p4 = scmp.ne.s32.totalorder %s20305_s10, %s20301_s9 }
   0x9   : > { %p78_p3 = por %p77_p2, %p76_p1  ;;  %s66_s18 = ssub.s32 %s20317_s13, %s22082_s16 }
   0xa   : > { %p83_p5 = scmp.eq.s32.totalorder %s15553_s15, 0  ;;  %p67_p6 = scmp.eq.s32.totalorder %s66_s18, 0 }
   0xb   : > { %p18769_p8 = scmp.lt.s32.totalorder %s20321_s14, 7  ;;  %s145_s21 = sand.u32 1, %s20309_s11  }
   0xc   : > { %p20385_p7 = por %p83_p5, %p82_p4  ;;  %s16908_s22 = smul.u32 172032, %s20317_s13 }
   0xd   : > { %s20391_s20 = scalar_select %p67_p6, %s20309_s11, %s69_s17  }
   0xe   : > { %s18757_s23 = smul.u32 10752, %s145_s21  ;;  %s20398_s26 = scalar_lea.hbm %s22071_s1, %s16908_s22 }
   0xf   : > { %p20400_p9 = pnand %p18769_p8, %p78_p3  ;;  %s20406_s30 = scalar_lea.sflag [#allocation3], %s145_s21 }
  0x10   : > { %s149_s28 = scalar_lea.vmem [#allocation2], %s18757_s23  ;;  %s20211_s3 = scalar_lea.hbm %s20398_s26, 172032 }
  0x11   : > { %s158_s29 = sshll.u32 %s149_s28, 4  ;;  %p20212_p10 = scmp.ne.s32.totalorder %s20398_s26, %s20211_s3  ;;  %s20404_s29 = int_to_ptr.vmem [resolvable:$true] %s158_s29 }
  0x12   : > { %p20213_p11 = pneg %p20400_p9  ;;  %s20216_s6 = scalar_lea.hbm %s22071_s1, 1204224 }
  0x13   : > { %p20217_p0 = scmp.lt.u32.totalorder %s20398_s26, %s22071_s1  ;;  %p20218_p1 = scmp.lt.u32.totalorder %s20216_s6, %s20211_s3 }
  0x14   : > { %p20214_p12 = pnand %p20213_p11, %p20212_p10  ;;  %p20220_p3 = scmp.lt.u32.totalorder %s20211_s3, %s20398_s26 }
  0x15   : > { %p20219_p2 = por %p20218_p1, %p20217_p0 }
  0x16   : > { %p20215_p13 = pneg %p20214_p12 }
  0x17   : > { %p20221_p4 = por %p20220_p3, %p20219_p2 }
  0x19   : > { %p20222_p5 = pnand %p20221_p4, %p20215_p13 }
  0x1b   : > { %20225 = shalt.err (!%p20222_p5)
}
  0x1c   : > { %s20226_s9 = scalar_lea.vmem %s20404_s29, 172032  ;;  %s20323_s17 = smov [#allocation2]  }
  0x1d   : > { %p20227_p6 = scmp.ne.s32.totalorder %s20404_s29, %s20226_s9  ;;  %s20231_s18 = sshll.u32 %s20323_s17, 4  ;;  %s20232_s18 = int_to_ptr.vmem [resolvable:$false] %s20231_s18 }
  0x1e   : > { %s20233_s21 = scalar_lea.vmem %s20232_s18, 344064  ;;  %p20234_p12 = scmp.lt.s32.totalorder %s20404_s29, %s20232_s18 }
  0x1f   : > { %p20229_p8 = pnand %p20227_p6, %p20213_p11  ;;  %p20235_p0 = scmp.lt.s32.totalorder %s20233_s21, %s20226_s9 }
  0x21   : > { %p20230_p10 = pneg %p20229_p8  ;;  %p20236_p1 = por %p20235_p0, %p20234_p12 }
  0x23   : > { %p20237_p2 = pnand %p20236_p1, %p20230_p10 }
  0x25   : > { %20240 = shalt.err (!%p20237_p2)
}
  0x26   : > { %s20324_s22 = smov 64   ;;  %s20325_s23 = smov 4  }
  0x27   : > { %18768 = dma.hbm_to_vmem [thread:$0]  (!%p20400_p9), %s20398_s26, 172032, %s20404_s29, %s20406_s30, %s20324_s22, %s20324_s22, %s20325_s23  }
  0x28   : > { %p15557_p11 = scmp.ge.s32.totalorder %s20321_s14, 1  ;;  %p166_p13 = scmp.lt.s32.totalorder %s20321_s14, 8 }
  0x2a   : > { %p167_p3 = pnand %p15557_p11, %p166_p13 }
  0x2b   : > { %s172_s24 = sand.u32 (!%p167_p3), 1, %s20305_s10  }
  0x2c   : > { %170 = sbr.rel (%p167_p3) target bundleno = 1643 (0x66b), region = 28  ;;  %s173_s28 = scalar_lea.sflag (!%p167_p3), [#allocation3], %s172_s24 }
  0x2d   : > { %s18758_s25 = smul.u32 (!%p167_p3), 10752, %s172_s24 }
  0x2f   : > { %s20437_s3 = scalar_lea.vmem (!%p167_p3), [#allocation2], %s18758_s25 }
  0x33   : > { %20292 = dma.done.wait (%p20385_p7), %s173_s28, 172032  }
  0x34   : > { %20294 = vsyncadd (%p20385_p7), %s173_s28, 4294795264  ;;  %s201_s4 = smul.u32 168, %s20313_s12  ;;  %p15559_p9 = scmp.ne.s32.totalorder %s20313_s12, 0 }
  0x35   : > { %vm217_vm0 = vcmask (!%p15559_p9), 812032   ;;  %v20326_v0 = vmov (!%p15559_p9), 0.0  }
  0x36   : > { %p202_p4 = scmp.lt.s32.totalorder %s201_s4, 1175  ;;  %216 = sbr.rel (%p15559_p9) target bundleno = 61 (0x3d), region = 36  ;;  %218 = vst.msk [vmem:[#allocation5] sm:$0x3] (!%p15559_p9), %vm217_vm0, %v20326_v0 }
  0x38   : > { %s22084_s4 = smov (!%p202_p4, %s201_s4), 1175 }
  0x39   : > { %s15558_s26 = sshll.u32 %s22084_s4, 1 }
  0x3a   : > { %s20447_s30 = scalar_lea.vmem %s22070_s0, %s15558_s26 }
  0x3d PF: > { %v18825_v1 = vld [vmem:[%s20437_s3 + $0x40] sm:$0xff]   ;;  %v18829_v5 = vld [vmem:[%s20437_s3 + $0x48] sm:$0xff]   ;;  %v18833_v9 = vld [vmem:[%s20437_s3 + $0x50] sm:$0xff]   ;;  %v307_v29 = vlaneseq  ;;  %v20327_v37 = vmov 1983009808   ;;  %s20328_s12 = smov [#allocation5]  }
  0x3e   : > { %v18826_v2 = vld [vmem:[%s20437_s3 + $0xc0] sm:$0xff]   ;;  %16909 = vmatprep.subr.bf16.mxu0 %v18825_v1  ;;  %v18830_v6 = vld [vmem:[%s20437_s3 + $0xc8] sm:$0xff]   ;;  %v18834_v10 = vld [vmem:[%s20437_s3 + $0xd0] sm:$0xff]   ;;  %v305_v38 = vunpack.c.l.s4 %v20327_v37  ;;  %s15478_s19 = sshll.u32 %s20328_s12, 4  ;;  %vm15467_vm1 = vcmask 812032   ;;  %p22026_p7 = scmp.eq.s32.totalorder %s15553_s15, 6  ;;  %s15479_s19 = int_to_ptr.vmem [resolvable:$true] %s15478_s19 }
  0x3f   : > { %v18827_v3 = vld [vmem:[%s20437_s3] sm:$0xff]   ;;  %16931 = vmatprep.subr.bf16.mxu1 %v18826_v2  ;;  %v18831_v7 = vld [vmem:[%s20437_s3 + $0x8] sm:$0xff]   ;;  %v18835_v11 = vld [vmem:[%s20437_s3 + $0x10] sm:$0xff]   ;;  %v308_v34 = vshrl.u32 %v307_v29, 7  ;;  %s20241_s6 = scalar_lea.vmem %s15479_s19, 32  ;;  %p20248_p10 = scmp.lt.s32.totalorder %s15479_s19, %s15479_s19 }
  0x40   : > { %v18828_v4 = vld [vmem:[%s20437_s3 + $0x80] sm:$0xff]   ;;  %16910 = vmatpush3.bf16.msra.mxu0 %v18827_v3  ;;  %v18832_v8 = vld [vmem:[%s20437_s3 + $0x88] sm:$0xff]   ;;  %v18836_v12 = vld [vmem:[%s20437_s3 + $0x90] sm:$0xff]   ;;  %v306_v40 = vunpack.c.0.s8 %v305_v38  ;;  %p20242_p5 = scmp.ne.s32.totalorder %s15479_s19, %s20241_s6  ;;  %p20249_p12 = scmp.lt.s32.totalorder %s20241_s6, %s20241_s6 }
  0x41   : > { %16932 = vmatpush3.bf16.msra.mxu1 %v18828_v4  ;;  %16911 = vmatprep.subr.bf16.mxu0 %v18829_v5  ;;  %v18837_v13 = vld [vmem:[%s20437_s3 + $0x58] sm:$0xff]   ;;  %v18841_v17 = vld [vmem:[%s20437_s3 + $0x60] sm:$0xff]   ;;  %v18845_v21 = vld [vmem:[%s20437_s3 + $0x68] sm:$0xff]  }
  0x42   : > { %16933 = vmatprep.subr.bf16.mxu1 %v18830_v6  ;;  %v18838_v14 = vld [vmem:[%s20437_s3 + $0xd8] sm:$0xff]   ;;  %v18842_v18 = vld [vmem:[%s20437_s3 + $0xe0] sm:$0xff]   ;;  %v18846_v22 = vld [vmem:[%s20437_s3 + $0xe8] sm:$0xff]   ;;  %v20485_v42 = vsub.s32 %v306_v40, %v308_v34  ;;  %p20243_p6 = pnand %p20242_p5, %p22026_p7  ;;  %p20250_p0 = por %p20249_p12, %p20248_p10 }
  0x43   : > { %v18839_v15 = vld [vmem:[%s20437_s3 + $0x18] sm:$0xff]   ;;  %v18843_v19 = vld [vmem:[%s20437_s3 + $0x20] sm:$0xff]   ;;  %v18847_v23 = vld [vmem:[%s20437_s3 + $0x28] sm:$0xff]  }
  0x44   : > { %16912 = vmatpush3.bf16.msra.mxu0 %v18831_v7  ;;  %v18840_v16 = vld [vmem:[%s20437_s3 + $0x98] sm:$0xff]   ;;  %v18844_v20 = vld [vmem:[%s20437_s3 + $0xa0] sm:$0xff]   ;;  %v18848_v24 = vld [vmem:[%s20437_s3 + $0xa8] sm:$0xff]   ;;  %p20244_p8 = pneg %p20243_p6 }
  0x45   : > { %16934 = vmatpush3.bf16.msra.mxu1 %v18832_v8  ;;  %16913 = vmatprep.subr.bf16.mxu0 %v18833_v9  ;;  %v18849_v25 = vld [vmem:[%s20437_s3 + $0x70] sm:$0xff]   ;;  %v18853_v30 = vld [vmem:[%s20437_s3 + $0x78] sm:$0xff]   ;;  %v219_v35 = vld [vmem:[%s20447_s30] sm:$0xff] }
  0x46   : > { %16935 = vmatprep.subr.bf16.mxu1 %v18834_v10  ;;  %v18850_v26 = vld [vmem:[%s20437_s3 + $0xf0] sm:$0xff]   ;;  %v18854_v31 = vld [vmem:[%s20437_s3 + $0xf8] sm:$0xff]   ;;  %v18858_v36 = vld [vmem:[%s20437_s3 + $0x140] sm:$0xff]   ;;  %v303_v41 = vcombine.high %v219_v35, %v219_v35  ;;  %v310_v43 = vrot.slane %v219_v35, %v20485_v42  ;;  %p20251_p1 = pnand %p20250_p0, %p20244_p8 }
  0x47   : > { %v18851_v27 = vld [vmem:[%s20437_s3 + $0x30] sm:$0xff]   ;;  %v18855_v32 = vld [vmem:[%s20437_s3 + $0x38] sm:$0xff]   ;;  %v18859_v39 = vld [vmem:[%s20437_s3 + $0x1c0] sm:$0xff]  }
  0x48   : > { %16914 = vmatpush3.bf16.msra.mxu0 %v18835_v11  ;;  %v18852_v28 = vld [vmem:[%s20437_s3 + $0xb0] sm:$0xff]   ;;  %v18856_v33 = vld [vmem:[%s20437_s3 + $0xb8] sm:$0xff]   ;;  %v317_v44 = vrot.slane %v303_v41, %v20485_v42  ;;  %v318_v45 = vcombine.high %v310_v43, %v310_v43  ;;  %v18860_v47 = vld [vmem:[%s20437_s3 + $0x100] sm:$0xff]   ;;  %v1185_v48 = vpack.c.bf16 %v310_v43, %v310_v43 }
  0x49   : > { %16936 = vmatpush3.bf16.msra.mxu1 %v18836_v12  ;;  %16915 = vmatprep.subr.bf16.mxu0 %v18837_v13  ;;  %v18861_v50 = vld [vmem:[%s20437_s3 + $0x180] sm:$0xff]   ;;  %v18862_v53 = vld [vmem:[%s20437_s3 + $0x148] sm:$0xff]   ;;  %v18866_v57 = vld [vmem:[%s20437_s3 + $0x150] sm:$0xff]  }
  0x4a   : > { %16937 = vmatprep.subr.bf16.mxu1 %v18838_v14  ;;  %v319_v46 = vcombine.high %v317_v44, %v317_v44  ;;  %v1187_v49 = vpack.c.bf16 %v317_v44, %v317_v44  ;;  %v1186_v51 = vpack.c.bf16 %v318_v45, %v318_v45  ;;  %v18863_v54 = vld [vmem:[%s20437_s3 + $0x1c8] sm:$0xff]   ;;  %v18867_v58 = vld [vmem:[%s20437_s3 + $0x1d0] sm:$0xff]   ;;  %v18870_v61 = vld [vmem:[%s20437_s3 + $0x158] sm:$0xff]  }
  0x4b   : > { %v18864_v55 = vld [vmem:[%s20437_s3 + $0x108] sm:$0xff]   ;;  %v18868_v59 = vld [vmem:[%s20437_s3 + $0x110] sm:$0xff]   ;;  %v18871_v62 = vld [vmem:[%s20437_s3 + $0x1d8] sm:$0xff]  }
  0x4c   : > { %16916 = vmatpush3.bf16.msra.mxu0 %v18839_v15  ;;  %v1188_v52 = vpack.c.bf16 %v319_v46, %v319_v46  ;;  %12137 = vmatprep.mubr.bf16.mxu0 %v1186_v51  ;;  %v18865_v56 = vld [vmem:[%s20437_s3 + $0x188] sm:$0xff]   ;;  %v18869_v60 = vld [vmem:[%s20437_s3 + $0x190] sm:$0xff]   ;;  %v18872_v63 = vld [vmem:[%s20437_s3 + $0x118] sm:$0xff]  }
  0x4d   : > { %16938 = vmatpush3.bf16.msra.mxu1 %v18840_v16  ;;  %16917 = vmatprep.subr.bf16.mxu0 %v18841_v17  ;;  %v18873_v0 = vld [vmem:[%s20437_s3 + $0x198] sm:$0xff]   ;;  %v18874_v1 = vld [vmem:[%s20437_s3 + $0x160] sm:$0xff]   ;;  %v18878_v5 = vld [vmem:[%s20437_s3 + $0x168] sm:$0xff]  }
  0x4e   : > { %16939 = vmatprep.subr.bf16.mxu1 %v18842_v18  ;;  %12177 = vmatprep.mubr.bf16.mxu1 %v1188_v52  ;;  %v18875_v2 = vld [vmem:[%s20437_s3 + $0x1e0] sm:$0xff]   ;;  %v18879_v6 = vld [vmem:[%s20437_s3 + $0x1e8] sm:$0xff]   ;;  %v18882_v9 = vld [vmem:[%s20437_s3 + $0x170] sm:$0xff]  }
  0x4f   : > { %v18876_v3 = vld [vmem:[%s20437_s3 + $0x120] sm:$0xff]   ;;  %v18880_v7 = vld [vmem:[%s20437_s3 + $0x128] sm:$0xff]   ;;  %v18883_v10 = vld [vmem:[%s20437_s3 + $0x1f0] sm:$0xff]  }
  0x50   : > { %16918 = vmatpush3.bf16.msra.mxu0 %v18843_v19  ;;  %v18877_v4 = vld [vmem:[%s20437_s3 + $0x1a0] sm:$0xff]   ;;  %v18881_v8 = vld [vmem:[%s20437_s3 + $0x1a8] sm:$0xff]   ;;  %v18884_v12 = vld [vmem:[%s20437_s3 + $0x130] sm:$0xff]  }
  0x51   : > { %16940 = vmatpush3.bf16.msra.mxu1 %v18844_v20  ;;  %16919 = vmatprep.subr.bf16.mxu0 %v18845_v21  ;;  %v220_v11 = vld [vmem:[%s20447_s30 + $0x8] sm:$0xff]  ;;  %v18885_v15 = vld [vmem:[%s20437_s3 + $0x1b0] sm:$0xff]   ;;  %v18886_v16 = vld [vmem:[%s20437_s3 + $0x178] sm:$0xff]  }
  0x52   : > { %16941 = vmatprep.subr.bf16.mxu1 %v18846_v22  ;;  %v327_v13 = vrot.slane %v220_v11, %v20485_v42  ;;  %v320_v14 = vcombine.high %v220_v11, %v220_v11  ;;  %v18887_v19 = vld [vmem:[%s20437_s3 + $0x1f8] sm:$0xff]   ;;  %v18898_v34 = vld [vmem:[%s20437_s3 + $0x288] sm:$0xff]   ;;  %v18899_v35 = vld [vmem:[%s20437_s3 + $0x250] sm:$0xff]  }
  0x53   : > { %v18888_v20 = vld [vmem:[%s20437_s3 + $0x138] sm:$0xff]   ;;  %v18901_v37 = vld [vmem:[%s20437_s3 + $0x210] sm:$0xff]   ;;  %v18907_v44 = vld [vmem:[%s20437_s3 + $0x260] sm:$0xff]  }
  0x54   : > { %16920 = vmatpush3.bf16.msra.mxu0 %v18847_v23  ;;  %v335_v17 = vcombine.high %v327_v13, %v327_v13  ;;  %v334_v18 = vrot.slane %v320_v14, %v20485_v42  ;;  %v18889_v23 = vld [vmem:[%s20437_s3 + $0x1b8] sm:$0xff]   ;;  %v18902_v38 = vld [vmem:[%s20437_s3 + $0x290] sm:$0xff]   ;;  %v18908_v45 = vld [vmem:[%s20437_s3 + $0x2e0] sm:$0xff]  }
  0x55   : > { %16942 = vmatpush3.bf16.msra.mxu1 %v18848_v24  ;;  %16921 = vmatprep.subr.bf16.mxu0 %v18849_v25  ;;  %v18891_v25 = vld [vmem:[%s20437_s3 + $0x240] sm:$0xff]   ;;  %v18904_v40 = vld [vmem:[%s20437_s3 + $0x2d8] sm:$0xff]   ;;  %v18914_v51 = vld [vmem:[%s20437_s3 + $0x2a8] sm:$0xff]  }
  0x56   : > { %16943 = vmatprep.subr.bf16.mxu1 %v18850_v26  ;;  %v1190_v21 = vpack.c.bf16 %v335_v17, %v335_v17  ;;  %v336_v22 = vcombine.high %v334_v18, %v334_v18  ;;  %v18892_v26 = vld [vmem:[%s20437_s3 + $0x2c0] sm:$0xff]   ;;  %v1191_v29 = vpack.c.bf16 %v334_v18, %v334_v18  ;;  %v18905_v41 = vld [vmem:[%s20437_s3 + $0x218] sm:$0xff]   ;;  %v18915_v52 = vld [vmem:[%s20437_s3 + $0x270] sm:$0xff]  }
  0x57   : > { %v18906_v43 = vld [vmem:[%s20437_s3 + $0x298] sm:$0xff]   ;;  %v18909_v46 = vld [vmem:[%s20437_s3 + $0x220] sm:$0xff]   ;;  %v18929_v11 = vld [vmem:[%s20437_s3 + $0x3c8] sm:$0xff]  }
  0x58   : > { %16922 = vmatpush3.bf16.msra.mxu0 %v18851_v27  ;;  %v1192_v24 = vpack.c.bf16 %v336_v22, %v336_v22  ;;  %v18893_v27 = vld [vmem:[%s20437_s3 + $0x200] sm:$0xff]   ;;  %v18932_v14 = vld [vmem:[%s20437_s3 + $0x350] sm:$0xff]   ;;  %v18936_v18 = vld [vmem:[%s20437_s3 + $0x358] sm:$0xff]  }
  0x59   : > { %16944 = vmatpush3.bf16.msra.mxu1 %v18852_v28  ;;  %16923 = vmatprep.subr.bf16.mxu0 %v18853_v30  ;;  %v1189_v28 = vpack.c.bf16 %v327_v13, %v327_v13  ;;  %v18894_v30 = vld [vmem:[%s20437_s3 + $0x280] sm:$0xff]   ;;  %v18931_v13 = vld [vmem:[%s20437_s3 + $0x388] sm:$0xff]   ;;  %v18935_v17 = vld [vmem:[%s20437_s3 + $0x390] sm:$0xff]  }
  0x5a   : > { %16945 = vmatprep.subr.bf16.mxu1 %v18854_v31  ;;  %v18895_v31 = vld [vmem:[%s20437_s3 + $0x248] sm:$0xff]   ;;  %v18940_v22 = vld [vmem:[%s20437_s3 + $0x360] sm:$0xff]  }
  0x5c   : > { %16924 = vmatpush3.bf16.msra.mxu0 %v18855_v32  ;;  %v18896_v32 = vld [vmem:[%s20437_s3 + $0x2c8] sm:$0xff]  }
  0x5d   : > { %16946 = vmatpush3.bf16.msra.mxu1 %v18856_v33  ;;  %16953 = vmatprep.subr.bf16.mxu0 %v18858_v36  ;;  %v18897_v33 = vld [vmem:[%s20437_s3 + $0x208] sm:$0xff]   ;;  %v18900_v36 = vld [vmem:[%s20437_s3 + $0x2d0] sm:$0xff]  }
  0x5e   : > { %16975 = vmatprep.subr.bf16.mxu1 %v18859_v39  ;;  %v18903_v39 = vld [vmem:[%s20437_s3 + $0x258] sm:$0xff]  }
  0x5f   : > { %12138 = vmatmul.mubr.bf16.vlgmr.msra.gmra.mrb[0].mxu0 %v1185_v48  ;;  %v18911_v48 = vld [vmem:[%s20437_s3 + $0x268] sm:$0xff]  }
  0x60   : > { %12178 = vmatmul.mubr.bf16.vlgmr.msra.gmra.mrb[0].mxu1 %v1187_v49  ;;  %16954 = vmatpush3.bf16.msra.mxu0 %v18860_v47  ;;  %v18910_v47 = vld [vmem:[%s20437_s3 + $0x2a0] sm:$0xff]   ;;  %v18912_v49 = vld [vmem:[%s20437_s3 + $0x2e8] sm:$0xff]  }
  0x61   : > { %16976 = vmatpush3.bf16.msra.mxu1 %v18861_v50  ;;  %16955 = vmatprep.subr.bf16.mxu0 %v18862_v53  ;;  %v18913_v50 = vld [vmem:[%s20437_s3 + $0x228] sm:$0xff]   ;;  %v18916_v53 = vld [vmem:[%s20437_s3 + $0x2f0] sm:$0xff]  }
  0x62   : > { %16977 = vmatprep.subr.bf16.mxu1 %v18863_v54  ;;  %12217 = vmatprep.mubr.bf16.mxu0 %v1190_v21  ;;  %v221_v54 = vld [vmem:[%s20447_s30 + $0x10] sm:$0xff]  ;;  %v18939_v21 = vld [vmem:[%s20437_s3 + $0x398] sm:$0xff]  }
  0x63   : > { %12257 = vmatprep.mubr.bf16.mxu1 %v1192_v24  ;;  %v18942_v24 = vld [vmem:[%s20437_s3 + $0x320] sm:$0xff]  }
  0x64   : > { %16956 = vmatpush3.bf16.msra.mxu0 %v18864_v55  ;;  %v18917_v55 = vld [vmem:[%s20437_s3 + $0x230] sm:$0xff]  }
  0x65   : > { %16978 = vmatpush3.bf16.msra.mxu1 %v18865_v56  ;;  %16957 = vmatprep.subr.bf16.mxu0 %v18866_v57  ;;  %v344_v56 = vrot.slane %v221_v54, %v20485_v42  ;;  %v337_v57 = vcombine.high %v221_v54, %v221_v54  ;;  %v18962_v54 = vld [vmem:[%s20437_s3 + $0x4c8] sm:$0xff]  }
  0x66   : > { %16979 = vmatprep.subr.bf16.mxu1 %v18867_v58  ;;  %v18918_v58 = vld [vmem:[%s20437_s3 + $0x2b0] sm:$0xff]  }
  0x68   : > { %16958 = vmatpush3.bf16.msra.mxu0 %v18868_v59  ;;  %v18919_v59 = vld [vmem:[%s20437_s3 + $0x278] sm:$0xff]  }
  0x69   : > { %16980 = vmatpush3.bf16.msra.mxu1 %v18869_v60  ;;  %16959 = vmatprep.subr.bf16.mxu0 %v18870_v61  ;;  %v352_v60 = vcombine.high %v344_v56, %v344_v56  ;;  %v351_v61 = vrot.slane %v337_v57, %v20485_v42  ;;  %v18965_v57 = vld [vmem:[%s20437_s3 + $0x450] sm:$0xff]  }
  0x6a   : > { %16981 = vmatprep.subr.bf16.mxu1 %v18871_v62  ;;  %v18920_v62 = vld [vmem:[%s20437_s3 + $0x2f8] sm:$0xff]  }
  0x6c   : > { %16960 = vmatpush3.bf16.msra.mxu0 %v18872_v63  ;;  %v18921_v63 = vld [vmem:[%s20437_s3 + $0x238] sm:$0xff]  }
  0x6d   : > { %16982 = vmatpush3.bf16.msra.mxu1 %v18873_v0  ;;  %16961 = vmatprep.subr.bf16.mxu0 %v18874_v1  ;;  %v1194_v0 = vpack.c.bf16 %v352_v60, %v352_v60  ;;  %v353_v1 = vcombine.high %v351_v61, %v351_v61  ;;  %v18968_v60 = vld [vmem:[%s20437_s3 + $0x490] sm:$0xff]  }
  0x6e   : > { %16983 = vmatprep.subr.bf16.mxu1 %v18875_v2  ;;  %v18922_v2 = vld [vmem:[%s20437_s3 + $0x2b8] sm:$0xff]  }
  0x70   : > { %16962 = vmatpush3.bf16.msra.mxu0 %v18876_v3  ;;  %v1196_v3 = vpack.c.bf16 %v353_v1, %v353_v1  ;;  %v18973_v1 = vld [vmem:[%s20437_s3 + $0x460] sm:$0xff]  }
  0x71   : > { %16984 = vmatpush3.bf16.msra.mxu1 %v18877_v4  ;;  %16963 = vmatprep.subr.bf16.mxu0 %v18878_v5  ;;  %v18924_v4 = vld [vmem:[%s20437_s3 + $0x340] sm:$0xff]  }
  0x72   : > { %16985 = vmatprep.subr.bf16.mxu1 %v18879_v6  ;;  %v18925_v5 = vld [vmem:[%s20437_s3 + $0x3c0] sm:$0xff]  }
  0x73   : > { %v18926_v6 = vld [vmem:[%s20437_s3 + $0x300] sm:$0xff]  }
  0x74   : > { %16964 = vmatpush3.bf16.msra.mxu0 %v18880_v7  ;;  %v1193_v7 = vpack.c.bf16 %v344_v56, %v344_v56  ;;  %v18964_v56 = vld [vmem:[%s20437_s3 + $0x488] sm:$0xff]  }
  0x75   : > { %16986 = vmatpush3.bf16.msra.mxu1 %v18881_v8  ;;  %16965 = vmatprep.subr.bf16.mxu0 %v18882_v9  ;;  %v1195_v8 = vpack.c.bf16 %v351_v61, %v351_v61  ;;  %v18927_v9 = vld [vmem:[%s20437_s3 + $0x380] sm:$0xff]   ;;  %v18969_v61 = vld [vmem:[%s20437_s3 + $0x458] sm:$0xff]  }
  0x76   : > { %16987 = vmatprep.subr.bf16.mxu1 %v18883_v10  ;;  %v18928_v10 = vld [vmem:[%s20437_s3 + $0x348] sm:$0xff]  }
  0x78   : > { %16966 = vmatpush3.bf16.msra.mxu0 %v18884_v12  ;;  %v18930_v12 = vld [vmem:[%s20437_s3 + $0x308] sm:$0xff]  }
  0x79   : > { %16988 = vmatpush3.bf16.msra.mxu1 %v18885_v15  ;;  %16967 = vmatprep.subr.bf16.mxu0 %v18886_v16  ;;  %v18933_v15 = vld [vmem:[%s20437_s3 + $0x3d0] sm:$0xff]  }
  0x7a   : > { %16989 = vmatprep.subr.bf16.mxu1 %v18887_v19  ;;  %v18934_v16 = vld [vmem:[%s20437_s3 + $0x310] sm:$0xff]   ;;  %v18937_v19 = vld [vmem:[%s20437_s3 + $0x3d8] sm:$0xff]  }
  0x7c   : > { %16968 = vmatpush3.bf16.msra.mxu0 %v18888_v20  ;;  %v18938_v20 = vld [vmem:[%s20437_s3 + $0x318] sm:$0xff]  }
  0x7d   : > { %16990 = vmatpush3.bf16.msra.mxu1 %v18889_v23  ;;  %16997 = vmatprep.subr.bf16.mxu0 %v18891_v25  ;;  %v18941_v23 = vld [vmem:[%s20437_s3 + $0x3e0] sm:$0xff]  }
  0x7e   : > { %17019 = vmatprep.subr.bf16.mxu1 %v18892_v26  ;;  %v18943_v25 = vld [vmem:[%s20437_s3 + $0x3a0] sm:$0xff]   ;;  %v18944_v26 = vld [vmem:[%s20437_s3 + $0x368] sm:$0xff]  }
  0x7f   : > { %12218 = vmatmul.mubr.bf16.vlgmr.msra.gmra.mrb[4].mxu0 %v1189_v28  ;;  %v18946_v28 = vld [vmem:[%s20437_s3 + $0x328] sm:$0xff]  }
  0x80   : > { %12258 = vmatmul.mubr.bf16.vlgmr.msra.gmra.mrb[4].mxu1 %v1191_v29  ;;  %16998 = vmatpush3.bf16.msra.mxu0 %v18893_v27  ;;  %v18945_v27 = vld [vmem:[%s20437_s3 + $0x3e8] sm:$0xff]  }
  0x81   : > { %17020 = vmatpush3.bf16.msra.mxu1 %v18894_v30  ;;  %16999 = vmatprep.subr.bf16.mxu0 %v18895_v31  ;;  %v18947_v29 = vld [vmem:[%s20437_s3 + $0x3a8] sm:$0xff]   ;;  %v18948_v30 = vld [vmem:[%s20437_s3 + $0x370] sm:$0xff]  }
  0x82   : > { %17021 = vmatprep.subr.bf16.mxu1 %v18896_v32  ;;  %12297 = vmatprep.mubr.bf16.mxu0 %v1194_v0  ;;  %v18949_v31 = vld [vmem:[%s20437_s3 + $0x3f0] sm:$0xff]   ;;  %v18972_v0 = vld [vmem:[%s20437_s3 + $0x498] sm:$0xff]  }
  0x83   : > { %12337 = vmatprep.mubr.bf16.mxu1 %v1196_v3  ;;  %v18950_v32 = vld [vmem:[%s20437_s3 + $0x330] sm:$0xff]   ;;  %v18975_v3 = vld [vmem:[%s20437_s3 + $0x420] sm:$0xff]  }
  0x84   : > { %17000 = vmatpush3.bf16.msra.mxu0 %v18897_v33  ;;  %v222_v33 = vld [vmem:[%s20447_s30 + $0x18] sm:$0xff] }
  0x85   : > { %17022 = vmatpush3.bf16.msra.mxu1 %v18898_v34  ;;  %17001 = vmatprep.subr.bf16.mxu0 %v18899_v35  ;;  %v18951_v34 = vld [vmem:[%s20437_s3 + $0x3b0] sm:$0xff]   ;;  %v361_v35 = vrot.slane %v222_v33, %v20485_v42 }
  0x86   : > { %17023 = vmatprep.subr.bf16.mxu1 %v18900_v36  ;;  %v354_v36 = vcombine.high %v222_v33, %v222_v33  ;;  %v18996_v33 = vld [vmem:[%s20437_s3 + $0x508] sm:$0xff]  }
  0x88   : > { %17002 = vmatpush3.bf16.msra.mxu0 %v18901_v37  ;;  %v18952_v37 = vld [vmem:[%s20437_s3 + $0x378] sm:$0xff]  }
  0x89   : > { %17024 = vmatpush3.bf16.msra.mxu1 %v18902_v38  ;;  %17003 = vmatprep.subr.bf16.mxu0 %v18903_v39  ;;  %v18953_v38 = vld [vmem:[%s20437_s3 + $0x3f8] sm:$0xff]   ;;  %v369_v39 = vcombine.high %v361_v35, %v361_v35 }
  0x8a   : > { %17025 = vmatprep.subr.bf16.mxu1 %v18904_v40  ;;  %v368_v40 = vrot.slane %v354_v36, %v20485_v42  ;;  %v18999_v36 = vld [vmem:[%s20437_s3 + $0x5d0] sm:$0xff]  }
  0x8c   : > { %17004 = vmatpush3.bf16.msra.mxu0 %v18905_v41  ;;  %v18954_v41 = vld [vmem:[%s20437_s3 + $0x338] sm:$0xff]  }
  0x8d   : > { %17026 = vmatpush3.bf16.msra.mxu1 %v18906_v43  ;;  %17005 = vmatprep.subr.bf16.mxu0 %v18907_v44  ;;  %v18955_v43 = vld [vmem:[%s20437_s3 + $0x3b8] sm:$0xff]   ;;  %v1198_v44 = vpack.c.bf16 %v369_v39, %v369_v39 }
  0x8e   : > { %17027 = vmatprep.subr.bf16.mxu1 %v18908_v45  ;;  %v370_v45 = vcombine.high %v368_v40, %v368_v40  ;;  %v19002_v39 = vld [vmem:[%s20437_s3 + $0x558] sm:$0xff]  }
  0x90   : > { %17006 = vmatpush3.bf16.msra.mxu0 %v18909_v46  ;;  %v18957_v46 = vld [vmem:[%s20437_s3 + $0x440] sm:$0xff]  }
  0x91   : > { %17028 = vmatpush3.bf16.msra.mxu1 %v18910_v47  ;;  %17007 = vmatprep.subr.bf16.mxu0 %v18911_v48  ;;  %v1200_v47 = vpack.c.bf16 %v370_v45, %v370_v45  ;;  %v18958_v48 = vld [vmem:[%s20437_s3 + $0x4c0] sm:$0xff]  }
  0x92   : > { %17029 = vmatprep.subr.bf16.mxu1 %v18912_v49  ;;  %v18959_v49 = vld [vmem:[%s20437_s3 + $0x400] sm:$0xff]  }
  0x93   : > { %v19007_v45 = vld [vmem:[%s20437_s3 + $0x5e0] sm:$0xff]  }
  0x94   : > { %17008 = vmatpush3.bf16.msra.mxu0 %v18913_v50  ;;  %v1197_v50 = vpack.c.bf16 %v361_v35, %v361_v35  ;;  %v18998_v35 = vld [vmem:[%s20437_s3 + $0x550] sm:$0xff]  }
  0x95   : > { %17030 = vmatpush3.bf16.msra.mxu1 %v18914_v51  ;;  %17009 = vmatprep.subr.bf16.mxu0 %v18915_v52  ;;  %v1199_v51 = vpack.c.bf16 %v368_v40, %v368_v40  ;;  %v18960_v52 = vld [vmem:[%s20437_s3 + $0x480] sm:$0xff]   ;;  %v19003_v40 = vld [vmem:[%s20437_s3 + $0x5d8] sm:$0xff]  }
  0x96   : > { %17031 = vmatprep.subr.bf16.mxu1 %v18916_v53  ;;  %v18961_v53 = vld [vmem:[%s20437_s3 + $0x448] sm:$0xff]  }
  0x98   : > { %17010 = vmatpush3.bf16.msra.mxu0 %v18917_v55  ;;  %v18963_v55 = vld [vmem:[%s20437_s3 + $0x408] sm:$0xff]  }
  0x99   : > { %17032 = vmatpush3.bf16.msra.mxu1 %v18918_v58  ;;  %17011 = vmatprep.subr.bf16.mxu0 %v18919_v59  ;;  %v18966_v58 = vld [vmem:[%s20437_s3 + $0x4d0] sm:$0xff]  }
  0x9a   : > { %17033 = vmatprep.subr.bf16.mxu1 %v18920_v62  ;;  %v18967_v59 = vld [vmem:[%s20437_s3 + $0x410] sm:$0xff]   ;;  %v18970_v62 = vld [vmem:[%s20437_s3 + $0x4d8] sm:$0xff]  }
  0x9c   : > { %17012 = vmatpush3.bf16.msra.mxu0 %v18921_v63  ;;  %v18971_v63 = vld [vmem:[%s20437_s3 + $0x418] sm:$0xff]  }
  0x9d   : > { %17034 = vmatpush3.bf16.msra.mxu1 %v18922_v2  ;;  %17041 = vmatprep.subr.bf16.mxu0 %v18924_v4  ;;  %v18974_v2 = vld [vmem:[%s20437_s3 + $0x4e0] sm:$0xff]  }
  0x9e   : > { %17063 = vmatprep.subr.bf16.mxu1 %v18925_v5  ;;  %v18976_v4 = vld [vmem:[%s20437_s3 + $0x4a0] sm:$0xff]   ;;  %v18977_v5 = vld [vmem:[%s20437_s3 + $0x468] sm:$0xff]  }
  0x9f   : > { %12298 = vmatmul.mubr.bf16.vlgmr.msra.gmra.mrb[8].mxu0 %v1193_v7  ;;  %v18979_v7 = vld [vmem:[%s20437_s3 + $0x428] sm:$0xff]  }
  0xa0   : > { %12338 = vmatmul.mubr.bf16.vlgmr.msra.gmra.mrb[8].mxu1 %v1195_v8  ;;  %17042 = vmatpush3.bf16.msra.mxu0 %v18926_v6  ;;  %v18978_v6 = vld [vmem:[%s20437_s3 + $0x4e8] sm:$0xff]  }
  0xa1   : > { %17064 = vmatpush3.bf16.msra.mxu1 %v18927_v9  ;;  %17043 = vmatprep.subr.bf16.mxu0 %v18928_v10  ;;  %v18980_v8 = vld [vmem:[%s20437_s3 + $0x4a8] sm:$0xff]   ;;  %v18981_v9 = vld [vmem:[%s20437_s3 + $0x470] sm:$0xff]  }
  0xa2   : > { %17065 = vmatprep.subr.bf16.mxu1 %v18929_v11  ;;  %12377 = vmatprep.mubr.bf16.mxu0 %v1198_v44  ;;  %v18982_v10 = vld [vmem:[%s20437_s3 + $0x4f0] sm:$0xff]   ;;  %v19006_v44 = vld [vmem:[%s20437_s3 + $0x560] sm:$0xff]  }
  0xa3   : > { %12417 = vmatprep.mubr.bf16.mxu1 %v1200_v47  ;;  %v18983_v11 = vld [vmem:[%s20437_s3 + $0x430] sm:$0xff]   ;;  %v19009_v47 = vld [vmem:[%s20437_s3 + $0x5a0] sm:$0xff]  }
  0xa4   : > { %17044 = vmatpush3.bf16.msra.mxu0 %v18930_v12  ;;  %v223_v12 = vld [vmem:[%s20447_s30 + $0x20] sm:$0xff] }
  0xa5   : > { %17066 = vmatpush3.bf16.msra.mxu1 %v18931_v13  ;;  %17045 = vmatprep.subr.bf16.mxu0 %v18932_v14  ;;  %v18984_v13 = vld [vmem:[%s20437_s3 + $0x4b0] sm:$0xff]   ;;  %v378_v14 = vrot.slane %v223_v12, %v20485_v42 }
  0xa6   : > { %17067 = vmatprep.subr.bf16.mxu1 %v18933_v15  ;;  %v371_v15 = vcombine.high %v223_v12, %v223_v12  ;;  %v19029_v12 = vld [vmem:[%s20437_s3 + $0x608] sm:$0xff]  }
  0xa8   : > { %17046 = vmatpush3.bf16.msra.mxu0 %v18934_v16  ;;  %v18985_v16 = vld [vmem:[%s20437_s3 + $0x478] sm:$0xff]  }
  0xa9   : > { %17068 = vmatpush3.bf16.msra.mxu1 %v18935_v17  ;;  %17047 = vmatprep.subr.bf16.mxu0 %v18936_v18  ;;  %v18986_v17 = vld [vmem:[%s20437_s3 + $0x4f8] sm:$0xff]   ;;  %v386_v18 = vcombine.high %v378_v14, %v378_v14 }
  0xaa   : > { %17069 = vmatprep.subr.bf16.mxu1 %v18937_v19  ;;  %v385_v19 = vrot.slane %v371_v15, %v20485_v42  ;;  %v19032_v15 = vld [vmem:[%s20437_s3 + $0x6d0] sm:$0xff]  }
  0xac   : > { %17048 = vmatpush3.bf16.msra.mxu0 %v18938_v20  ;;  %v18987_v20 = vld [vmem:[%s20437_s3 + $0x438] sm:$0xff]  }
  0xad   : > { %17070 = vmatpush3.bf16.msra.mxu1 %v18939_v21  ;;  %17049 = vmatprep.subr.bf16.mxu0 %v18940_v22  ;;  %v18988_v21 = vld [vmem:[%s20437_s3 + $0x4b8] sm:$0xff]   ;;  %v1202_v22 = vpack.c.bf16 %v386_v18, %v386_v18 }
  0xae   : > { %17071 = vmatprep.subr.bf16.mxu1 %v18941_v23  ;;  %v387_v23 = vcombine.high %v385_v19, %v385_v19  ;;  %v19035_v18 = vld [vmem:[%s20437_s3 + $0x658] sm:$0xff]  }
  0xb0   : > { %17050 = vmatpush3.bf16.msra.mxu0 %v18942_v24  ;;  %v18990_v24 = vld [vmem:[%s20437_s3 + $0x540] sm:$0xff]  }
  0xb1   : > { %17072 = vmatpush3.bf16.msra.mxu1 %v18943_v25  ;;  %17051 = vmatprep.subr.bf16.mxu0 %v18944_v26  ;;  %v1204_v25 = vpack.c.bf16 %v387_v23, %v387_v23  ;;  %v18991_v26 = vld [vmem:[%s20437_s3 + $0x5c0] sm:$0xff]  }
  0xb2   : > { %17073 = vmatprep.subr.bf16.mxu1 %v18945_v27  ;;  %v18992_v27 = vld [vmem:[%s20437_s3 + $0x500] sm:$0xff]  }
  0xb3   : > { %v19040_v23 = vld [vmem:[%s20437_s3 + $0x6e0] sm:$0xff]  }
  0xb4   : > { %17052 = vmatpush3.bf16.msra.mxu0 %v18946_v28  ;;  %v1201_v28 = vpack.c.bf16 %v378_v14, %v378_v14  ;;  %v19031_v14 = vld [vmem:[%s20437_s3 + $0x650] sm:$0xff]  }
  0xb5   : > { %17074 = vmatpush3.bf16.msra.mxu1 %v18947_v29  ;;  %17053 = vmatprep.subr.bf16.mxu0 %v18948_v30  ;;  %v1203_v29 = vpack.c.bf16 %v385_v19, %v385_v19  ;;  %v18993_v30 = vld [vmem:[%s20437_s3 + $0x580] sm:$0xff]   ;;  %v19036_v19 = vld [vmem:[%s20437_s3 + $0x6d8] sm:$0xff]  }
  0xb6   : > { %17075 = vmatprep.subr.bf16.mxu1 %v18949_v31  ;;  %v18994_v31 = vld [vmem:[%s20437_s3 + $0x548] sm:$0xff]  }
  0xb8   : > { %17054 = vmatpush3.bf16.msra.mxu0 %v18950_v32  ;;  %v18995_v32 = vld [vmem:[%s20437_s3 + $0x5c8] sm:$0xff]  }
  0xb9   : > { %17076 = vmatpush3.bf16.msra.mxu1 %v18951_v34  ;;  %17055 = vmatprep.subr.bf16.mxu0 %v18952_v37  ;;  %v18997_v34 = vld [vmem:[%s20437_s3 + $0x588] sm:$0xff]   ;;  %v19000_v37 = vld [vmem:[%s20437_s3 + $0x510] sm:$0xff]  }
  0xba   : > { %17077 = vmatprep.subr.bf16.mxu1 %v18953_v38  ;;  %v19001_v38 = vld [vmem:[%s20437_s3 + $0x590] sm:$0xff]  }
  0xbc   : > { %17056 = vmatpush3.bf16.msra.mxu0 %v18954_v41  ;;  %v19004_v41 = vld [vmem:[%s20437_s3 + $0x518] sm:$0xff]  }
  0xbd   : > { %17078 = vmatpush3.bf16.msra.mxu1 %v18955_v43  ;;  %17085 = vmatprep.subr.bf16.mxu0 %v18957_v46  ;;  %v19005_v43 = vld [vmem:[%s20437_s3 + $0x598] sm:$0xff]   ;;  %v19008_v46 = vld [vmem:[%s20437_s3 + $0x520] sm:$0xff]  }
  0xbe   : > { %17107 = vmatprep.subr.bf16.mxu1 %v18958_v48  ;;  %v19010_v48 = vld [vmem:[%s20437_s3 + $0x568] sm:$0xff]  }
  0xbf   : > { %12378 = vmatmul.mubr.bf16.vlgmr.msra.gmra.mrb[12].mxu0 %v1197_v50  ;;  %v19012_v50 = vld [vmem:[%s20437_s3 + $0x528] sm:$0xff]  }
  0xc0   : > { %12418 = vmatmul.mubr.bf16.vlgmr.msra.gmra.mrb[12].mxu1 %v1199_v51  ;;  %17086 = vmatpush3.bf16.msra.mxu0 %v18959_v49  ;;  %v19011_v49 = vld [vmem:[%s20437_s3 + $0x5e8] sm:$0xff]  }
  0xc1   : > { %17108 = vmatpush3.bf16.msra.mxu1 %v18960_v52  ;;  %17087 = vmatprep.subr.bf16.mxu0 %v18961_v53  ;;  %v19013_v51 = vld [vmem:[%s20437_s3 + $0x5a8] sm:$0xff]   ;;  %v19014_v52 = vld [vmem:[%s20437_s3 + $0x570] sm:$0xff]  }
  0xc2   : > { %17109 = vmatprep.subr.bf16.mxu1 %v18962_v54  ;;  %12457 = vmatprep.mubr.bf16.mxu0 %v1202_v22  ;;  %v19015_v53 = vld [vmem:[%s20437_s3 + $0x5f0] sm:$0xff]   ;;  %v19039_v22 = vld [vmem:[%s20437_s3 + $0x660] sm:$0xff]  }
  0xc3   : > { %12497 = vmatprep.mubr.bf16.mxu1 %v1204_v25  ;;  %v19016_v54 = vld [vmem:[%s20437_s3 + $0x530] sm:$0xff]   ;;  %v19042_v25 = vld [vmem:[%s20437_s3 + $0x6a0] sm:$0xff]  }
  0xc4   : > { %17088 = vmatpush3.bf16.msra.mxu0 %v18963_v55  ;;  %v224_v55 = vld [vmem:[%s20447_s30 + $0x28] sm:$0xff] }
  0xc5   : > { %17110 = vmatpush3.bf16.msra.mxu1 %v18964_v56  ;;  %17089 = vmatprep.subr.bf16.mxu0 %v18965_v57  ;;  %v19017_v56 = vld [vmem:[%s20437_s3 + $0x5b0] sm:$0xff]   ;;  %v395_v57 = vrot.slane %v224_v55, %v20485_v42 }
  0xc6   : > { %17111 = vmatprep.subr.bf16.mxu1 %v18966_v58  ;;  %v388_v58 = vcombine.high %v224_v55, %v224_v55  ;;  %v19062_v55 = vld [vmem:[%s20437_s3 + $0x708] sm:$0xff]  }
  0xc8   : > { %17090 = vmatpush3.bf16.msra.mxu0 %v18967_v59  ;;  %v19018_v59 = vld [vmem:[%s20437_s3 + $0x578] sm:$0xff]  }
  0xc9   : > { %17112 = vmatpush3.bf16.msra.mxu1 %v18968_v60  ;;  %17091 = vmatprep.subr.bf16.mxu0 %v18969_v61  ;;  %v19019_v60 = vld [vmem:[%s20437_s3 + $0x5f8] sm:$0xff]   ;;  %v403_v61 = vcombine.high %v395_v57, %v395_v57 }
  0xca   : > { %17113 = vmatprep.subr.bf16.mxu1 %v18970_v62  ;;  %v402_v62 = vrot.slane %v388_v58, %v20485_v42  ;;  %v19065_v58 = vld [vmem:[%s20437_s3 + $0x7d0] sm:$0xff]  }
  0xcc   : > { %17092 = vmatpush3.bf16.msra.mxu0 %v18971_v63  ;;  %v19020_v63 = vld [vmem:[%s20437_s3 + $0x538] sm:$0xff]  }
  0xcd   : > { %17114 = vmatpush3.bf16.msra.mxu1 %v18972_v0  ;;  %17093 = vmatprep.subr.bf16.mxu0 %v18973_v1  ;;  %v19021_v0 = vld [vmem:[%s20437_s3 + $0x5b8] sm:$0xff]   ;;  %v1206_v1 = vpack.c.bf16 %v403_v61, %v403_v61 }
  0xce   : > { %17115 = vmatprep.subr.bf16.mxu1 %v18974_v2  ;;  %v404_v2 = vcombine.high %v402_v62, %v402_v62  ;;  %v19068_v61 = vld [vmem:[%s20437_s3 + $0x758] sm:$0xff]  }
  0xd0   : > { %17094 = vmatpush3.bf16.msra.mxu0 %v18975_v3  ;;  %v19023_v3 = vld [vmem:[%s20437_s3 + $0x640] sm:$0xff]  }
  0xd1   : > { %17116 = vmatpush3.bf16.msra.mxu1 %v18976_v4  ;;  %17095 = vmatprep.subr.bf16.mxu0 %v18977_v5  ;;  %v1208_v4 = vpack.c.bf16 %v404_v2, %v404_v2  ;;  %v19024_v5 = vld [vmem:[%s20437_s3 + $0x6c0] sm:$0xff]  }
  0xd2   : > { %17117 = vmatprep.subr.bf16.mxu1 %v18978_v6  ;;  %v19025_v6 = vld [vmem:[%s20437_s3 + $0x600] sm:$0xff]  }
  0xd3   : > { %v19073_v2 = vld [vmem:[%s20437_s3 + $0x7e0] sm:$0xff]  }
  0xd4   : > { %17096 = vmatpush3.bf16.msra.mxu0 %v18979_v7  ;;  %v1205_v7 = vpack.c.bf16 %v395_v57, %v395_v57  ;;  %v19064_v57 = vld [vmem:[%s20437_s3 + $0x750] sm:$0xff]  }
  0xd5   : > { %17118 = vmatpush3.bf16.msra.mxu1 %v18980_v8  ;;  %17097 = vmatprep.subr.bf16.mxu0 %v18981_v9  ;;  %v1207_v8 = vpack.c.bf16 %v402_v62, %v402_v62  ;;  %v19026_v9 = vld [vmem:[%s20437_s3 + $0x680] sm:$0xff]   ;;  %v19069_v62 = vld [vmem:[%s20437_s3 + $0x7d8] sm:$0xff]  }
  0xd6   : > { %17119 = vmatprep.subr.bf16.mxu1 %v18982_v10  ;;  %v19027_v10 = vld [vmem:[%s20437_s3 + $0x648] sm:$0xff]  }
  0xd8   : > { %17098 = vmatpush3.bf16.msra.mxu0 %v18983_v11  ;;  %v19028_v11 = vld [vmem:[%s20437_s3 + $0x6c8] sm:$0xff]  }
  0xd9   : > { %17120 = vmatpush3.bf16.msra.mxu1 %v18984_v13  ;;  %17099 = vmatprep.subr.bf16.mxu0 %v18985_v16  ;;  %v19030_v13 = vld [vmem:[%s20437_s3 + $0x688] sm:$0xff]   ;;  %v19033_v16 = vld [vmem:[%s20437_s3 + $0x610] sm:$0xff]  }
  0xda   : > { %17121 = vmatprep.subr.bf16.mxu1 %v18986_v17  ;;  %v19034_v17 = vld [vmem:[%s20437_s3 + $0x690] sm:$0xff]  }
  0xdc   : > { %17100 = vmatpush3.bf16.msra.mxu0 %v18987_v20  ;;  %v19037_v20 = vld [vmem:[%s20437_s3 + $0x618] sm:$0xff]  }
  0xdd   : > { %17122 = vmatpush3.bf16.msra.mxu1 %v18988_v21  ;;  %17129 = vmatprep.subr.bf16.mxu0 %v18990_v24  ;;  %v19038_v21 = vld [vmem:[%s20437_s3 + $0x698] sm:$0xff]   ;;  %v19041_v24 = vld [vmem:[%s20437_s3 + $0x620] sm:$0xff]  }
  0xde   : > { %17151 = vmatprep.subr.bf16.mxu1 %v18991_v26  ;;  %v19043_v26 = vld [vmem:[%s20437_s3 + $0x668] sm:$0xff]  }
  0xdf   : > { %12458 = vmatmul.mubr.bf16.vlgmr.msra.gmra.mrb[16].mxu0 %v1201_v28  ;;  %v19045_v28 = vld [vmem:[%s20437_s3 + $0x628] sm:$0xff]  }
  0xe0   : > { %12498 = vmatmul.mubr.bf16.vlgmr.msra.gmra.mrb[16].mxu1 %v1203_v29  ;;  %17130 = vmatpush3.bf16.msra.mxu0 %v18992_v27  ;;  %v19044_v27 = vld [vmem:[%s20437_s3 + $0x6e8] sm:$0xff]  }
  0xe1   : > { %17152 = vmatpush3.bf16.msra.mxu1 %v18993_v30  ;;  %17131 = vmatprep.subr.bf16.mxu0 %v18994_v31  ;;  %v19046_v29 = vld [vmem:[%s20437_s3 + $0x6a8] sm:$0xff]   ;;  %v19047_v30 = vld [vmem:[%s20437_s3 + $0x670] sm:$0xff]  }
  0xe2   : > { %17153 = vmatprep.subr.bf16.mxu1 %v18995_v32  ;;  %12537 = vmatprep.mubr.bf16.mxu0 %v1206_v1  ;;  %v19048_v31 = vld [vmem:[%s20437_s3 + $0x6f0] sm:$0xff]   ;;  %v19072_v1 = vld [vmem:[%s20437_s3 + $0x760] sm:$0xff]  }
  0xe3   : > { %12577 = vmatprep.mubr.bf16.mxu1 %v1208_v4  ;;  %v19049_v32 = vld [vmem:[%s20437_s3 + $0x630] sm:$0xff]   ;;  %v19075_v4 = vld [vmem:[%s20437_s3 + $0x7a0] sm:$0xff]  }
  0xe4   : > { %17132 = vmatpush3.bf16.msra.mxu0 %v18996_v33  ;;  %v19050_v33 = vld [vmem:[%s20437_s3 + $0x6b0] sm:$0xff]  }
  0xe5   : > { %17154 = vmatpush3.bf16.msra.mxu1 %v18997_v34  ;;  %17133 = vmatprep.subr.bf16.mxu0 %v18998_v35  ;;  %v225_v34 = vld [vmem:[%s20447_s30 + $0x30] sm:$0xff]  ;;  %v19051_v35 = vld [vmem:[%s20437_s3 + $0x678] sm:$0xff]  }
  0xe6   : > { %17155 = vmatprep.subr.bf16.mxu1 %v18999_v36  ;;  %v412_v36 = vrot.slane %v225_v34, %v20485_v42 }
  0xe8   : > { %17134 = vmatpush3.bf16.msra.mxu0 %v19000_v37  ;;  %v405_v37 = vcombine.high %v225_v34, %v225_v34  ;;  %v19089_v34 = vld [vmem:[%s20437_s3 + $0x840] sm:$0xff]  }
  0xe9   : > { %17156 = vmatpush3.bf16.msra.mxu1 %v19001_v38  ;;  %17135 = vmatprep.subr.bf16.mxu0 %v19002_v39  ;;  %v19052_v38 = vld [vmem:[%s20437_s3 + $0x6f8] sm:$0xff]  }
  0xea   : > { %17157 = vmatprep.subr.bf16.mxu1 %v19003_v40  ;;  %v19053_v39 = vld [vmem:[%s20437_s3 + $0x638] sm:$0xff]   ;;  %v420_v40 = vcombine.high %v412_v36, %v412_v36 }
  0xec   : > { %17136 = vmatpush3.bf16.msra.mxu0 %v19004_v41  ;;  %v419_v41 = vrot.slane %v405_v37, %v20485_v42  ;;  %v19091_v37 = vld [vmem:[%s20437_s3 + $0x800] sm:$0xff]  }
  0xed   : > { %17158 = vmatpush3.bf16.msra.mxu1 %v19005_v43  ;;  %17137 = vmatprep.subr.bf16.mxu0 %v19006_v44  ;;  %v19054_v43 = vld [vmem:[%s20437_s3 + $0x6b8] sm:$0xff]   ;;  %v1210_v44 = vpack.c.bf16 %v420_v40, %v420_v40 }
  0xee   : > { %17159 = vmatprep.subr.bf16.mxu1 %v19007_v45  ;;  %v421_v45 = vcombine.high %v419_v41, %v419_v41 }
  0xf0   : > { %17138 = vmatpush3.bf16.msra.mxu0 %v19008_v46  ;;  %v19056_v46 = vld [vmem:[%s20437_s3 + $0x740] sm:$0xff]  }
  0xf1   : > { %17160 = vmatpush3.bf16.msra.mxu1 %v19009_v47  ;;  %17139 = vmatprep.subr.bf16.mxu0 %v19010_v48  ;;  %v19057_v47 = vld [vmem:[%s20437_s3 + $0x7c0] sm:$0xff]   ;;  %v1212_v48 = vpack.c.bf16 %v421_v45, %v421_v45  ;;  %v19095_v45 = vld [vmem:[%s20437_s3 + $0x808] sm:$0xff]  }
  0xf2   : > { %17161 = vmatprep.subr.bf16.mxu1 %v19011_v49  ;;  %v19058_v49 = vld [vmem:[%s20437_s3 + $0x700] sm:$0xff]  }
  0xf4   : > { %17140 = vmatpush3.bf16.msra.mxu0 %v19012_v50  ;;  %v1209_v50 = vpack.c.bf16 %v412_v36, %v412_v36  ;;  %v19090_v36 = vld [vmem:[%s20437_s3 + $0x8c0] sm:$0xff]  }
  0xf5   : > { %17162 = vmatpush3.bf16.msra.mxu1 %v19013_v51  ;;  %17141 = vmatprep.subr.bf16.mxu0 %v19014_v52  ;;  %v1211_v51 = vpack.c.bf16 %v419_v41, %v419_v41  ;;  %v19059_v52 = vld [vmem:[%s20437_s3 + $0x780] sm:$0xff]  }
  0xf6   : > { %17163 = vmatprep.subr.bf16.mxu1 %v19015_v53  ;;  %v19060_v53 = vld [vmem:[%s20437_s3 + $0x748] sm:$0xff]   ;;  %v19092_v41 = vld [vmem:[%s20437_s3 + $0x880] sm:$0xff]  }
  0xf8   : > { %17142 = vmatpush3.bf16.msra.mxu0 %v19016_v54  ;;  %v19061_v54 = vld [vmem:[%s20437_s3 + $0x7c8] sm:$0xff]  }
  0xf9   : > { %17164 = vmatpush3.bf16.msra.mxu1 %v19017_v56  ;;  %17143 = vmatprep.subr.bf16.mxu0 %v19018_v59  ;;  %v19063_v56 = vld [vmem:[%s20437_s3 + $0x788] sm:$0xff]   ;;  %v19066_v59 = vld [vmem:[%s20437_s3 + $0x710] sm:$0xff]  }
  0xfa   : > { %17165 = vmatprep.subr.bf16.mxu1 %v19019_v60  ;;  %v19067_v60 = vld [vmem:[%s20437_s3 + $0x790] sm:$0xff]  }
  0xfc   : > { %17144 = vmatpush3.bf16.msra.mxu0 %v19020_v63  ;;  %v19070_v63 = vld [vmem:[%s20437_s3 + $0x718] sm:$0xff]  }
  0xfd   : > { %17166 = vmatpush3.bf16.msra.mxu1 %v19021_v0  ;;  %17173 = vmatprep.subr.bf16.mxu0 %v19023_v3  ;;  %v19071_v0 = vld [vmem:[%s20437_s3 + $0x798] sm:$0xff]   ;;  %v19074_v3 = vld [vmem:[%s20437_s3 + $0x720] sm:$0xff]  }
  0xfe   : > { %17195 = vmatprep.subr.bf16.mxu1 %v19024_v5  ;;  %v19076_v5 = vld [vmem:[%s20437_s3 + $0x768] sm:$0xff]  }
  0xff   : > { %12538 = vmatmul.mubr.bf16.vlgmr.msra.gmra.mrb[20].mxu0 %v1205_v7  ;;  %v19078_v7 = vld [vmem:[%s20437_s3 + $0x728] sm:$0xff]  }
 0x100   : > { %12578 = vmatmul.mubr.bf16.vlgmr.msra.gmra.mrb[20].mxu1 %v1207_v8  ;;  %17174 = vmatpush3.bf16.msra.mxu0 %v19025_v6  ;;  %v19077_v6 = vld [vmem:[%s20437_s3 + $0x7e8] sm:$0xff]  }
 0x101   : > { %17196 = vmatpush3.bf16.msra.mxu1 %v19026_v9  ;;  %17175 = vmatprep.subr.bf16.mxu0 %v19027_v10  ;;  %v19079_v8 = vld [vmem:[%s20437_s3 + $0x7a8] sm:$0xff]   ;;  %v19080_v9 = vld [vmem:[%s20437_s3 + $0x770] sm:$0xff]  }
 0x102   : > { %17197 = vmatprep.subr.bf16.mxu1 %v19028_v11  ;;  %12617 = vmatprep.mubr.bf16.mxu0 %v1210_v44  ;;  %v19081_v10 = vld [vmem:[%s20437_s3 + $0x7f0] sm:$0xff]   ;;  %v19094_v44 = vld [vmem:[%s20437_s3 + $0x8c8] sm:$0xff]  }
 0x103   : > { %12657 = vmatprep.mubr.bf16.mxu1 %v1212_v48  ;;  %v19098_v48 = vld [vmem:[%s20437_s3 + $0x8d0] sm:$0xff]  }
 0x104   : > { %17176 = vmatpush3.bf16.msra.mxu0 %v19029_v12 }
 0x105   : > { %17198 = vmatpush3.bf16.msra.mxu1 %v19030_v13  ;;  %17177 = vmatprep.subr.bf16.mxu0 %v19031_v14  ;;  %v19082_v13 = vld [vmem:[%s20437_s3 + $0x730] sm:$0xff]  }
 0x106   : > { %17199 = vmatprep.subr.bf16.mxu1 %v19032_v15  ;;  %v19083_v14 = vld [vmem:[%s20437_s3 + $0x7b0] sm:$0xff]  }
 0x108   : > { %17178 = vmatpush3.bf16.msra.mxu0 %v19033_v16 }
 0x109   : > { %17200 = vmatpush3.bf16.msra.mxu1 %v19034_v17  ;;  %17179 = vmatprep.subr.bf16.mxu0 %v19035_v18  ;;  %v19084_v17 = vld [vmem:[%s20437_s3 + $0x778] sm:$0xff]  }
 0x10a   : > { %17201 = vmatprep.subr.bf16.mxu1 %v19036_v19  ;;  %v19085_v18 = vld [vmem:[%s20437_s3 + $0x7f8] sm:$0xff]  }
 0x10b   : > { %v226_v19 = vld [vmem:[%s20447_s30 + $0x38] sm:$0xff] }
 0x10c   : > { %17180 = vmatpush3.bf16.msra.mxu0 %v19037_v20 }
 0x10d   : > { %17202 = vmatpush3.bf16.msra.mxu1 %v19038_v21  ;;  %17181 = vmatprep.subr.bf16.mxu0 %v19039_v22 }
 0x10e   : > { %17203 = vmatprep.subr.bf16.mxu1 %v19040_v23 }
 0x110   : > { %17182 = vmatpush3.bf16.msra.mxu0 %v19041_v24  ;;  %v429_v24 = vrot.slane %v226_v19, %v20485_v42 }
 0x111   : > { %17204 = vmatpush3.bf16.msra.mxu1 %v19042_v25  ;;  %17183 = vmatprep.subr.bf16.mxu0 %v19043_v26 }
 0x112   : > { %17205 = vmatprep.subr.bf16.mxu1 %v19044_v27  ;;  %v422_v27 = vcombine.high %v226_v19, %v226_v19  ;;  %v19119_v19 = vld [vmem:[%s20437_s3 + $0x838] sm:$0xff]  }
 0x114   : > { %17184 = vmatpush3.bf16.msra.mxu0 %v19045_v28 }
 0x115   : > { %17206 = vmatpush3.bf16.msra.mxu1 %v19046_v29  ;;  %17185 = vmatprep.subr.bf16.mxu0 %v19047_v30  ;;  %v19086_v29 = vld [vmem:[%s20437_s3 + $0x738] sm:$0xff]   ;;  %v437_v30 = vcombine.high %v429_v24, %v429_v24 }
 0x116   : > { %17207 = vmatprep.subr.bf16.mxu1 %v19048_v31  ;;  %v19087_v31 = vld [vmem:[%s20437_s3 + $0x7b8] sm:$0xff]  }
 0x118   : > { %17186 = vmatpush3.bf16.msra.mxu0 %v19049_v32  ;;  %v436_v32 = vrot.slane %v422_v27, %v20485_v42  ;;  %v19123_v27 = vld [vmem:[%s20437_s3 + $0x9c0] sm:$0xff]  }
 0x119   : > { %17208 = vmatpush3.bf16.msra.mxu1 %v19050_v33  ;;  %17187 = vmatprep.subr.bf16.mxu0 %v19051_v35  ;;  %v1214_v33 = vpack.c.bf16 %v437_v30, %v437_v30 }
 0x11a   : > { %17209 = vmatprep.subr.bf16.mxu1 %v19052_v38  ;;  %v438_v35 = vcombine.high %v436_v32, %v436_v32  ;;  %v1215_v40 = vpack.c.bf16 %v436_v32, %v436_v32  ;;  %v19125_v32 = vld [vmem:[%s20437_s3 + $0x980] sm:$0xff]  }
 0x11c   : > { %17188 = vmatpush3.bf16.msra.mxu0 %v19053_v39  ;;  %v1216_v38 = vpack.c.bf16 %v438_v35, %v438_v35  ;;  %v1213_v39 = vpack.c.bf16 %v429_v24, %v429_v24  ;;  %v19122_v24 = vld [vmem:[%s20437_s3 + $0x940] sm:$0xff]   ;;  %v19128_v35 = vld [vmem:[%s20437_s3 + $0x908] sm:$0xff]  }
 0x11d   : > { %17210 = vmatpush3.bf16.msra.mxu1 %v19054_v43  ;;  %17217 = vmatprep.subr.bf16.mxu0 %v19056_v46  ;;  %v19093_v43 = vld [vmem:[%s20437_s3 + $0x848] sm:$0xff]  }
 0x11e   : > { %17239 = vmatprep.subr.bf16.mxu1 %v19057_v47  ;;  %v19096_v46 = vld [vmem:[%s20437_s3 + $0x888] sm:$0xff]   ;;  %v19097_v47 = vld [vmem:[%s20437_s3 + $0x850] sm:$0xff]  }
 0x11f   : > { %12618 = vmatmul.mubr.bf16.vlgmr.msra.gmra.mrb[24].mxu0 %v1209_v50  ;;  %v19100_v50 = vld [vmem:[%s20437_s3 + $0x890] sm:$0xff]  }
 0x120   : > { %12658 = vmatmul.mubr.bf16.vlgmr.msra.gmra.mrb[24].mxu1 %v1211_v51  ;;  %17218 = vmatpush3.bf16.msra.mxu0 %v19058_v49  ;;  %v19099_v49 = vld [vmem:[%s20437_s3 + $0x810] sm:$0xff]   ;;  %v19101_v51 = vld [vmem:[%s20437_s3 + $0x858] sm:$0xff]  }
 0x121   : > { %17240 = vmatpush3.bf16.msra.mxu1 %v19059_v52  ;;  %17219 = vmatprep.subr.bf16.mxu0 %v19060_v53  ;;  %v19102_v52 = vld [vmem:[%s20437_s3 + $0x8d8] sm:$0xff]  }
 0x122   : > { %17241 = vmatprep.subr.bf16.mxu1 %v19061_v54  ;;  %12697 = vmatprep.mubr.bf16.mxu0 %v1214_v33  ;;  %v19103_v53 = vld [vmem:[%s20437_s3 + $0x818] sm:$0xff]   ;;  %v19126_v33 = vld [vmem:[%s20437_s3 + $0x948] sm:$0xff]  }
 0x123   : > { %12737 = vmatprep.mubr.bf16.mxu1 %v1216_v38  ;;  %v19104_v54 = vld [vmem:[%s20437_s3 + $0x898] sm:$0xff]   ;;  %v19131_v38 = vld [vmem:[%s20437_s3 + $0x9d0] sm:$0xff]  }
 0x124   : > { %17220 = vmatpush3.bf16.msra.mxu0 %v19062_v55  ;;  %v19105_v55 = vld [vmem:[%s20437_s3 + $0x860] sm:$0xff]  }
 0x125   : > { %17242 = vmatpush3.bf16.msra.mxu1 %v19063_v56  ;;  %17221 = vmatprep.subr.bf16.mxu0 %v19064_v57  ;;  %v19106_v56 = vld [vmem:[%s20437_s3 + $0x8e0] sm:$0xff]  }
 0x126   : > { %17243 = vmatprep.subr.bf16.mxu1 %v19065_v58  ;;  %v19107_v57 = vld [vmem:[%s20437_s3 + $0x820] sm:$0xff]  }
 0x127   : > { %v19108_v58 = vld [vmem:[%s20437_s3 + $0x8a0] sm:$0xff]  }
 0x128   : > { %17222 = vmatpush3.bf16.msra.mxu0 %v19066_v59  ;;  %v19109_v59 = vld [vmem:[%s20437_s3 + $0x868] sm:$0xff]  }
 0x129   : > { %17244 = vmatpush3.bf16.msra.mxu1 %v19067_v60  ;;  %17223 = vmatprep.subr.bf16.mxu0 %v19068_v61  ;;  %v19110_v60 = vld [vmem:[%s20437_s3 + $0x8e8] sm:$0xff]  }
 0x12a   : > { %17245 = vmatprep.subr.bf16.mxu1 %v19069_v62  ;;  %v19111_v61 = vld [vmem:[%s20437_s3 + $0x828] sm:$0xff]  }
 0x12b   : > { %v19112_v62 = vld [vmem:[%s20437_s3 + $0x8a8] sm:$0xff]  }
 0x12c   : > { %17224 = vmatpush3.bf16.msra.mxu0 %v19070_v63  ;;  %v19113_v63 = vld [vmem:[%s20437_s3 + $0x870] sm:$0xff]  }
 0x12d   : > { %17246 = vmatpush3.bf16.msra.mxu1 %v19071_v0  ;;  %17225 = vmatprep.subr.bf16.mxu0 %v19072_v1  ;;  %v19114_v0 = vld [vmem:[%s20437_s3 + $0x8f0] sm:$0xff]  }
 0x12e   : > { %17247 = vmatprep.subr.bf16.mxu1 %v19073_v2 }
 0x130   : > { %17226 = vmatpush3.bf16.msra.mxu0 %v19074_v3  ;;  %v19115_v3 = vld [vmem:[%s20437_s3 + $0x830] sm:$0xff]  }
 0x131   : > { %17248 = vmatpush3.bf16.msra.mxu1 %v19075_v4  ;;  %17227 = vmatprep.subr.bf16.mxu0 %v19076_v5  ;;  %v19116_v4 = vld [vmem:[%s20437_s3 + $0x8b0] sm:$0xff]  }
 0x132   : > { %17249 = vmatprep.subr.bf16.mxu1 %v19077_v6  ;;  %v16925_v11 = vpop.f32.mrb[0].mxu0 }
 0x133   : > { %v16947_v12 = vpop.f32.mrb[0].mxu1  ;;  %v16926_v15 = vpop.f32.mrb[1].mxu0 }
 0x134   : > { %v16948_v16 = vpop.f32.mrb[1].mxu1  ;;  %v16927_v20 = vadd.f32 %v16926_v15, %v16925_v11  ;;  %v16928_v22 = vpop.f32.mrb[2].mxu0  ;;  %17228 = vmatpush3.bf16.msra.mxu0 %v19078_v7  ;;  %v19117_v7 = vld [vmem:[%s20437_s3 + $0x878] sm:$0xff]  }
 0x135   : > { %v16949_v21 = vadd.f32 %v16948_v16, %v16947_v12  ;;  %v16950_v23 = vpop.f32.mrb[2].mxu1  ;;  %17250 = vmatpush3.bf16.msra.mxu1 %v19079_v8  ;;  %v16929_v25 = vpop.f32.mrb[3].mxu0  ;;  %17229 = vmatprep.subr.bf16.mxu0 %v19080_v9  ;;  %v19118_v12 = vld [vmem:[%s20437_s3 + $0x8f8] sm:$0xff]  }
 0x136   : > { %v16951_v26 = vpop.f32.mrb[3].mxu1  ;;  %17251 = vmatprep.subr.bf16.mxu1 %v19081_v10 }
 0x137   : > { %v20729_v28 = vadd.f32 %v16949_v21, %v16927_v20  ;;  %v19120_v20 = vld [vmem:[%s20437_s3 + $0x8b8] sm:$0xff]  }
 0x138   : > { %17230 = vmatpush3.bf16.msra.mxu0 %v19082_v13  ;;  %v227_v13 = vld [vmem:[%s20447_s30 + $0x40] sm:$0xff] }
 0x139   : > { %17252 = vmatpush3.bf16.msra.mxu1 %v19083_v14  ;;  %17231 = vmatprep.subr.bf16.mxu0 %v19084_v17  ;;  %v446_v16 = vrot.slane %v227_v13, %v20485_v42  ;;  %v439_v17 = vcombine.high %v227_v13, %v227_v13 }
 0x13a   : > { %17253 = vmatprep.subr.bf16.mxu1 %v19085_v18 }
 0x13b   : > { %v454_v21 = vcombine.high %v446_v16, %v446_v16  ;;  %v453_v22 = vrot.slane %v439_v17, %v20485_v42  ;;  %v1217_v30 = vpack.c.bf16 %v446_v16, %v446_v16  ;;  %v19156_v16 = vld [vmem:[%s20437_s3 + $0xac0] sm:$0xff]  }
 0x13c   : > { %17232 = vmatpush3.bf16.msra.mxu0 %v19086_v29 }
 0x13d   : > { %17254 = vmatpush3.bf16.msra.mxu1 %v19087_v31  ;;  %17261 = vmatprep.subr.bf16.mxu0 %v19089_v34  ;;  %v1218_v25 = vpack.c.bf16 %v454_v21, %v454_v21  ;;  %v455_v26 = vcombine.high %v453_v22, %v453_v22  ;;  %v1219_v31 = vpack.c.bf16 %v453_v22, %v453_v22  ;;  %v19127_v34 = vld [vmem:[%s20437_s3 + $0x9c8] sm:$0xff]   ;;  %v19158_v22 = vld [vmem:[%s20437_s3 + $0xa80] sm:$0xff]  }
 0x13e   : > { %17283 = vmatprep.subr.bf16.mxu1 %v19090_v36  ;;  %v19129_v36 = vld [vmem:[%s20437_s3 + $0x988] sm:$0xff]  }
 0x13f   : > { %12698 = vmatmul.mubr.bf16.vlgmr.msra.gmra.mrb[28].mxu0 %v1213_v39  ;;  %v1220_v29 = vpack.c.bf16 %v455_v26, %v455_v26  ;;  %v19132_v39 = vld [vmem:[%s20437_s3 + $0x910] sm:$0xff]   ;;  %v19161_v26 = vld [vmem:[%s20437_s3 + $0xa08] sm:$0xff]  }
 0x140   : > { %12738 = vmatmul.mubr.bf16.vlgmr.msra.gmra.mrb[28].mxu1 %v1215_v40  ;;  %17262 = vmatpush3.bf16.msra.mxu0 %v19091_v37  ;;  %v19130_v37 = vld [vmem:[%s20437_s3 + $0x950] sm:$0xff]  }
 0x141   : > { %17284 = vmatpush3.bf16.msra.mxu1 %v19092_v41  ;;  %17263 = vmatprep.subr.bf16.mxu0 %v19093_v43  ;;  %v19133_v40 = vld [vmem:[%s20437_s3 + $0x990] sm:$0xff]   ;;  %v19134_v41 = vld [vmem:[%s20437_s3 + $0x958] sm:$0xff]  }
 0x142   : > { %17285 = vmatprep.subr.bf16.mxu1 %v19094_v44  ;;  %12777 = vmatprep.mubr.bf16.mxu0 %v1218_v25  ;;  %v19135_v43 = vld [vmem:[%s20437_s3 + $0x9d8] sm:$0xff]   ;;  %v19160_v25 = vld [vmem:[%s20437_s3 + $0xac8] sm:$0xff]  }
 0x143   : > { %12817 = vmatprep.mubr.bf16.mxu1 %v1220_v29  ;;  %v19136_v44 = vld [vmem:[%s20437_s3 + $0x918] sm:$0xff]   ;;  %v19164_v29 = vld [vmem:[%s20437_s3 + $0xad0] sm:$0xff]  }
 0x144   : > { %17264 = vmatpush3.bf16.msra.mxu0 %v19095_v45  ;;  %v19137_v45 = vld [vmem:[%s20437_s3 + $0x998] sm:$0xff]  }
 0x145   : > { %17286 = vmatpush3.bf16.msra.mxu1 %v19096_v46  ;;  %17265 = vmatprep.subr.bf16.mxu0 %v19097_v47  ;;  %v19138_v46 = vld [vmem:[%s20437_s3 + $0x960] sm:$0xff]  }
 0x146   : > { %17287 = vmatprep.subr.bf16.mxu1 %v19098_v48  ;;  %v19139_v47 = vld [vmem:[%s20437_s3 + $0x9e0] sm:$0xff]  }
 0x147   : > { %v19140_v48 = vld [vmem:[%s20437_s3 + $0x920] sm:$0xff]  }
 0x148   : > { %17266 = vmatpush3.bf16.msra.mxu0 %v19099_v49  ;;  %v19141_v49 = vld [vmem:[%s20437_s3 + $0x9a0] sm:$0xff]  }
 0x149   : > { %17288 = vmatpush3.bf16.msra.mxu1 %v19100_v50  ;;  %17267 = vmatprep.subr.bf16.mxu0 %v19101_v51  ;;  %v19142_v50 = vld [vmem:[%s20437_s3 + $0x968] sm:$0xff]  }
 0x14a   : > { %17289 = vmatprep.subr.bf16.mxu1 %v19102_v52  ;;  %v19143_v51 = vld [vmem:[%s20437_s3 + $0x9e8] sm:$0xff]  }
 0x14b   : > { %v19144_v52 = vld [vmem:[%s20437_s3 + $0x928] sm:$0xff]  }
 0x14c   : > { %17268 = vmatpush3.bf16.msra.mxu0 %v19103_v53  ;;  %v19145_v53 = vld [vmem:[%s20437_s3 + $0x9a8] sm:$0xff]  }
 0x14d   : > { %17290 = vmatpush3.bf16.msra.mxu1 %v19104_v54  ;;  %17269 = vmatprep.subr.bf16.mxu0 %v19105_v55  ;;  %v19146_v54 = vld [vmem:[%s20437_s3 + $0x970] sm:$0xff]  }
 0x14e   : > { %17291 = vmatprep.subr.bf16.mxu1 %v19106_v56  ;;  %v19147_v55 = vld [vmem:[%s20437_s3 + $0x9f0] sm:$0xff]  }
 0x150   : > { %17270 = vmatpush3.bf16.msra.mxu0 %v19107_v57 }
 0x151   : > { %17292 = vmatpush3.bf16.msra.mxu1 %v19108_v58  ;;  %17271 = vmatprep.subr.bf16.mxu0 %v19109_v59  ;;  %v19148_v58 = vld [vmem:[%s20437_s3 + $0x930] sm:$0xff]  }
 0x152   : > { %17293 = vmatprep.subr.bf16.mxu1 %v19110_v60  ;;  %v16969_v1 = vpop.f32.mrb[4].mxu0  ;;  %v19149_v59 = vld [vmem:[%s20437_s3 + $0x9b0] sm:$0xff]  }
 0x153   : > { %v16991_v2 = vpop.f32.mrb[4].mxu1  ;;  %v16970_v5 = vpop.f32.mrb[5].mxu0 }
 0x154   : > { %v16992_v6 = vpop.f32.mrb[5].mxu1  ;;  %v16971_v8 = vadd.f32 %v16970_v5, %v16969_v1  ;;  %v16972_v10 = vpop.f32.mrb[6].mxu0  ;;  %17272 = vmatpush3.bf16.msra.mxu0 %v19111_v61 }
 0x155   : > { %v16993_v9 = vadd.f32 %v16992_v6, %v16991_v2  ;;  %v16994_v11 = vpop.f32.mrb[6].mxu1  ;;  %17294 = vmatpush3.bf16.msra.mxu1 %v19112_v62  ;;  %v16973_v14 = vpop.f32.mrb[7].mxu0  ;;  %17273 = vmatprep.subr.bf16.mxu0 %v19113_v63  ;;  %v19150_v2 = vld [vmem:[%s20437_s3 + $0x978] sm:$0xff]  }
 0x156   : > { %v16995_v15 = vpop.f32.mrb[7].mxu1  ;;  %17295 = vmatprep.subr.bf16.mxu1 %v19114_v0  ;;  %v12220_v18 = vadd.f32 %v16971_v8, %v20729_v28  ;;  %v19124_v28 = vld [vmem:[%s20437_s3 + $0x900] sm:$0xff]   ;;  %v19152_v8 = vld [vmem:[%s20437_s3 + $0x938] sm:$0xff]  }
 0x157   : > { %v19155_v15 = vld [vmem:[%s20437_s3 + $0xa40] sm:$0xff]  }
 0x158   : > { %v20770_v23 = vadd.f32 %v16993_v9, %v12220_v18  ;;  %17274 = vmatpush3.bf16.msra.mxu0 %v19115_v3  ;;  %v19151_v3 = vld [vmem:[%s20437_s3 + $0x9f8] sm:$0xff]  }
 0x159   : > { %17296 = vmatpush3.bf16.msra.mxu1 %v19116_v4  ;;  %17275 = vmatprep.subr.bf16.mxu0 %v19117_v7  ;;  %v228_v7 = vld [vmem:[%s20447_s30 + $0x48] sm:$0xff] }
 0x15a   : > { %17297 = vmatprep.subr.bf16.mxu1 %v19118_v12  ;;  %v463_v9 = vrot.slane %v228_v7, %v20485_v42  ;;  %v456_v10 = vcombine.high %v228_v7, %v228_v7  ;;  %v19153_v12 = vld [vmem:[%s20437_s3 + $0x9b8] sm:$0xff]   ;;  %v19189_v7 = vld [vmem:[%s20437_s3 + $0xbc0] sm:$0xff]  }
 0x15c   : > { %17276 = vmatpush3.bf16.msra.mxu0 %v19119_v19  ;;  %v471_v13 = vcombine.high %v463_v9, %v463_v9  ;;  %v470_v14 = vrot.slane %v456_v10, %v20485_v42  ;;  %v1221_v19 = vpack.c.bf16 %v463_v9, %v463_v9  ;;  %v19190_v9 = vld [vmem:[%s20437_s3 + $0xb00] sm:$0xff]  }
 0x15d   : > { %17298 = vmatpush3.bf16.msra.mxu1 %v19120_v20  ;;  %17305 = vmatprep.subr.bf16.mxu0 %v19122_v24  ;;  %v19157_v20 = vld [vmem:[%s20437_s3 + $0xa00] sm:$0xff]   ;;  %v19159_v24 = vld [vmem:[%s20437_s3 + $0xa48] sm:$0xff]  }
 0x15e   : > { %17327 = vmatprep.subr.bf16.mxu1 %v19123_v27  ;;  %v1222_v17 = vpack.c.bf16 %v471_v13, %v471_v13  ;;  %v472_v18 = vcombine.high %v470_v14, %v470_v14  ;;  %v1223_v21 = vpack.c.bf16 %v470_v14, %v470_v14  ;;  %v19162_v27 = vld [vmem:[%s20437_s3 + $0xa88] sm:$0xff]  }
 0x15f   : > { %12778 = vmatmul.mubr.bf16.vlgmr.msra.gmra.mrb[32].mxu0 %v1217_v30  ;;  %v19165_v30 = vld [vmem:[%s20437_s3 + $0xa10] sm:$0xff]   ;;  %v19192_v14 = vld [vmem:[%s20437_s3 + $0xb48] sm:$0xff]  }
 0x160   : > { %12818 = vmatmul.mubr.bf16.vlgmr.msra.gmra.mrb[32].mxu1 %v1219_v31  ;;  %17306 = vmatpush3.bf16.msra.mxu0 %v19124_v28  ;;  %v19163_v28 = vld [vmem:[%s20437_s3 + $0xa50] sm:$0xff]  }
 0x161   : > { %17328 = vmatpush3.bf16.msra.mxu1 %v19125_v32  ;;  %17307 = vmatprep.subr.bf16.mxu0 %v19126_v33  ;;  %v19166_v31 = vld [vmem:[%s20437_s3 + $0xa90] sm:$0xff]   ;;  %v19167_v32 = vld [vmem:[%s20437_s3 + $0xa58] sm:$0xff]  }
 0x162   : > { %17329 = vmatprep.subr.bf16.mxu1 %v19127_v34  ;;  %12857 = vmatprep.mubr.bf16.mxu0 %v1222_v17  ;;  %v19168_v33 = vld [vmem:[%s20437_s3 + $0xad8] sm:$0xff]   ;;  %v19194_v17 = vld [vmem:[%s20437_s3 + $0xb08] sm:$0xff]  }
 0x163   : > { %v19169_v34 = vld [vmem:[%s20437_s3 + $0xa18] sm:$0xff]  }
 0x164   : > { %17308 = vmatpush3.bf16.msra.mxu0 %v19128_v35  ;;  %v19170_v35 = vld [vmem:[%s20437_s3 + $0xa98] sm:$0xff]  }
 0x165   : > { %17330 = vmatpush3.bf16.msra.mxu1 %v19129_v36  ;;  %17309 = vmatprep.subr.bf16.mxu0 %v19130_v37  ;;  %v19171_v36 = vld [vmem:[%s20437_s3 + $0xa60] sm:$0xff]  }
 0x166   : > { %17331 = vmatprep.subr.bf16.mxu1 %v19131_v38  ;;  %v19172_v37 = vld [vmem:[%s20437_s3 + $0xae0] sm:$0xff]  }
 0x167   : > { %v19173_v38 = vld [vmem:[%s20437_s3 + $0xa20] sm:$0xff]  }
 0x168   : > { %17310 = vmatpush3.bf16.msra.mxu0 %v19132_v39  ;;  %v19174_v39 = vld [vmem:[%s20437_s3 + $0xaa0] sm:$0xff]  }
 0x169   : > { %17332 = vmatpush3.bf16.msra.mxu1 %v19133_v40  ;;  %17311 = vmatprep.subr.bf16.mxu0 %v19134_v41  ;;  %v19175_v40 = vld [vmem:[%s20437_s3 + $0xa68] sm:$0xff]  }
 0x16a   : > { %17333 = vmatprep.subr.bf16.mxu1 %v19135_v43  ;;  %v19176_v41 = vld [vmem:[%s20437_s3 + $0xae8] sm:$0xff]  }
 0x16b   : > { %v19177_v43 = vld [vmem:[%s20437_s3 + $0xa28] sm:$0xff]  }
 0x16c   : > { %17312 = vmatpush3.bf16.msra.mxu0 %v19136_v44  ;;  %v19178_v44 = vld [vmem:[%s20437_s3 + $0xaa8] sm:$0xff]  }
 0x16d   : > { %17334 = vmatpush3.bf16.msra.mxu1 %v19137_v45  ;;  %17313 = vmatprep.subr.bf16.mxu0 %v19138_v46  ;;  %v19179_v45 = vld [vmem:[%s20437_s3 + $0xa70] sm:$0xff]  }
 0x16e   : > { %17335 = vmatprep.subr.bf16.mxu1 %v19139_v47 }
 0x170   : > { %17314 = vmatpush3.bf16.msra.mxu0 %v19140_v48  ;;  %v19180_v48 = vld [vmem:[%s20437_s3 + $0xaf0] sm:$0xff]  }
 0x171   : > { %17336 = vmatpush3.bf16.msra.mxu1 %v19141_v49  ;;  %17315 = vmatprep.subr.bf16.mxu0 %v19142_v50  ;;  %v19181_v49 = vld [vmem:[%s20437_s3 + $0xa30] sm:$0xff]  }
 0x172   : > { %17337 = vmatprep.subr.bf16.mxu1 %v19143_v51  ;;  %v17013_v56 = vpop.f32.mrb[8].mxu0 }
 0x173   : > { %v17035_v57 = vpop.f32.mrb[8].mxu1  ;;  %v17014_v60 = vpop.f32.mrb[9].mxu0 }
 0x174   : > { %v17036_v61 = vpop.f32.mrb[9].mxu1  ;;  %v17015_v62 = vadd.f32 %v17014_v60, %v17013_v56  ;;  %v17016_v0 = vpop.f32.mrb[10].mxu0  ;;  %17316 = vmatpush3.bf16.msra.mxu0 %v19144_v52  ;;  %v19182_v52 = vld [vmem:[%s20437_s3 + $0xab0] sm:$0xff]  }
 0x175   : > { %v17037_v63 = vadd.f32 %v17036_v61, %v17035_v57  ;;  %v17038_v1 = vpop.f32.mrb[10].mxu1  ;;  %17338 = vmatpush3.bf16.msra.mxu1 %v19145_v53  ;;  %v17017_v4 = vpop.f32.mrb[11].mxu0  ;;  %17317 = vmatprep.subr.bf16.mxu0 %v19146_v54  ;;  %v19183_v57 = vld [vmem:[%s20437_s3 + $0xa78] sm:$0xff]  }
 0x176   : > { %v17039_v5 = vpop.f32.mrb[11].mxu1  ;;  %17339 = vmatprep.subr.bf16.mxu1 %v19147_v55  ;;  %v12300_v6 = vadd.f32 %v17015_v62, %v20770_v23  ;;  %v1224_v23 = vpack.c.bf16 %v472_v18, %v472_v18  ;;  %v19185_v62 = vld [vmem:[%s20437_s3 + $0xa38] sm:$0xff]   ;;  %v19188_v4 = vld [vmem:[%s20437_s3 + $0xb40] sm:$0xff]   ;;  %v19195_v18 = vld [vmem:[%s20437_s3 + $0xb88] sm:$0xff]  }
 0x177   : > { %v19186_v1 = vld [vmem:[%s20437_s3 + $0xab8] sm:$0xff]  }
 0x178   : > { %v20806_v11 = vadd.f32 %v17037_v63, %v12300_v6  ;;  %17318 = vmatpush3.bf16.msra.mxu0 %v19148_v58  ;;  %12897 = vmatprep.mubr.bf16.mxu1 %v1224_v23  ;;  %v19184_v58 = vld [vmem:[%s20437_s3 + $0xaf8] sm:$0xff]   ;;  %v229_v63 = vld [vmem:[%s20447_s30 + $0x50] sm:$0xff] }
 0x179   : > { %17340 = vmatpush3.bf16.msra.mxu1 %v19149_v59  ;;  %17319 = vmatprep.subr.bf16.mxu0 %v19150_v2  ;;  %v480_v2 = vrot.slane %v229_v63, %v20485_v42  ;;  %v19200_v23 = vld [vmem:[%s20437_s3 + $0xb58] sm:$0xff]  }
 0x17a   : > { %17341 = vmatprep.subr.bf16.mxu1 %v19151_v3  ;;  %v473_v3 = vcombine.high %v229_v63, %v229_v63 }
 0x17b   : > { %v488_v5 = vcombine.high %v480_v2, %v480_v2 }
 0x17c   : > { %17320 = vmatpush3.bf16.msra.mxu0 %v19152_v8  ;;  %v487_v6 = vrot.slane %v473_v3, %v20485_v42  ;;  %v1225_v8 = vpack.c.bf16 %v480_v2, %v480_v2  ;;  %v19223_v2 = vld [vmem:[%s20437_s3 + $0xc00] sm:$0xff]  }
 0x17d   : > { %17342 = vmatpush3.bf16.msra.mxu1 %v19153_v12  ;;  %17349 = vmatprep.subr.bf16.mxu0 %v19155_v15  ;;  %v1226_v10 = vpack.c.bf16 %v488_v5, %v488_v5  ;;  %v19191_v12 = vld [vmem:[%s20437_s3 + $0xb80] sm:$0xff]  }
 0x17e   : > { %17371 = vmatprep.subr.bf16.mxu1 %v19156_v16  ;;  %v1227_v13 = vpack.c.bf16 %v487_v6, %v487_v6  ;;  %v19193_v16 = vld [vmem:[%s20437_s3 + $0xbc8] sm:$0xff]  }
 0x17f   : > { %12858 = vmatmul.mubr.bf16.vlgmr.msra.gmra.mrb[36].mxu0 %v1221_v19  ;;  %v19196_v19 = vld [vmem:[%s20437_s3 + $0xb50] sm:$0xff]  }
 0x180   : > { %12898 = vmatmul.mubr.bf16.vlgmr.msra.gmra.mrb[36].mxu1 %v1223_v21  ;;  %17350 = vmatpush3.bf16.msra.mxu0 %v19157_v20  ;;  %v19197_v20 = vld [vmem:[%s20437_s3 + $0xbd0] sm:$0xff]  }
 0x181   : > { %17372 = vmatpush3.bf16.msra.mxu1 %v19158_v22  ;;  %17351 = vmatprep.subr.bf16.mxu0 %v19159_v24  ;;  %v19198_v21 = vld [vmem:[%s20437_s3 + $0xb10] sm:$0xff]   ;;  %v19201_v24 = vld [vmem:[%s20437_s3 + $0xbd8] sm:$0xff]  }
 0x182   : > { %17373 = vmatprep.subr.bf16.mxu1 %v19160_v25  ;;  %12937 = vmatprep.mubr.bf16.mxu0 %v1226_v10  ;;  %v19199_v22 = vld [vmem:[%s20437_s3 + $0xb90] sm:$0xff]   ;;  %v19202_v25 = vld [vmem:[%s20437_s3 + $0xb18] sm:$0xff]   ;;  %v19228_v10 = vld [vmem:[%s20437_s3 + $0xc88] sm:$0xff]  }
 0x184   : > { %17352 = vmatpush3.bf16.msra.mxu0 %v19161_v26  ;;  %v19203_v26 = vld [vmem:[%s20437_s3 + $0xb98] sm:$0xff]  }
 0x185   : > { %17374 = vmatpush3.bf16.msra.mxu1 %v19162_v27  ;;  %17353 = vmatprep.subr.bf16.mxu0 %v19163_v28  ;;  %v19204_v27 = vld [vmem:[%s20437_s3 + $0xb60] sm:$0xff]  }
 0x186   : > { %17375 = vmatprep.subr.bf16.mxu1 %v19164_v29  ;;  %v19205_v28 = vld [vmem:[%s20437_s3 + $0xbe0] sm:$0xff]  }
 0x187   : > { %v19206_v29 = vld [vmem:[%s20437_s3 + $0xb20] sm:$0xff]  }
 0x188   : > { %17354 = vmatpush3.bf16.msra.mxu0 %v19165_v30  ;;  %v19207_v30 = vld [vmem:[%s20437_s3 + $0xba0] sm:$0xff]  }
 0x189   : > { %17376 = vmatpush3.bf16.msra.mxu1 %v19166_v31  ;;  %17355 = vmatprep.subr.bf16.mxu0 %v19167_v32  ;;  %v19208_v31 = vld [vmem:[%s20437_s3 + $0xb68] sm:$0xff]  }
 0x18a   : > { %17377 = vmatprep.subr.bf16.mxu1 %v19168_v33  ;;  %v19209_v32 = vld [vmem:[%s20437_s3 + $0xbe8] sm:$0xff]  }
 0x18b   : > { %v19210_v33 = vld [vmem:[%s20437_s3 + $0xb28] sm:$0xff]  }
 0x18c   : > { %17356 = vmatpush3.bf16.msra.mxu0 %v19169_v34  ;;  %v19211_v34 = vld [vmem:[%s20437_s3 + $0xba8] sm:$0xff]  }
 0x18d   : > { %17378 = vmatpush3.bf16.msra.mxu1 %v19170_v35  ;;  %17357 = vmatprep.subr.bf16.mxu0 %v19171_v36  ;;  %v19212_v35 = vld [vmem:[%s20437_s3 + $0xb70] sm:$0xff]  }
 0x18e   : > { %17379 = vmatprep.subr.bf16.mxu1 %v19172_v37 }
 0x190   : > { %17358 = vmatpush3.bf16.msra.mxu0 %v19173_v38  ;;  %v19213_v38 = vld [vmem:[%s20437_s3 + $0xbf0] sm:$0xff]  }
 0x191   : > { %17380 = vmatpush3.bf16.msra.mxu1 %v19174_v39  ;;  %17359 = vmatprep.subr.bf16.mxu0 %v19175_v40  ;;  %v19214_v39 = vld [vmem:[%s20437_s3 + $0xb30] sm:$0xff]  }
 0x192   : > { %v17057_v46 = vpop.f32.mrb[12].mxu0  ;;  %17381 = vmatprep.subr.bf16.mxu1 %v19176_v41 }
 0x193   : > { %v17079_v47 = vpop.f32.mrb[12].mxu1  ;;  %v17058_v50 = vpop.f32.mrb[13].mxu0 }
 0x194   : > { %v17080_v51 = vpop.f32.mrb[13].mxu1  ;;  %v17059_v53 = vadd.f32 %v17058_v50, %v17057_v46  ;;  %v17060_v55 = vpop.f32.mrb[14].mxu0  ;;  %17360 = vmatpush3.bf16.msra.mxu0 %v19177_v43 }
 0x195   : > { %v17081_v54 = vadd.f32 %v17080_v51, %v17079_v47  ;;  %v17082_v56 = vpop.f32.mrb[14].mxu1  ;;  %17382 = vmatpush3.bf16.msra.mxu1 %v19178_v44  ;;  %v17061_v59 = vpop.f32.mrb[15].mxu0  ;;  %17361 = vmatprep.subr.bf16.mxu0 %v19179_v45  ;;  %v19215_v47 = vld [vmem:[%s20437_s3 + $0xbb0] sm:$0xff]   ;;  %v230_v55 = vld [vmem:[%s20447_s30 + $0x58] sm:$0xff] }
 0x196   : > { %v17083_v60 = vpop.f32.mrb[15].mxu1  ;;  %v12380_v61 = vadd.f32 %v17059_v53, %v20806_v11  ;;  %17383 = vmatprep.subr.bf16.mxu1 %v19180_v48  ;;  %v489_v11 = vcombine.high %v487_v6, %v487_v6  ;;  %v19216_v48 = vld [vmem:[%s20437_s3 + $0xb78] sm:$0xff]   ;;  %v497_v56 = vrot.slane %v230_v55, %v20485_v42  ;;  %v19224_v6 = vld [vmem:[%s20437_s3 + $0xc80] sm:$0xff]  }
 0x197   : > { %v19218_v53 = vld [vmem:[%s20437_s3 + $0xb38] sm:$0xff]  }
 0x198   : > { %v20843_v0 = vadd.f32 %v17081_v54, %v12380_v61  ;;  %17362 = vmatpush3.bf16.msra.mxu0 %v19181_v49  ;;  %v1228_v15 = vpack.c.bf16 %v489_v11, %v489_v11  ;;  %v19219_v59 = vld [vmem:[%s20437_s3 + $0xbb8] sm:$0xff]   ;;  %v505_v60 = vcombine.high %v497_v56, %v497_v56  ;;  %v1229_v63 = vpack.c.bf16 %v497_v56, %v497_v56  ;;  %v19230_v11 = vld [vmem:[%s20437_s3 + $0xcd0] sm:$0xff]  }
 0x199   : > { %17384 = vmatpush3.bf16.msra.mxu1 %v19182_v52  ;;  %17363 = vmatprep.subr.bf16.mxu0 %v19183_v57  ;;  %v19217_v52 = vld [vmem:[%s20437_s3 + $0xbf8] sm:$0xff]   ;;  %v490_v57 = vcombine.high %v230_v55, %v230_v55  ;;  %v19256_v55 = vld [vmem:[%s20437_s3 + $0xd00] sm:$0xff]  }
 0x19a   : > { %17385 = vmatprep.subr.bf16.mxu1 %v19184_v58  ;;  %12977 = vmatprep.mubr.bf16.mxu1 %v1228_v15  ;;  %v19221_v58 = vld [vmem:[%s20437_s3 + $0xc40] sm:$0xff]   ;;  %v19234_v15 = vld [vmem:[%s20437_s3 + $0xcd8] sm:$0xff]  }
 0x19b   : > { %v504_v61 = vrot.slane %v490_v57, %v20485_v42 }
 0x19c   : > { %17364 = vmatpush3.bf16.msra.mxu0 %v19185_v62  ;;  %v19222_v62 = vld [vmem:[%s20437_s3 + $0xcc0] sm:$0xff]  }
 0x19d   : > { %17386 = vmatpush3.bf16.msra.mxu1 %v19186_v1  ;;  %17393 = vmatprep.subr.bf16.mxu0 %v19188_v4  ;;  %v506_v1 = vcombine.high %v504_v61, %v504_v61  ;;  %v1231_v3 = vpack.c.bf16 %v504_v61, %v504_v61  ;;  %v19225_v4 = vld [vmem:[%s20437_s3 + $0xc48] sm:$0xff]  }
 0x19e   : > { %17415 = vmatprep.subr.bf16.mxu1 %v19189_v7  ;;  %v19226_v7 = vld [vmem:[%s20437_s3 + $0xcc8] sm:$0xff]  }
 0x19f   : > { %12938 = vmatmul.mubr.bf16.vlgmr.msra.gmra.mrb[40].mxu0 %v1225_v8  ;;  %v1232_v5 = vpack.c.bf16 %v506_v1, %v506_v1  ;;  %v19227_v8 = vld [vmem:[%s20437_s3 + $0xc08] sm:$0xff]   ;;  %v19262_v1 = vld [vmem:[%s20437_s3 + $0xd50] sm:$0xff]  }
 0x1a0   : > { %17394 = vmatpush3.bf16.msra.mxu0 %v19190_v9  ;;  %12978 = vmatmul.mubr.bf16.vlgmr.msra.gmra.mrb[40].mxu1 %v1227_v13  ;;  %v19229_v9 = vld [vmem:[%s20437_s3 + $0xc50] sm:$0xff]   ;;  %v19233_v13 = vld [vmem:[%s20437_s3 + $0xc58] sm:$0xff]  }
 0x1a1   : > { %17395 = vmatprep.subr.bf16.mxu0 %v19192_v14  ;;  %17416 = vmatpush3.bf16.msra.mxu1 %v19191_v12  ;;  %v19231_v12 = vld [vmem:[%s20437_s3 + $0xc10] sm:$0xff]  }
 0x1a2   : > { %17417 = vmatprep.subr.bf16.mxu1 %v19193_v16  ;;  %13057 = vmatprep.mubr.bf16.mxu1 %v1232_v5  ;;  %v19232_v14 = vld [vmem:[%s20437_s3 + $0xc90] sm:$0xff]   ;;  %v19235_v16 = vld [vmem:[%s20437_s3 + $0xc18] sm:$0xff]  }
 0x1a3   : > { %v19266_v5 = vld [vmem:[%s20437_s3 + $0xd58] sm:$0xff]  }
 0x1a4   : > { %17396 = vmatpush3.bf16.msra.mxu0 %v19194_v17  ;;  %v19237_v17 = vld [vmem:[%s20437_s3 + $0xc60] sm:$0xff]  }
 0x1a5   : > { %17397 = vmatprep.subr.bf16.mxu0 %v19196_v19  ;;  %17418 = vmatpush3.bf16.msra.mxu1 %v19195_v18  ;;  %v19236_v18 = vld [vmem:[%s20437_s3 + $0xc98] sm:$0xff]   ;;  %v19238_v19 = vld [vmem:[%s20437_s3 + $0xce0] sm:$0xff]  }
 0x1a6   : > { %17419 = vmatprep.subr.bf16.mxu1 %v19197_v20  ;;  %v19239_v20 = vld [vmem:[%s20437_s3 + $0xc20] sm:$0xff]  }
 0x1a8   : > { %17398 = vmatpush3.bf16.msra.mxu0 %v19198_v21  ;;  %v19241_v21 = vld [vmem:[%s20437_s3 + $0xc68] sm:$0xff]  }
 0x1a9   : > { %17399 = vmatprep.subr.bf16.mxu0 %v19200_v23  ;;  %17420 = vmatpush3.bf16.msra.mxu1 %v19199_v22  ;;  %v19240_v22 = vld [vmem:[%s20437_s3 + $0xca0] sm:$0xff]   ;;  %v19242_v23 = vld [vmem:[%s20437_s3 + $0xce8] sm:$0xff]  }
 0x1aa   : > { %17421 = vmatprep.subr.bf16.mxu1 %v19201_v24  ;;  %v19243_v24 = vld [vmem:[%s20437_s3 + $0xc28] sm:$0xff]  }
 0x1ac   : > { %17400 = vmatpush3.bf16.msra.mxu0 %v19202_v25 }
 0x1ad   : > { %17401 = vmatprep.subr.bf16.mxu0 %v19204_v27  ;;  %17422 = vmatpush3.bf16.msra.mxu1 %v19203_v26  ;;  %v19244_v27 = vld [vmem:[%s20437_s3 + $0xca8] sm:$0xff]  }
 0x1ae   : > { %17423 = vmatprep.subr.bf16.mxu1 %v19205_v28  ;;  %v19245_v28 = vld [vmem:[%s20437_s3 + $0xc70] sm:$0xff]  }
 0x1b0   : > { %17402 = vmatpush3.bf16.msra.mxu0 %v19206_v29 }
 0x1b1   : > { %17403 = vmatprep.subr.bf16.mxu0 %v19208_v31  ;;  %17424 = vmatpush3.bf16.msra.mxu1 %v19207_v30 }
 0x1b2   : > { %v17101_v36 = vpop.f32.mrb[16].mxu0  ;;  %17425 = vmatprep.subr.bf16.mxu1 %v19209_v32 }
 0x1b3   : > { %v17123_v37 = vpop.f32.mrb[16].mxu1  ;;  %v17102_v40 = vpop.f32.mrb[17].mxu0 }
 0x1b4   : > { %v17124_v41 = vpop.f32.mrb[17].mxu1  ;;  %v17103_v43 = vadd.f32 %v17102_v40, %v17101_v36  ;;  %v17104_v45 = vpop.f32.mrb[18].mxu0  ;;  %17404 = vmatpush3.bf16.msra.mxu0 %v19210_v33  ;;  %v19247_v36 = vld [vmem:[%s20437_s3 + $0xc30] sm:$0xff]  }
 0x1b5   : > { %v17125_v44 = vadd.f32 %v17124_v41, %v17123_v37  ;;  %v17126_v46 = vpop.f32.mrb[18].mxu1  ;;  %v17105_v49 = vpop.f32.mrb[19].mxu0  ;;  %17405 = vmatprep.subr.bf16.mxu0 %v19212_v35  ;;  %17426 = vmatpush3.bf16.msra.mxu1 %v19211_v34  ;;  %v19246_v35 = vld [vmem:[%s20437_s3 + $0xcf0] sm:$0xff]   ;;  %v19249_v41 = vld [vmem:[%s20437_s3 + $0xc78] sm:$0xff]  }
 0x1b6   : > { %v17127_v50 = vpop.f32.mrb[19].mxu1  ;;  %v12460_v51 = vadd.f32 %v17103_v43, %v20843_v0  ;;  %17427 = vmatprep.subr.bf16.mxu1 %v19213_v38  ;;  %v1230_v0 = vpack.c.bf16 %v505_v60, %v505_v60  ;;  %v19250_v43 = vld [vmem:[%s20437_s3 + $0xcf8] sm:$0xff]   ;;  %v231_v46 = vld [vmem:[%s20447_s30 + $0x60] sm:$0xff]  ;;  %v19258_v60 = vld [vmem:[%s20437_s3 + $0xd48] sm:$0xff]  }
 0x1b7   : > { %v19251_v45 = vld [vmem:[%s20437_s3 + $0xc38] sm:$0xff]   ;;  %v19254_v49 = vld [vmem:[%s20437_s3 + $0xd40] sm:$0xff]  }
 0x1b8   : > { %v20880_v54 = vadd.f32 %v17125_v44, %v12460_v51  ;;  %17406 = vmatpush3.bf16.msra.mxu0 %v19214_v39  ;;  %13017 = vmatprep.mubr.bf16.mxu0 %v1230_v0  ;;  %v19248_v39 = vld [vmem:[%s20437_s3 + $0xcb0] sm:$0xff]   ;;  %v19252_v50 = vld [vmem:[%s20437_s3 + $0xcb8] sm:$0xff]   ;;  %v19261_v0 = vld [vmem:[%s20437_s3 + $0xd88] sm:$0xff]  }
 0x1b9   : > { %17407 = vmatprep.subr.bf16.mxu0 %v19216_v48  ;;  %17428 = vmatpush3.bf16.msra.mxu1 %v19215_v47  ;;  %v514_v47 = vrot.slane %v231_v46, %v20485_v42  ;;  %v507_v48 = vcombine.high %v231_v46, %v231_v46 }
 0x1ba   : > { %17429 = vmatprep.subr.bf16.mxu1 %v19217_v52 }
 0x1bb   : > { %v522_v51 = vcombine.high %v514_v47, %v514_v47  ;;  %v521_v52 = vrot.slane %v507_v48, %v20485_v42  ;;  %v19289_v48 = vld [vmem:[%s20437_s3 + $0xe00] sm:$0xff]  }
 0x1bc   : > { %17408 = vmatpush3.bf16.msra.mxu0 %v19218_v53  ;;  %v19255_v53 = vld [vmem:[%s20437_s3 + $0xdc0] sm:$0xff]  }
 0x1bd   : > { %17437 = vmatprep.subr.bf16.mxu0 %v19221_v58  ;;  %17430 = vmatpush3.bf16.msra.mxu1 %v19219_v59  ;;  %v1234_v56 = vpack.c.bf16 %v522_v51, %v522_v51  ;;  %v523_v57 = vcombine.high %v521_v52, %v521_v52  ;;  %v19257_v58 = vld [vmem:[%s20437_s3 + $0xd80] sm:$0xff]   ;;  %v1235_v59 = vpack.c.bf16 %v521_v52, %v521_v52 }
 0x1be   : > { %17459 = vmatprep.subr.bf16.mxu1 %v19222_v62  ;;  %v19259_v62 = vld [vmem:[%s20437_s3 + $0xdc8] sm:$0xff]   ;;  %v19290_v52 = vld [vmem:[%s20437_s3 + $0xe80] sm:$0xff]  }
 0x1bf   : > { %13018 = vmatmul.mubr.bf16.vlgmr.msra.gmra.mrb[44].mxu0 %v1229_v63  ;;  %v1236_v61 = vpack.c.bf16 %v523_v57, %v523_v57  ;;  %v19260_v63 = vld [vmem:[%s20437_s3 + $0xd08] sm:$0xff]   ;;  %v19296_v57 = vld [vmem:[%s20437_s3 + $0xed0] sm:$0xff]  }
 0x1c0   : > { %17438 = vmatpush3.bf16.msra.mxu0 %v19223_v2  ;;  %13058 = vmatmul.mubr.bf16.vlgmr.msra.gmra.mrb[44].mxu1 %v1231_v3  ;;  %v19263_v2 = vld [vmem:[%s20437_s3 + $0xdd0] sm:$0xff]  }
 0x1c1   : > { %17439 = vmatprep.subr.bf16.mxu0 %v19225_v4  ;;  %17460 = vmatpush3.bf16.msra.mxu1 %v19224_v6  ;;  %v19264_v3 = vld [vmem:[%s20437_s3 + $0xd10] sm:$0xff]   ;;  %v19267_v6 = vld [vmem:[%s20437_s3 + $0xdd8] sm:$0xff]  }
 0x1c2   : > { %17461 = vmatprep.subr.bf16.mxu1 %v19226_v7  ;;  %13097 = vmatprep.mubr.bf16.mxu0 %v1234_v56  ;;  %v19265_v4 = vld [vmem:[%s20437_s3 + $0xd90] sm:$0xff]   ;;  %v19268_v7 = vld [vmem:[%s20437_s3 + $0xd18] sm:$0xff]   ;;  %v19294_v56 = vld [vmem:[%s20437_s3 + $0xe88] sm:$0xff]  }
 0x1c3   : > { %13137 = vmatprep.mubr.bf16.mxu1 %v1236_v61  ;;  %v19300_v61 = vld [vmem:[%s20437_s3 + $0xed8] sm:$0xff]  }
 0x1c4   : > { %17440 = vmatpush3.bf16.msra.mxu0 %v19227_v8  ;;  %v19269_v8 = vld [vmem:[%s20437_s3 + $0xd98] sm:$0xff]  }
 0x1c5   : > { %17441 = vmatprep.subr.bf16.mxu0 %v19229_v9  ;;  %17462 = vmatpush3.bf16.msra.mxu1 %v19228_v10  ;;  %v19270_v9 = vld [vmem:[%s20437_s3 + $0xd60] sm:$0xff]  }
 0x1c6   : > { %17463 = vmatprep.subr.bf16.mxu1 %v19230_v11  ;;  %v19271_v10 = vld [vmem:[%s20437_s3 + $0xde0] sm:$0xff]  }
 0x1c7   : > { %v19272_v11 = vld [vmem:[%s20437_s3 + $0xd20] sm:$0xff]  }
 0x1c8   : > { %17442 = vmatpush3.bf16.msra.mxu0 %v19231_v12  ;;  %v19273_v12 = vld [vmem:[%s20437_s3 + $0xda0] sm:$0xff]  }
 0x1c9   : > { %17443 = vmatprep.subr.bf16.mxu0 %v19233_v13  ;;  %17464 = vmatpush3.bf16.msra.mxu1 %v19232_v14  ;;  %v19274_v13 = vld [vmem:[%s20437_s3 + $0xd68] sm:$0xff]  }
 0x1ca   : > { %17465 = vmatprep.subr.bf16.mxu1 %v19234_v15  ;;  %v19275_v14 = vld [vmem:[%s20437_s3 + $0xde8] sm:$0xff]  }
 0x1cb   : > { %v19276_v15 = vld [vmem:[%s20437_s3 + $0xd28] sm:$0xff]  }
 0x1cc   : > { %17444 = vmatpush3.bf16.msra.mxu0 %v19235_v16 }
 0x1cd   : > { %17445 = vmatprep.subr.bf16.mxu0 %v19237_v17  ;;  %17466 = vmatpush3.bf16.msra.mxu1 %v19236_v18  ;;  %v19277_v18 = vld [vmem:[%s20437_s3 + $0xda8] sm:$0xff]  }
 0x1ce   : > { %17467 = vmatprep.subr.bf16.mxu1 %v19238_v19  ;;  %v19278_v19 = vld [vmem:[%s20437_s3 + $0xd70] sm:$0xff]  }
 0x1d0   : > { %17446 = vmatpush3.bf16.msra.mxu0 %v19239_v20 }
 0x1d1   : > { %17447 = vmatprep.subr.bf16.mxu0 %v19241_v21  ;;  %17468 = vmatpush3.bf16.msra.mxu1 %v19240_v22 }
 0x1d2   : > { %v17145_v25 = vpop.f32.mrb[20].mxu0  ;;  %17469 = vmatprep.subr.bf16.mxu1 %v19242_v23 }
 0x1d3   : > { %v17167_v26 = vpop.f32.mrb[20].mxu1  ;;  %v17146_v29 = vpop.f32.mrb[21].mxu0 }
 0x1d4   : > { %v17168_v30 = vpop.f32.mrb[21].mxu1  ;;  %v17147_v31 = vadd.f32 %v17146_v29, %v17145_v25  ;;  %v17148_v33 = vpop.f32.mrb[22].mxu0  ;;  %17448 = vmatpush3.bf16.msra.mxu0 %v19243_v24 }
 0x1d5   : > { %v17169_v32 = vadd.f32 %v17168_v30, %v17167_v26  ;;  %v17170_v34 = vpop.f32.mrb[22].mxu1  ;;  %v17149_v37 = vpop.f32.mrb[23].mxu0  ;;  %17449 = vmatprep.subr.bf16.mxu0 %v19245_v28  ;;  %17470 = vmatpush3.bf16.msra.mxu1 %v19244_v27  ;;  %v19279_v26 = vld [vmem:[%s20437_s3 + $0xdf0] sm:$0xff]  }
 0x1d6   : > { %v17171_v38 = vpop.f32.mrb[23].mxu1  ;;  %v12540_v40 = vadd.f32 %v17147_v31, %v20880_v54  ;;  %17471 = vmatprep.subr.bf16.mxu1 %v19246_v35  ;;  %v1233_v54 = vpack.c.bf16 %v514_v47, %v514_v47  ;;  %v19280_v27 = vld [vmem:[%s20437_s3 + $0xd30] sm:$0xff]   ;;  %v19283_v34 = vld [vmem:[%s20437_s3 + $0xdf8] sm:$0xff]  }
 0x1d7   : > { %v19281_v31 = vld [vmem:[%s20437_s3 + $0xdb0] sm:$0xff]   ;;  %v19284_v35 = vld [vmem:[%s20437_s3 + $0xd38] sm:$0xff]  }
 0x1d8   : > { %v20917_v44 = vadd.f32 %v17169_v32, %v12540_v40  ;;  %17450 = vmatpush3.bf16.msra.mxu0 %v19247_v36  ;;  %v19282_v32 = vld [vmem:[%s20437_s3 + $0xd78] sm:$0xff]   ;;  %v232_v36 = vld [vmem:[%s20447_s30 + $0x68] sm:$0xff] }
 0x1d9   : > { %17451 = vmatprep.subr.bf16.mxu0 %v19249_v41  ;;  %17472 = vmatpush3.bf16.msra.mxu1 %v19248_v39  ;;  %v531_v37 = vrot.slane %v232_v36, %v20485_v42  ;;  %v524_v38 = vcombine.high %v232_v36, %v232_v36  ;;  %v19287_v39 = vld [vmem:[%s20437_s3 + $0xe40] sm:$0xff]   ;;  %v19285_v40 = vld [vmem:[%s20437_s3 + $0xdb8] sm:$0xff]  }
 0x1da   : > { %17473 = vmatprep.subr.bf16.mxu1 %v19250_v43  ;;  %v19322_v36 = vld [vmem:[%s20437_s3 + $0xf00] sm:$0xff]  }
 0x1db   : > { %v539_v41 = vcombine.high %v531_v37, %v531_v37  ;;  %v538_v43 = vrot.slane %v524_v38, %v20485_v42 }
 0x1dc   : > { %17452 = vmatpush3.bf16.msra.mxu0 %v19251_v45  ;;  %v1237_v45 = vpack.c.bf16 %v531_v37, %v531_v37 }
 0x1dd   : > { %17481 = vmatprep.subr.bf16.mxu0 %v19254_v49  ;;  %17474 = vmatpush3.bf16.msra.mxu1 %v19252_v50  ;;  %v1238_v46 = vpack.c.bf16 %v539_v41, %v539_v41  ;;  %v540_v47 = vcombine.high %v538_v43, %v538_v43  ;;  %v1239_v49 = vpack.c.bf16 %v538_v43, %v538_v43  ;;  %v19291_v50 = vld [vmem:[%s20437_s3 + $0xe48] sm:$0xff]  }
 0x1de   : > { %17503 = vmatprep.subr.bf16.mxu1 %v19255_v53  ;;  %v19292_v53 = vld [vmem:[%s20437_s3 + $0xec8] sm:$0xff]  }
 0x1df   : > { %13098 = vmatmul.mubr.bf16.vlgmr.msra.gmra.mrb[48].mxu0 %v1233_v54  ;;  %v1240_v51 = vpack.c.bf16 %v540_v47, %v540_v47  ;;  %v19293_v54 = vld [vmem:[%s20437_s3 + $0xe08] sm:$0xff]   ;;  %v19328_v47 = vld [vmem:[%s20437_s3 + $0xf50] sm:$0xff]  }
 0x1e0   : > { %17482 = vmatpush3.bf16.msra.mxu0 %v19256_v55  ;;  %13138 = vmatmul.mubr.bf16.vlgmr.msra.gmra.mrb[48].mxu1 %v1235_v59  ;;  %v19295_v55 = vld [vmem:[%s20437_s3 + $0xe50] sm:$0xff]   ;;  %v19299_v59 = vld [vmem:[%s20437_s3 + $0xe58] sm:$0xff]   ;;  %v19324_v41 = vld [vmem:[%s20437_s3 + $0xf48] sm:$0xff]  }
 0x1e1   : > { %17483 = vmatprep.subr.bf16.mxu0 %v19258_v60  ;;  %17504 = vmatpush3.bf16.msra.mxu1 %v19257_v58  ;;  %v19297_v58 = vld [vmem:[%s20437_s3 + $0xe10] sm:$0xff]  }
 0x1e2   : > { %17505 = vmatprep.subr.bf16.mxu1 %v19259_v62  ;;  %13177 = vmatprep.mubr.bf16.mxu0 %v1238_v46  ;;  %v19298_v60 = vld [vmem:[%s20437_s3 + $0xe90] sm:$0xff]   ;;  %v19301_v62 = vld [vmem:[%s20437_s3 + $0xe18] sm:$0xff]   ;;  %v19327_v46 = vld [vmem:[%s20437_s3 + $0xf88] sm:$0xff]  }
 0x1e3   : > { %13217 = vmatprep.mubr.bf16.mxu1 %v1240_v51  ;;  %v19332_v51 = vld [vmem:[%s20437_s3 + $0xf58] sm:$0xff]  }
 0x1e4   : > { %17484 = vmatpush3.bf16.msra.mxu0 %v19260_v63  ;;  %v19303_v63 = vld [vmem:[%s20437_s3 + $0xe60] sm:$0xff]  }
 0x1e5   : > { %17485 = vmatprep.subr.bf16.mxu0 %v19262_v1  ;;  %17506 = vmatpush3.bf16.msra.mxu1 %v19261_v0  ;;  %v19302_v0 = vld [vmem:[%s20437_s3 + $0xe98] sm:$0xff]   ;;  %v19304_v1 = vld [vmem:[%s20437_s3 + $0xee0] sm:$0xff]  }
 0x1e6   : > { %17507 = vmatprep.subr.bf16.mxu1 %v19263_v2  ;;  %v19305_v2 = vld [vmem:[%s20437_s3 + $0xe20] sm:$0xff]  }
 0x1e8   : > { %17486 = vmatpush3.bf16.msra.mxu0 %v19264_v3  ;;  %v19307_v3 = vld [vmem:[%s20437_s3 + $0xe68] sm:$0xff]  }
 0x1e9   : > { %17487 = vmatprep.subr.bf16.mxu0 %v19266_v5  ;;  %17508 = vmatpush3.bf16.msra.mxu1 %v19265_v4  ;;  %v19306_v4 = vld [vmem:[%s20437_s3 + $0xea0] sm:$0xff]  }
 0x1ea   : > { %17509 = vmatprep.subr.bf16.mxu1 %v19267_v6 }
 0x1ec   : > { %17488 = vmatpush3.bf16.msra.mxu0 %v19268_v7  ;;  %v19308_v7 = vld [vmem:[%s20437_s3 + $0xee8] sm:$0xff]  }
 0x1ed   : > { %17489 = vmatprep.subr.bf16.mxu0 %v19270_v9  ;;  %17510 = vmatpush3.bf16.msra.mxu1 %v19269_v8  ;;  %v19309_v8 = vld [vmem:[%s20437_s3 + $0xe28] sm:$0xff]  }
 0x1ee   : > { %17511 = vmatprep.subr.bf16.mxu1 %v19271_v10 }
 0x1f0   : > { %17490 = vmatpush3.bf16.msra.mxu0 %v19272_v11  ;;  %v19310_v11 = vld [vmem:[%s20437_s3 + $0xea8] sm:$0xff]  }
 0x1f1   : > { %17491 = vmatprep.subr.bf16.mxu0 %v19274_v13  ;;  %17512 = vmatpush3.bf16.msra.mxu1 %v19273_v12 }
 0x1f2   : > { %v17189_v16 = vpop.f32.mrb[24].mxu0  ;;  %17513 = vmatprep.subr.bf16.mxu1 %v19275_v14 }
 0x1f3   : > { %v17211_v17 = vpop.f32.mrb[24].mxu1  ;;  %v17190_v20 = vpop.f32.mrb[25].mxu0 }
 0x1f4   : > { %v17212_v21 = vpop.f32.mrb[25].mxu1  ;;  %v17191_v22 = vadd.f32 %v17190_v20, %v17189_v16  ;;  %v17192_v24 = vpop.f32.mrb[26].mxu0  ;;  %17492 = vmatpush3.bf16.msra.mxu0 %v19276_v15  ;;  %v19311_v16 = vld [vmem:[%s20437_s3 + $0xe70] sm:$0xff]  }
 0x1f5   : > { %v17213_v23 = vadd.f32 %v17212_v21, %v17211_v17  ;;  %v17214_v25 = vpop.f32.mrb[26].mxu1  ;;  %v17193_v28 = vpop.f32.mrb[27].mxu0  ;;  %17493 = vmatprep.subr.bf16.mxu0 %v19278_v19  ;;  %17514 = vmatpush3.bf16.msra.mxu1 %v19277_v18  ;;  %v19312_v17 = vld [vmem:[%s20437_s3 + $0xef0] sm:$0xff]   ;;  %v19315_v24 = vld [vmem:[%s20437_s3 + $0xe78] sm:$0xff]  }
 0x1f6   : > { %v17215_v29 = vpop.f32.mrb[27].mxu1  ;;  %v12620_v30 = vadd.f32 %v17191_v22, %v20917_v44  ;;  %17515 = vmatprep.subr.bf16.mxu1 %v19279_v26  ;;  %v19288_v44 = vld [vmem:[%s20437_s3 + $0xec0] sm:$0xff]   ;;  %v19313_v21 = vld [vmem:[%s20437_s3 + $0xe30] sm:$0xff]   ;;  %v19316_v25 = vld [vmem:[%s20437_s3 + $0xef8] sm:$0xff]  }
 0x1f7   : > { %v19314_v22 = vld [vmem:[%s20437_s3 + $0xeb0] sm:$0xff]   ;;  %v19317_v26 = vld [vmem:[%s20437_s3 + $0xe38] sm:$0xff]  }
 0x1f8   : > { %v20954_v33 = vadd.f32 %v17213_v23, %v12620_v30  ;;  %17494 = vmatpush3.bf16.msra.mxu0 %v19280_v27  ;;  %v233_v27 = vld [vmem:[%s20447_s30 + $0x70] sm:$0xff]  ;;  %v19320_v30 = vld [vmem:[%s20437_s3 + $0xf40] sm:$0xff]  }
 0x1f9   : > { %17495 = vmatprep.subr.bf16.mxu0 %v19282_v32  ;;  %17516 = vmatpush3.bf16.msra.mxu1 %v19281_v31  ;;  %v548_v28 = vrot.slane %v233_v27, %v20485_v42  ;;  %v541_v29 = vcombine.high %v233_v27, %v233_v27  ;;  %v19318_v31 = vld [vmem:[%s20437_s3 + $0xeb8] sm:$0xff]   ;;  %v19355_v27 = vld [vmem:[%s20437_s3 + $0x1000] sm:$0xff]  }
 0x1fa   : > { %17517 = vmatprep.subr.bf16.mxu1 %v19283_v34  ;;  %v19321_v34 = vld [vmem:[%s20437_s3 + $0xfc0] sm:$0xff]  }
 0x1fb   : > { %v556_v32 = vcombine.high %v548_v28, %v548_v28 }
 0x1fc   : > { %17496 = vmatpush3.bf16.msra.mxu0 %v19284_v35  ;;  %v1241_v35 = vpack.c.bf16 %v548_v28, %v548_v28 }
 0x1fd   : > { %17525 = vmatprep.subr.bf16.mxu0 %v19287_v39  ;;  %17518 = vmatpush3.bf16.msra.mxu1 %v19285_v40  ;;  %v1242_v37 = vpack.c.bf16 %v556_v32, %v556_v32  ;;  %v19323_v39 = vld [vmem:[%s20437_s3 + $0xf80] sm:$0xff]   ;;  %v19357_v32 = vld [vmem:[%s20437_s3 + $0x1048] sm:$0xff]  }
 0x1fe   : > { %17547 = vmatprep.subr.bf16.mxu1 %v19288_v44  ;;  %v19325_v44 = vld [vmem:[%s20437_s3 + $0xfc8] sm:$0xff]  }
 0x1ff   : > { %13178 = vmatmul.mubr.bf16.vlgmr.msra.gmra.mrb[52].mxu0 %v1237_v45  ;;  %v19326_v45 = vld [vmem:[%s20437_s3 + $0xf08] sm:$0xff]  }
 0x200   : > { %17526 = vmatpush3.bf16.msra.mxu0 %v19289_v48  ;;  %13218 = vmatmul.mubr.bf16.vlgmr.msra.gmra.mrb[52].mxu1 %v1239_v49  ;;  %v19329_v48 = vld [vmem:[%s20437_s3 + $0xfd0] sm:$0xff]  }
 0x201   : > { %17527 = vmatprep.subr.bf16.mxu0 %v19291_v50  ;;  %17548 = vmatpush3.bf16.msra.mxu1 %v19290_v52  ;;  %v19330_v49 = vld [vmem:[%s20437_s3 + $0xf10] sm:$0xff]   ;;  %v19333_v52 = vld [vmem:[%s20437_s3 + $0xfd8] sm:$0xff]  }
 0x202   : > { %17549 = vmatprep.subr.bf16.mxu1 %v19292_v53  ;;  %13257 = vmatprep.mubr.bf16.mxu0 %v1242_v37  ;;  %v19331_v50 = vld [vmem:[%s20437_s3 + $0xf90] sm:$0xff]   ;;  %v19334_v53 = vld [vmem:[%s20437_s3 + $0xf18] sm:$0xff]  }
 0x203   : > { %v19361_v37 = vld [vmem:[%s20437_s3 + $0x1050] sm:$0xff]  }
 0x204   : > { %17528 = vmatpush3.bf16.msra.mxu0 %v19293_v54  ;;  %v19335_v54 = vld [vmem:[%s20437_s3 + $0xf98] sm:$0xff]  }
 0x205   : > { %17529 = vmatprep.subr.bf16.mxu0 %v19295_v55  ;;  %17550 = vmatpush3.bf16.msra.mxu1 %v19294_v56  ;;  %v19336_v55 = vld [vmem:[%s20437_s3 + $0xf60] sm:$0xff]  }
 0x206   : > { %17551 = vmatprep.subr.bf16.mxu1 %v19296_v57  ;;  %v19337_v56 = vld [vmem:[%s20437_s3 + $0xfe0] sm:$0xff]  }
 0x207   : > { %v19338_v57 = vld [vmem:[%s20437_s3 + $0xf20] sm:$0xff]  }
 0x208   : > { %17530 = vmatpush3.bf16.msra.mxu0 %v19297_v58  ;;  %v19339_v58 = vld [vmem:[%s20437_s3 + $0xfa0] sm:$0xff]  }
 0x209   : > { %17531 = vmatprep.subr.bf16.mxu0 %v19299_v59  ;;  %17552 = vmatpush3.bf16.msra.mxu1 %v19298_v60  ;;  %v19340_v59 = vld [vmem:[%s20437_s3 + $0xf68] sm:$0xff]  }
 0x20a   : > { %17553 = vmatprep.subr.bf16.mxu1 %v19300_v61 }
 0x20c   : > { %17532 = vmatpush3.bf16.msra.mxu0 %v19301_v62  ;;  %v19341_v62 = vld [vmem:[%s20437_s3 + $0xfe8] sm:$0xff]  }
 0x20d   : > { %17533 = vmatprep.subr.bf16.mxu0 %v19303_v63  ;;  %17554 = vmatpush3.bf16.msra.mxu1 %v19302_v0  ;;  %v19342_v63 = vld [vmem:[%s20437_s3 + $0xf28] sm:$0xff]  }
 0x20e   : > { %17555 = vmatprep.subr.bf16.mxu1 %v19304_v1 }
 0x210   : > { %17534 = vmatpush3.bf16.msra.mxu0 %v19305_v2 }
 0x211   : > { %17535 = vmatprep.subr.bf16.mxu0 %v19307_v3  ;;  %17556 = vmatpush3.bf16.msra.mxu1 %v19306_v4 }
 0x212   : > { %v17233_v5 = vpop.f32.mrb[28].mxu0  ;;  %17557 = vmatprep.subr.bf16.mxu1 %v19308_v7  ;;  %v19344_v7 = vld [vmem:[%s20437_s3 + $0xf70] sm:$0xff]  }
 0x213   : > { %v17255_v6 = vpop.f32.mrb[28].mxu1  ;;  %v17234_v9 = vpop.f32.mrb[29].mxu0 }
 0x214   : > { %v17256_v10 = vpop.f32.mrb[29].mxu1  ;;  %v17235_v12 = vadd.f32 %v17234_v9, %v17233_v5  ;;  %v17236_v14 = vpop.f32.mrb[30].mxu0  ;;  %17536 = vmatpush3.bf16.msra.mxu0 %v19309_v8 }
 0x215   : > { %v17257_v13 = vadd.f32 %v17256_v10, %v17255_v6  ;;  %v17258_v15 = vpop.f32.mrb[30].mxu1  ;;  %v17237_v18 = vpop.f32.mrb[31].mxu0  ;;  %17537 = vmatprep.subr.bf16.mxu0 %v19311_v16  ;;  %17558 = vmatpush3.bf16.msra.mxu1 %v19310_v11  ;;  %v19343_v6 = vld [vmem:[%s20437_s3 + $0xfa8] sm:$0xff]   ;;  %v19345_v11 = vld [vmem:[%s20437_s3 + $0xff0] sm:$0xff]   ;;  %v19349_v16 = vld [vmem:[%s20437_s3 + $0xff8] sm:$0xff]  }
 0x216   : > { %v17259_v19 = vpop.f32.mrb[31].mxu1  ;;  %v12700_v20 = vadd.f32 %v17235_v12, %v20954_v33  ;;  %17559 = vmatprep.subr.bf16.mxu1 %v19312_v17  ;;  %v555_v33 = vrot.slane %v541_v29, %v20485_v42  ;;  %v19346_v12 = vld [vmem:[%s20437_s3 + $0xf30] sm:$0xff]   ;;  %v19348_v15 = vld [vmem:[%s20437_s3 + $0xf78] sm:$0xff]  }
 0x217   : > { %v19347_v14 = vld [vmem:[%s20437_s3 + $0xfb0] sm:$0xff]   ;;  %v19350_v17 = vld [vmem:[%s20437_s3 + $0xf38] sm:$0xff]  }
 0x218   : > { %v20991_v23 = vadd.f32 %v17257_v13, %v12700_v20  ;;  %17538 = vmatpush3.bf16.msra.mxu0 %v19313_v21  ;;  %v557_v38 = vcombine.high %v555_v33, %v555_v33  ;;  %v1243_v40 = vpack.c.bf16 %v555_v33, %v555_v33  ;;  %v234_v18 = vld [vmem:[%s20447_s30 + $0x78] sm:$0xff]  ;;  %v19353_v21 = vld [vmem:[%s20437_s3 + $0x1040] sm:$0xff]  }
 0x219   : > { %17539 = vmatprep.subr.bf16.mxu0 %v19315_v24  ;;  %17560 = vmatpush3.bf16.msra.mxu1 %v19314_v22  ;;  %v565_v19 = vrot.slane %v234_v18, %v20485_v42  ;;  %v558_v20 = vcombine.high %v234_v18, %v234_v18  ;;  %v19351_v22 = vld [vmem:[%s20437_s3 + $0xfb8] sm:$0xff]   ;;  %v19388_v18 = vld [vmem:[%s20437_s3 + $0x1100] sm:$0xff]  }
 0x21a   : > { %17561 = vmatprep.subr.bf16.mxu1 %v19316_v25  ;;  %v1244_v43 = vpack.c.bf16 %v557_v38, %v557_v38  ;;  %v19354_v25 = vld [vmem:[%s20437_s3 + $0x10c0] sm:$0xff]   ;;  %v19362_v38 = vld [vmem:[%s20437_s3 + $0x10d0] sm:$0xff]  }
 0x21b   : > { %v572_v24 = vrot.slane %v558_v20, %v20485_v42 }
 0x21c   : > { %17540 = vmatpush3.bf16.msra.mxu0 %v19317_v26  ;;  %13297 = vmatprep.mubr.bf16.mxu1 %v1244_v43  ;;  %v1245_v26 = vpack.c.bf16 %v565_v19, %v565_v19  ;;  %v19366_v43 = vld [vmem:[%s20437_s3 + $0x10d8] sm:$0xff]  }
 0x21d   : > { %17569 = vmatprep.subr.bf16.mxu0 %v19320_v30  ;;  %17562 = vmatpush3.bf16.msra.mxu1 %v19318_v31  ;;  %v574_v29 = vcombine.high %v572_v24, %v572_v24  ;;  %v19356_v30 = vld [vmem:[%s20437_s3 + $0x1080] sm:$0xff]   ;;  %v1247_v31 = vpack.c.bf16 %v572_v24, %v572_v24 }
 0x21e   : > { %17591 = vmatprep.subr.bf16.mxu1 %v19321_v34  ;;  %v19358_v34 = vld [vmem:[%s20437_s3 + $0x10c8] sm:$0xff]  }
 0x21f   : > { %13258 = vmatmul.mubr.bf16.vlgmr.msra.gmra.mrb[56].mxu0 %v1241_v35  ;;  %v1248_v33 = vpack.c.bf16 %v574_v29, %v574_v29  ;;  %v19359_v35 = vld [vmem:[%s20437_s3 + $0x1008] sm:$0xff]   ;;  %v19395_v29 = vld [vmem:[%s20437_s3 + $0x11d0] sm:$0xff]  }
 0x220   : > { %17570 = vmatpush3.bf16.msra.mxu0 %v19322_v36  ;;  %13298 = vmatmul.mubr.bf16.vlgmr.msra.gmra.mrb[56].mxu1 %v1243_v40  ;;  %v19360_v36 = vld [vmem:[%s20437_s3 + $0x1088] sm:$0xff]   ;;  %v19364_v40 = vld [vmem:[%s20437_s3 + $0x1090] sm:$0xff]  }
 0x221   : > { %17571 = vmatprep.subr.bf16.mxu0 %v19324_v41  ;;  %17592 = vmatpush3.bf16.msra.mxu1 %v19323_v39  ;;  %v19363_v39 = vld [vmem:[%s20437_s3 + $0x1010] sm:$0xff]   ;;  %v19365_v41 = vld [vmem:[%s20437_s3 + $0x1058] sm:$0xff]  }
 0x222   : > { %17593 = vmatprep.subr.bf16.mxu1 %v19325_v44  ;;  %13377 = vmatprep.mubr.bf16.mxu1 %v1248_v33  ;;  %v19367_v44 = vld [vmem:[%s20437_s3 + $0x1018] sm:$0xff]  }
 0x223   : > { %v19399_v33 = vld [vmem:[%s20437_s3 + $0x11d8] sm:$0xff]  }
 0x224   : > { %17572 = vmatpush3.bf16.msra.mxu0 %v19326_v45  ;;  %v19368_v45 = vld [vmem:[%s20437_s3 + $0x1098] sm:$0xff]  }
 0x225   : > { %17573 = vmatprep.subr.bf16.mxu0 %v19328_v47  ;;  %17594 = vmatpush3.bf16.msra.mxu1 %v19327_v46  ;;  %v19369_v46 = vld [vmem:[%s20437_s3 + $0x1060] sm:$0xff]  }
 0x226   : > { %17595 = vmatprep.subr.bf16.mxu1 %v19329_v48  ;;  %v19370_v47 = vld [vmem:[%s20437_s3 + $0x10e0] sm:$0xff]  }
 0x227   : > { %v19371_v48 = vld [vmem:[%s20437_s3 + $0x1020] sm:$0xff]  }
 0x228   : > { %17574 = vmatpush3.bf16.msra.mxu0 %v19330_v49  ;;  %v19372_v49 = vld [vmem:[%s20437_s3 + $0x10a0] sm:$0xff]  }
 0x229   : > { %17575 = vmatprep.subr.bf16.mxu0 %v19332_v51  ;;  %17596 = vmatpush3.bf16.msra.mxu1 %v19331_v50  ;;  %v19373_v51 = vld [vmem:[%s20437_s3 + $0x1068] sm:$0xff]  }
 0x22a   : > { %17597 = vmatprep.subr.bf16.mxu1 %v19333_v52 }
 0x22c   : > { %17576 = vmatpush3.bf16.msra.mxu0 %v19334_v53 }
 0x22d   : > { %17577 = vmatprep.subr.bf16.mxu0 %v19336_v55  ;;  %17598 = vmatpush3.bf16.msra.mxu1 %v19335_v54  ;;  %v19374_v54 = vld [vmem:[%s20437_s3 + $0x10e8] sm:$0xff]  }
 0x22e   : > { %17599 = vmatprep.subr.bf16.mxu1 %v19337_v56  ;;  %v19375_v55 = vld [vmem:[%s20437_s3 + $0x1028] sm:$0xff]  }
 0x230   : > { %17578 = vmatpush3.bf16.msra.mxu0 %v19338_v57 }
 0x231   : > { %17579 = vmatprep.subr.bf16.mxu0 %v19340_v59  ;;  %17600 = vmatpush3.bf16.msra.mxu1 %v19339_v58 }
 0x232   : > { %v17277_v60 = vpop.f32.mrb[32].mxu0  ;;  %17601 = vmatprep.subr.bf16.mxu1 %v19341_v62 }
 0x233   : > { %v17299_v61 = vpop.f32.mrb[32].mxu1  ;;  %v17278_v0 = vpop.f32.mrb[33].mxu0 }
 0x234   : > { %v17300_v1 = vpop.f32.mrb[33].mxu1  ;;  %v17279_v2 = vadd.f32 %v17278_v0, %v17277_v60  ;;  %v17280_v4 = vpop.f32.mrb[34].mxu0  ;;  %17580 = vmatpush3.bf16.msra.mxu0 %v19342_v63  ;;  %v19377_v63 = vld [vmem:[%s20437_s3 + $0x1070] sm:$0xff]  }
 0x235   : > { %v17301_v3 = vadd.f32 %v17300_v1, %v17299_v61  ;;  %v17302_v5 = vpop.f32.mrb[34].mxu1  ;;  %v17281_v8 = vpop.f32.mrb[35].mxu0  ;;  %17581 = vmatprep.subr.bf16.mxu0 %v19344_v7  ;;  %17602 = vmatpush3.bf16.msra.mxu1 %v19343_v6  ;;  %v19376_v61 = vld [vmem:[%s20437_s3 + $0x10a8] sm:$0xff]   ;;  %v19379_v4 = vld [vmem:[%s20437_s3 + $0x1030] sm:$0xff]   ;;  %v19381_v6 = vld [vmem:[%s20437_s3 + $0x1078] sm:$0xff]  }
 0x236   : > { %v17303_v9 = vpop.f32.mrb[35].mxu1  ;;  %v12780_v10 = vadd.f32 %v17279_v2, %v20991_v23  ;;  %17603 = vmatprep.subr.bf16.mxu1 %v19345_v11  ;;  %v573_v23 = vcombine.high %v565_v19, %v565_v19  ;;  %v19378_v2 = vld [vmem:[%s20437_s3 + $0x10f0] sm:$0xff]   ;;  %v19382_v7 = vld [vmem:[%s20437_s3 + $0x10f8] sm:$0xff]  }
 0x237   : > { %v19380_v5 = vld [vmem:[%s20437_s3 + $0x10b0] sm:$0xff]   ;;  %v19383_v8 = vld [vmem:[%s20437_s3 + $0x1038] sm:$0xff]   ;;  %v235_v9 = vld [vmem:[%s20447_s30 + $0x80] sm:$0xff] }
 0x238   : > { %v21028_v13 = vadd.f32 %v17301_v3, %v12780_v10  ;;  %17582 = vmatpush3.bf16.msra.mxu0 %v19346_v12  ;;  %v1246_v28 = vpack.c.bf16 %v573_v23, %v573_v23  ;;  %v19384_v10 = vld [vmem:[%s20437_s3 + $0x10b8] sm:$0xff]   ;;  %v582_v11 = vrot.slane %v235_v9, %v20485_v42  ;;  %v575_v12 = vcombine.high %v235_v9, %v235_v9  ;;  %v19390_v23 = vld [vmem:[%s20437_s3 + $0x1148] sm:$0xff]  }
 0x239   : > { %17583 = vmatprep.subr.bf16.mxu0 %v19348_v15  ;;  %17604 = vmatpush3.bf16.msra.mxu1 %v19347_v14 }
 0x23a   : > { %17605 = vmatprep.subr.bf16.mxu1 %v19349_v16  ;;  %13337 = vmatprep.mubr.bf16.mxu0 %v1246_v28  ;;  %v590_v14 = vcombine.high %v582_v11, %v582_v11  ;;  %v589_v15 = vrot.slane %v575_v12, %v20485_v42  ;;  %v19387_v16 = vld [vmem:[%s20437_s3 + $0x11c0] sm:$0xff]   ;;  %v19394_v28 = vld [vmem:[%s20437_s3 + $0x1150] sm:$0xff]  }
 0x23c   : > { %17584 = vmatpush3.bf16.msra.mxu0 %v19350_v17  ;;  %v1249_v17 = vpack.c.bf16 %v582_v11, %v582_v11  ;;  %v1250_v19 = vpack.c.bf16 %v590_v14, %v590_v14  ;;  %v591_v20 = vcombine.high %v589_v15, %v589_v15  ;;  %v19421_v11 = vld [vmem:[%s20437_s3 + $0x1200] sm:$0xff]  }
 0x23d   : > { %17613 = vmatprep.subr.bf16.mxu0 %v19353_v21  ;;  %17606 = vmatpush3.bf16.msra.mxu1 %v19351_v22  ;;  %v19389_v21 = vld [vmem:[%s20437_s3 + $0x1180] sm:$0xff]   ;;  %v1251_v22 = vpack.c.bf16 %v589_v15, %v589_v15 }
 0x23e   : > { %17635 = vmatprep.subr.bf16.mxu1 %v19354_v25  ;;  %v1252_v24 = vpack.c.bf16 %v591_v20, %v591_v20  ;;  %v19391_v25 = vld [vmem:[%s20437_s3 + $0x11c8] sm:$0xff]   ;;  %v19422_v15 = vld [vmem:[%s20437_s3 + $0x1280] sm:$0xff]   ;;  %v19428_v20 = vld [vmem:[%s20437_s3 + $0x12d0] sm:$0xff]  }
 0x23f   : > { %13338 = vmatmul.mubr.bf16.vlgmr.msra.gmra.mrb[60].mxu0 %v1245_v26  ;;  %v19392_v26 = vld [vmem:[%s20437_s3 + $0x1108] sm:$0xff]  }
 0x240   : > { %17614 = vmatpush3.bf16.msra.mxu0 %v19355_v27  ;;  %13378 = vmatmul.mubr.bf16.vlgmr.msra.gmra.mrb[60].mxu1 %v1247_v31  ;;  %v19393_v27 = vld [vmem:[%s20437_s3 + $0x1188] sm:$0xff]   ;;  %v19397_v31 = vld [vmem:[%s20437_s3 + $0x1190] sm:$0xff]  }
 0x241   : > { %17615 = vmatprep.subr.bf16.mxu0 %v19357_v32  ;;  %17636 = vmatpush3.bf16.msra.mxu1 %v19356_v30  ;;  %v19396_v30 = vld [vmem:[%s20437_s3 + $0x1110] sm:$0xff]   ;;  %v19398_v32 = vld [vmem:[%s20437_s3 + $0x1158] sm:$0xff]  }
 0x242   : > { %17637 = vmatprep.subr.bf16.mxu1 %v19358_v34  ;;  %13417 = vmatprep.mubr.bf16.mxu0 %v1250_v19  ;;  %v19400_v34 = vld [vmem:[%s20437_s3 + $0x1118] sm:$0xff]   ;;  %v19426_v19 = vld [vmem:[%s20437_s3 + $0x1288] sm:$0xff]  }
 0x243   : > { %13457 = vmatprep.mubr.bf16.mxu1 %v1252_v24  ;;  %v19432_v24 = vld [vmem:[%s20437_s3 + $0x12d8] sm:$0xff]  }
 0x244   : > { %17616 = vmatpush3.bf16.msra.mxu0 %v19359_v35  ;;  %v19401_v35 = vld [vmem:[%s20437_s3 + $0x1198] sm:$0xff]  }
 0x245   : > { %17617 = vmatprep.subr.bf16.mxu0 %v19361_v37  ;;  %17638 = vmatpush3.bf16.msra.mxu1 %v19360_v36  ;;  %v19402_v36 = vld [vmem:[%s20437_s3 + $0x1160] sm:$0xff]  }
 0x246   : > { %17639 = vmatprep.subr.bf16.mxu1 %v19362_v38  ;;  %v19403_v37 = vld [vmem:[%s20437_s3 + $0x11e0] sm:$0xff]  }
 0x247   : > { %v19404_v38 = vld [vmem:[%s20437_s3 + $0x1120] sm:$0xff]  }
 0x248   : > { %17618 = vmatpush3.bf16.msra.mxu0 %v19363_v39  ;;  %v19405_v39 = vld [vmem:[%s20437_s3 + $0x11a0] sm:$0xff]  }
 0x249   : > { %17619 = vmatprep.subr.bf16.mxu0 %v19365_v41  ;;  %17640 = vmatpush3.bf16.msra.mxu1 %v19364_v40  ;;  %v19406_v41 = vld [vmem:[%s20437_s3 + $0x1168] sm:$0xff]  }
 0x24a   : > { %17641 = vmatprep.subr.bf16.mxu1 %v19366_v43 }
 0x24c   : > { %17620 = vmatpush3.bf16.msra.mxu0 %v19367_v44  ;;  %v19407_v44 = vld [vmem:[%s20437_s3 + $0x11e8] sm:$0xff]  }
 0x24d   : > { %17621 = vmatprep.subr.bf16.mxu0 %v19369_v46  ;;  %17642 = vmatpush3.bf16.msra.mxu1 %v19368_v45 }
 0x24e   : > { %17643 = vmatprep.subr.bf16.mxu1 %v19370_v47 }
 0x250   : > { %17622 = vmatpush3.bf16.msra.mxu0 %v19371_v48 }
 0x251   : > { %17623 = vmatprep.subr.bf16.mxu0 %v19373_v51  ;;  %17644 = vmatpush3.bf16.msra.mxu1 %v19372_v49  ;;  %v19408_v49 = vld [vmem:[%s20437_s3 + $0x1128] sm:$0xff]  }
 0x252   : > { %v17321_v50 = vpop.f32.mrb[36].mxu0  ;;  %17645 = vmatprep.subr.bf16.mxu1 %v19374_v54 }
 0x253   : > { %v17343_v52 = vpop.f32.mrb[36].mxu1  ;;  %v17322_v53 = vpop.f32.mrb[37].mxu0 }
 0x254   : > { %v17323_v56 = vadd.f32 %v17322_v53, %v17321_v50  ;;  %v17344_v57 = vpop.f32.mrb[37].mxu1  ;;  %v17324_v58 = vpop.f32.mrb[38].mxu0  ;;  %17624 = vmatpush3.bf16.msra.mxu0 %v19375_v55  ;;  %v19409_v50 = vld [vmem:[%s20437_s3 + $0x11a8] sm:$0xff]   ;;  %v19410_v55 = vld [vmem:[%s20437_s3 + $0x1170] sm:$0xff]  }
 0x255   : > { %v17345_v59 = vadd.f32 %v17344_v57, %v17343_v52  ;;  %v17346_v60 = vpop.f32.mrb[38].mxu1  ;;  %v17325_v62 = vpop.f32.mrb[39].mxu0  ;;  %17625 = vmatprep.subr.bf16.mxu0 %v19377_v63  ;;  %17646 = vmatpush3.bf16.msra.mxu1 %v19376_v61  ;;  %v19411_v57 = vld [vmem:[%s20437_s3 + $0x11f0] sm:$0xff]   ;;  %v19416_v63 = vld [vmem:[%s20437_s3 + $0x1138] sm:$0xff]  }
 0x256   : > { %v12860_v0 = vadd.f32 %v17323_v56, %v21028_v13  ;;  %v17347_v1 = vpop.f32.mrb[39].mxu1  ;;  %17647 = vmatprep.subr.bf16.mxu1 %v19378_v2  ;;  %v19386_v13 = vld [vmem:[%s20437_s3 + $0x1140] sm:$0xff]   ;;  %v19414_v60 = vld [vmem:[%s20437_s3 + $0x1178] sm:$0xff]   ;;  %v19413_v61 = vld [vmem:[%s20437_s3 + $0x11b0] sm:$0xff]  }
 0x257   : > { %v19415_v62 = vld [vmem:[%s20437_s3 + $0x11f8] sm:$0xff]  }
 0x258   : > { %v21065_v3 = vadd.f32 %v17345_v59, %v12860_v0  ;;  %17626 = vmatpush3.bf16.msra.mxu0 %v19379_v4  ;;  %v19412_v59 = vld [vmem:[%s20437_s3 + $0x1130] sm:$0xff]   ;;  %v236_v0 = vld [vmem:[%s20447_s30 + $0x88] sm:$0xff]  ;;  %v19417_v4 = vld [vmem:[%s20437_s3 + $0x11b8] sm:$0xff]  }
 0x259   : > { %17627 = vmatprep.subr.bf16.mxu0 %v19381_v6  ;;  %17648 = vmatpush3.bf16.msra.mxu1 %v19380_v5  ;;  %v599_v1 = vrot.slane %v236_v0, %v20485_v42  ;;  %v592_v2 = vcombine.high %v236_v0, %v236_v0 }
 0x25a   : > { %17649 = vmatprep.subr.bf16.mxu1 %v19382_v7  ;;  %v19420_v7 = vld [vmem:[%s20437_s3 + $0x12c0] sm:$0xff]  }
 0x25b   : > { %v607_v5 = vcombine.high %v599_v1, %v599_v1  ;;  %v606_v6 = vrot.slane %v592_v2, %v20485_v42  ;;  %v19454_v2 = vld [vmem:[%s20437_s3 + $0x1300] sm:$0xff]  }
 0x25c   : > { %17628 = vmatpush3.bf16.msra.mxu0 %v19383_v8  ;;  %v1253_v8 = vpack.c.bf16 %v599_v1, %v599_v1 }
 0x25d   : > { %17657 = vmatprep.subr.bf16.mxu0 %v19386_v13  ;;  %17650 = vmatpush3.bf16.msra.mxu1 %v19384_v10  ;;  %v1254_v9 = vpack.c.bf16 %v607_v5, %v607_v5  ;;  %v608_v10 = vcombine.high %v606_v6, %v606_v6  ;;  %v1255_v12 = vpack.c.bf16 %v606_v6, %v606_v6  ;;  %v19423_v13 = vld [vmem:[%s20437_s3 + $0x1248] sm:$0xff]   ;;  %v19455_v6 = vld [vmem:[%s20437_s3 + $0x1380] sm:$0xff]  }
 0x25e   : > { %17679 = vmatprep.subr.bf16.mxu1 %v19387_v16  ;;  %v19424_v16 = vld [vmem:[%s20437_s3 + $0x12c8] sm:$0xff]  }
 0x25f   : > { %13418 = vmatmul.mubr.bf16.vlgmr.msra.gmra.mrb[64].mxu0 %v1249_v17  ;;  %v1256_v14 = vpack.c.bf16 %v608_v10, %v608_v10  ;;  %v19425_v17 = vld [vmem:[%s20437_s3 + $0x1208] sm:$0xff]  }
 0x260   : > { %17658 = vmatpush3.bf16.msra.mxu0 %v19388_v18  ;;  %13458 = vmatmul.mubr.bf16.vlgmr.msra.gmra.mrb[64].mxu1 %v1251_v22  ;;  %v19427_v18 = vld [vmem:[%s20437_s3 + $0x1250] sm:$0xff]   ;;  %v19431_v22 = vld [vmem:[%s20437_s3 + $0x1258] sm:$0xff]   ;;  %v19459_v10 = vld [vmem:[%s20437_s3 + $0x1388] sm:$0xff]  }
 0x261   : > { %17659 = vmatprep.subr.bf16.mxu0 %v19390_v23  ;;  %17680 = vmatpush3.bf16.msra.mxu1 %v19389_v21  ;;  %v19429_v21 = vld [vmem:[%s20437_s3 + $0x1210] sm:$0xff]  }
 0x262   : > { %17681 = vmatprep.subr.bf16.mxu1 %v19391_v25  ;;  %13497 = vmatprep.mubr.bf16.mxu0 %v1254_v9  ;;  %v19430_v23 = vld [vmem:[%s20437_s3 + $0x1290] sm:$0xff]   ;;  %v19433_v25 = vld [vmem:[%s20437_s3 + $0x1218] sm:$0xff]  }
 0x263   : > { %13537 = vmatprep.mubr.bf16.mxu1 %v1256_v14  ;;  %v19460_v9 = vld [vmem:[%s20437_s3 + $0x1350] sm:$0xff]  }
 0x264   : > { %17660 = vmatpush3.bf16.msra.mxu0 %v19392_v26  ;;  %v19435_v26 = vld [vmem:[%s20437_s3 + $0x1260] sm:$0xff]   ;;  %v19463_v14 = vld [vmem:[%s20437_s3 + $0x1390] sm:$0xff]  }
 0x265   : > { %17661 = vmatprep.subr.bf16.mxu0 %v19394_v28  ;;  %17682 = vmatpush3.bf16.msra.mxu1 %v19393_v27  ;;  %v19434_v27 = vld [vmem:[%s20437_s3 + $0x1298] sm:$0xff]   ;;  %v19436_v28 = vld [vmem:[%s20437_s3 + $0x12e0] sm:$0xff]  }
 0x266   : > { %17683 = vmatprep.subr.bf16.mxu1 %v19395_v29  ;;  %v19437_v29 = vld [vmem:[%s20437_s3 + $0x1220] sm:$0xff]  }
 0x268   : > { %17662 = vmatpush3.bf16.msra.mxu0 %v19396_v30 }
 0x269   : > { %17663 = vmatprep.subr.bf16.mxu0 %v19398_v32  ;;  %17684 = vmatpush3.bf16.msra.mxu1 %v19397_v31  ;;  %v19439_v31 = vld [vmem:[%s20437_s3 + $0x1268] sm:$0xff]   ;;  %v19438_v32 = vld [vmem:[%s20437_s3 + $0x12a0] sm:$0xff]  }
 0x26a   : > { %17685 = vmatprep.subr.bf16.mxu1 %v19399_v33 }
 0x26c   : > { %17664 = vmatpush3.bf16.msra.mxu0 %v19400_v34 }
 0x26d   : > { %17665 = vmatprep.subr.bf16.mxu0 %v19402_v36  ;;  %17686 = vmatpush3.bf16.msra.mxu1 %v19401_v35  ;;  %v19440_v36 = vld [vmem:[%s20437_s3 + $0x12e8] sm:$0xff]  }
 0x26e   : > { %17687 = vmatprep.subr.bf16.mxu1 %v19403_v37 }
 0x270   : > { %17666 = vmatpush3.bf16.msra.mxu0 %v19404_v38  ;;  %v19441_v38 = vld [vmem:[%s20437_s3 + $0x1228] sm:$0xff]  }
 0x271   : > { %17667 = vmatprep.subr.bf16.mxu0 %v19406_v41  ;;  %17688 = vmatpush3.bf16.msra.mxu1 %v19405_v39 }
 0x272   : > { %v17365_v40 = vpop.f32.mrb[40].mxu0  ;;  %17689 = vmatprep.subr.bf16.mxu1 %v19407_v44 }
 0x273   : > { %v17366_v43 = vpop.f32.mrb[41].mxu0  ;;  %v17387_v45 = vpop.f32.mrb[40].mxu1 }
 0x274   : > { %v17367_v46 = vadd.f32 %v17366_v43, %v17365_v40  ;;  %v17368_v47 = vpop.f32.mrb[42].mxu0  ;;  %v17388_v48 = vpop.f32.mrb[41].mxu1  ;;  %17668 = vmatpush3.bf16.msra.mxu0 %v19408_v49  ;;  %v19442_v40 = vld [vmem:[%s20437_s3 + $0x12a8] sm:$0xff]  }
 0x275   : > { %v17369_v51 = vpop.f32.mrb[43].mxu0  ;;  %v17389_v53 = vadd.f32 %v17388_v48, %v17387_v45  ;;  %v17390_v54 = vpop.f32.mrb[42].mxu1  ;;  %17669 = vmatprep.subr.bf16.mxu0 %v19410_v55  ;;  %17690 = vmatpush3.bf16.msra.mxu1 %v19409_v50  ;;  %v19444_v48 = vld [vmem:[%s20437_s3 + $0x12f0] sm:$0xff]  }
 0x276   : > { %v12940_v52 = vadd.f32 %v17367_v46, %v21065_v3  ;;  %v17391_v56 = vpop.f32.mrb[43].mxu1  ;;  %17691 = vmatprep.subr.bf16.mxu1 %v19411_v57  ;;  %v19419_v3 = vld [vmem:[%s20437_s3 + $0x1240] sm:$0xff]   ;;  %v19443_v46 = vld [vmem:[%s20437_s3 + $0x1270] sm:$0xff]   ;;  %v19449_v54 = vld [vmem:[%s20437_s3 + $0x1238] sm:$0xff]  }
 0x277   : > { %v19445_v50 = vld [vmem:[%s20437_s3 + $0x1230] sm:$0xff]  }
 0x278   : > { %v21103_v58 = vadd.f32 %v17389_v53, %v12940_v52  ;;  %17670 = vmatpush3.bf16.msra.mxu0 %v19412_v59  ;;  %v19446_v51 = vld [vmem:[%s20437_s3 + $0x12b0] sm:$0xff]   ;;  %v19447_v52 = vld [vmem:[%s20437_s3 + $0x1278] sm:$0xff]  }
 0x279   : > { %17671 = vmatprep.subr.bf16.mxu0 %v19414_v60  ;;  %17692 = vmatpush3.bf16.msra.mxu1 %v19413_v61  ;;  %v19448_v53 = vld [vmem:[%s20437_s3 + $0x12f8] sm:$0xff]   ;;  %v237_v55 = vld [vmem:[%s20447_s30 + $0x90] sm:$0xff] }
 0x27a   : > { %17693 = vmatprep.subr.bf16.mxu1 %v19415_v62  ;;  %v616_v56 = vrot.slane %v237_v55, %v20485_v42  ;;  %v609_v57 = vcombine.high %v237_v55, %v237_v55  ;;  %v19450_v59 = vld [vmem:[%s20437_s3 + $0x12b8] sm:$0xff]   ;;  %v19453_v62 = vld [vmem:[%s20437_s3 + $0x13c0] sm:$0xff]  }
 0x27b   : > { %v19487_v55 = vld [vmem:[%s20437_s3 + $0x1400] sm:$0xff]  }
 0x27c   : > { %17672 = vmatpush3.bf16.msra.mxu0 %v19416_v63  ;;  %v624_v60 = vcombine.high %v616_v56, %v616_v56  ;;  %v623_v61 = vrot.slane %v609_v57, %v20485_v42  ;;  %v1257_v63 = vpack.c.bf16 %v616_v56, %v616_v56 }
 0x27d   : > { %17701 = vmatprep.subr.bf16.mxu0 %v19419_v3  ;;  %17694 = vmatpush3.bf16.msra.mxu1 %v19417_v4  ;;  %v19456_v4 = vld [vmem:[%s20437_s3 + $0x1348] sm:$0xff]  }
 0x27e   : > { %17723 = vmatprep.subr.bf16.mxu1 %v19420_v7  ;;  %v1258_v0 = vpack.c.bf16 %v624_v60, %v624_v60  ;;  %v625_v1 = vcombine.high %v623_v61, %v623_v61  ;;  %v1259_v3 = vpack.c.bf16 %v623_v61, %v623_v61  ;;  %v19457_v7 = vld [vmem:[%s20437_s3 + $0x13c8] sm:$0xff]  }
 0x27f   : > { %13498 = vmatmul.mubr.bf16.vlgmr.msra.gmra.mrb[68].mxu0 %v1253_v8  ;;  %v19458_v8 = vld [vmem:[%s20437_s3 + $0x1308] sm:$0xff]  }
 0x280   : > { %17702 = vmatpush3.bf16.msra.mxu0 %v19421_v11  ;;  %13538 = vmatmul.mubr.bf16.vlgmr.msra.gmra.mrb[68].mxu1 %v1255_v12  ;;  %v1260_v5 = vpack.c.bf16 %v625_v1, %v625_v1  ;;  %v19461_v11 = vld [vmem:[%s20437_s3 + $0x13d0] sm:$0xff]   ;;  %v19489_v60 = vld [vmem:[%s20437_s3 + $0x1448] sm:$0xff]  }
 0x281   : > { %17703 = vmatprep.subr.bf16.mxu0 %v19423_v13  ;;  %17724 = vmatpush3.bf16.msra.mxu1 %v19422_v15  ;;  %v19462_v12 = vld [vmem:[%s20437_s3 + $0x1310] sm:$0xff]   ;;  %v19464_v13 = vld [vmem:[%s20437_s3 + $0x1358] sm:$0xff]  }
 0x282   : > { %17725 = vmatprep.subr.bf16.mxu1 %v19424_v16  ;;  %13577 = vmatprep.mubr.bf16.mxu0 %v1258_v0  ;;  %v19465_v15 = vld [vmem:[%s20437_s3 + $0x13d8] sm:$0xff]   ;;  %v19492_v0 = vld [vmem:[%s20437_s3 + $0x1488] sm:$0xff]   ;;  %v19493_v1 = vld [vmem:[%s20437_s3 + $0x1450] sm:$0xff]  }
 0x283   : > { %13617 = vmatprep.mubr.bf16.mxu1 %v1260_v5  ;;  %v19466_v16 = vld [vmem:[%s20437_s3 + $0x1318] sm:$0xff]  }
 0x284   : > { %17704 = vmatpush3.bf16.msra.mxu0 %v19425_v17  ;;  %v19468_v17 = vld [vmem:[%s20437_s3 + $0x1360] sm:$0xff]   ;;  %v19497_v5 = vld [vmem:[%s20437_s3 + $0x1458] sm:$0xff]  }
 0x285   : > { %17705 = vmatprep.subr.bf16.mxu0 %v19427_v18  ;;  %17726 = vmatpush3.bf16.msra.mxu1 %v19426_v19  ;;  %v19467_v18 = vld [vmem:[%s20437_s3 + $0x1398] sm:$0xff]   ;;  %v19469_v19 = vld [vmem:[%s20437_s3 + $0x13e0] sm:$0xff]  }
 0x286   : > { %17727 = vmatprep.subr.bf16.mxu1 %v19428_v20  ;;  %v19470_v20 = vld [vmem:[%s20437_s3 + $0x1320] sm:$0xff]  }
 0x288   : > { %17706 = vmatpush3.bf16.msra.mxu0 %v19429_v21 }
 0x289   : > { %17707 = vmatprep.subr.bf16.mxu0 %v19431_v22  ;;  %17728 = vmatpush3.bf16.msra.mxu1 %v19430_v23  ;;  %v19472_v22 = vld [vmem:[%s20437_s3 + $0x1368] sm:$0xff]   ;;  %v19471_v23 = vld [vmem:[%s20437_s3 + $0x13a0] sm:$0xff]  }
 0x28a   : > { %17729 = vmatprep.subr.bf16.mxu1 %v19432_v24 }
 0x28c   : > { %17708 = vmatpush3.bf16.msra.mxu0 %v19433_v25 }
 0x28d   : > { %17709 = vmatprep.subr.bf16.mxu0 %v19435_v26  ;;  %17730 = vmatpush3.bf16.msra.mxu1 %v19434_v27  ;;  %v19473_v27 = vld [vmem:[%s20437_s3 + $0x13e8] sm:$0xff]  }
 0x28e   : > { %17731 = vmatprep.subr.bf16.mxu1 %v19436_v28 }
 0x290   : > { %17710 = vmatpush3.bf16.msra.mxu0 %v19437_v29  ;;  %v19474_v29 = vld [vmem:[%s20437_s3 + $0x1328] sm:$0xff]  }
 0x291   : > { %17711 = vmatprep.subr.bf16.mxu0 %v19439_v31  ;;  %17732 = vmatpush3.bf16.msra.mxu1 %v19438_v32  ;;  %v19475_v31 = vld [vmem:[%s20437_s3 + $0x13a8] sm:$0xff]  }
 0x292   : > { %v17409_v30 = vpop.f32.mrb[44].mxu0  ;;  %17733 = vmatprep.subr.bf16.mxu1 %v19440_v36  ;;  %v19476_v36 = vld [vmem:[%s20437_s3 + $0x1370] sm:$0xff]  }
 0x293   : > { %v17410_v33 = vpop.f32.mrb[45].mxu0  ;;  %v17431_v34 = vpop.f32.mrb[44].mxu1 }
 0x294   : > { %v17411_v35 = vadd.f32 %v17410_v33, %v17409_v30  ;;  %v17412_v37 = vpop.f32.mrb[46].mxu0  ;;  %v17432_v39 = vpop.f32.mrb[45].mxu1  ;;  %17712 = vmatpush3.bf16.msra.mxu0 %v19441_v38  ;;  %v19477_v38 = vld [vmem:[%s20437_s3 + $0x13f0] sm:$0xff]  }
 0x295   : > { %v17413_v41 = vpop.f32.mrb[47].mxu0  ;;  %v17433_v44 = vadd.f32 %v17432_v39, %v17431_v34  ;;  %v17434_v45 = vpop.f32.mrb[46].mxu1  ;;  %17713 = vmatprep.subr.bf16.mxu0 %v19443_v46  ;;  %17734 = vmatpush3.bf16.msra.mxu1 %v19442_v40  ;;  %v19478_v40 = vld [vmem:[%s20437_s3 + $0x1330] sm:$0xff]   ;;  %v238_v46 = vld [vmem:[%s20447_s30 + $0x98] sm:$0xff] }
 0x296   : > { %v13020_v43 = vadd.f32 %v17411_v35, %v21103_v58  ;;  %v17435_v47 = vpop.f32.mrb[47].mxu1  ;;  %17735 = vmatprep.subr.bf16.mxu1 %v19444_v48  ;;  %v19452_v58 = vld [vmem:[%s20437_s3 + $0x1340] sm:$0xff]   ;;  %v19479_v41 = vld [vmem:[%s20437_s3 + $0x13b0] sm:$0xff]   ;;  %v19482_v45 = vld [vmem:[%s20437_s3 + $0x1338] sm:$0xff]   ;;  %v633_v48 = vrot.slane %v238_v46, %v20485_v42 }
 0x297   : > { %v19483_v47 = vld [vmem:[%s20437_s3 + $0x13b8] sm:$0xff]  }
 0x298   : > { %v21141_v49 = vadd.f32 %v17433_v44, %v13020_v43  ;;  %17714 = vmatpush3.bf16.msra.mxu0 %v19445_v50  ;;  %v19480_v43 = vld [vmem:[%s20437_s3 + $0x1378] sm:$0xff]   ;;  %v19485_v50 = vld [vmem:[%s20437_s3 + $0x1440] sm:$0xff]  }
 0x299   : > { %17715 = vmatprep.subr.bf16.mxu0 %v19447_v52  ;;  %17736 = vmatpush3.bf16.msra.mxu1 %v19446_v51  ;;  %v19481_v44 = vld [vmem:[%s20437_s3 + $0x13f8] sm:$0xff]   ;;  %v641_v51 = vcombine.high %v633_v48, %v633_v48 }
 0x29a   : > { %17737 = vmatprep.subr.bf16.mxu1 %v19448_v53  ;;  %v19486_v53 = vld [vmem:[%s20437_s3 + $0x14c0] sm:$0xff]  }
 0x29b   : > { %v1262_v56 = vpack.c.bf16 %v641_v51, %v641_v51  ;;  %v19522_v51 = vld [vmem:[%s20437_s3 + $0x1548] sm:$0xff]  }
 0x29c   : > { %17716 = vmatpush3.bf16.msra.mxu0 %v19449_v54  ;;  %v1261_v54 = vpack.c.bf16 %v633_v48, %v633_v48 }
 0x29d   : > { %17745 = vmatprep.subr.bf16.mxu0 %v19452_v58  ;;  %17738 = vmatpush3.bf16.msra.mxu1 %v19450_v59  ;;  %v19488_v58 = vld [vmem:[%s20437_s3 + $0x1480] sm:$0xff]  }
 0x29e   : > { %17767 = vmatprep.subr.bf16.mxu1 %v19453_v62  ;;  %v19490_v62 = vld [vmem:[%s20437_s3 + $0x14c8] sm:$0xff]  }
 0x29f   : > { %13578 = vmatmul.mubr.bf16.vlgmr.msra.gmra.mrb[72].mxu0 %v1257_v63  ;;  %v19491_v63 = vld [vmem:[%s20437_s3 + $0x1408] sm:$0xff]  }
 0x2a0   : > { %17746 = vmatpush3.bf16.msra.mxu0 %v19454_v2  ;;  %13618 = vmatmul.mubr.bf16.vlgmr.msra.gmra.mrb[72].mxu1 %v1259_v3  ;;  %v19494_v2 = vld [vmem:[%s20437_s3 + $0x14d0] sm:$0xff]  }
 0x2a1   : > { %17747 = vmatprep.subr.bf16.mxu0 %v19456_v4  ;;  %17768 = vmatpush3.bf16.msra.mxu1 %v19455_v6  ;;  %v19495_v3 = vld [vmem:[%s20437_s3 + $0x1410] sm:$0xff]   ;;  %v19498_v6 = vld [vmem:[%s20437_s3 + $0x14d8] sm:$0xff]  }
 0x2a2   : > { %17769 = vmatprep.subr.bf16.mxu1 %v19457_v7  ;;  %13657 = vmatprep.mubr.bf16.mxu0 %v1262_v56  ;;  %v19496_v4 = vld [vmem:[%s20437_s3 + $0x1490] sm:$0xff]   ;;  %v19499_v7 = vld [vmem:[%s20437_s3 + $0x1418] sm:$0xff]  }
 0x2a3   : > { %v19526_v56 = vld [vmem:[%s20437_s3 + $0x1550] sm:$0xff]  }
 0x2a4   : > { %17748 = vmatpush3.bf16.msra.mxu0 %v19458_v8  ;;  %v19500_v8 = vld [vmem:[%s20437_s3 + $0x1498] sm:$0xff]  }
 0x2a5   : > { %17749 = vmatprep.subr.bf16.mxu0 %v19460_v9  ;;  %17770 = vmatpush3.bf16.msra.mxu1 %v19459_v10  ;;  %v19501_v9 = vld [vmem:[%s20437_s3 + $0x1460] sm:$0xff]  }
 0x2a6   : > { %17771 = vmatprep.subr.bf16.mxu1 %v19461_v11  ;;  %v19502_v10 = vld [vmem:[%s20437_s3 + $0x14e0] sm:$0xff]  }
 0x2a7   : > { %v19503_v11 = vld [vmem:[%s20437_s3 + $0x1420] sm:$0xff]  }
 0x2a8   : > { %17750 = vmatpush3.bf16.msra.mxu0 %v19462_v12  ;;  %v19504_v12 = vld [vmem:[%s20437_s3 + $0x14a0] sm:$0xff]  }
 0x2a9   : > { %17751 = vmatprep.subr.bf16.mxu0 %v19464_v13  ;;  %17772 = vmatpush3.bf16.msra.mxu1 %v19463_v14  ;;  %v19505_v13 = vld [vmem:[%s20437_s3 + $0x1468] sm:$0xff]  }
 0x2aa   : > { %17773 = vmatprep.subr.bf16.mxu1 %v19465_v15  ;;  %v19506_v15 = vld [vmem:[%s20437_s3 + $0x14e8] sm:$0xff]  }
 0x2ac   : > { %17752 = vmatpush3.bf16.msra.mxu0 %v19466_v16 }
 0x2ad   : > { %17753 = vmatprep.subr.bf16.mxu0 %v19468_v17  ;;  %17774 = vmatpush3.bf16.msra.mxu1 %v19467_v18  ;;  %v19507_v17 = vld [vmem:[%s20437_s3 + $0x1428] sm:$0xff]  }
 0x2ae   : > { %17775 = vmatprep.subr.bf16.mxu1 %v19469_v19 }
 0x2b0   : > { %17754 = vmatpush3.bf16.msra.mxu0 %v19470_v20 }
 0x2b1   : > { %17755 = vmatprep.subr.bf16.mxu0 %v19472_v22  ;;  %17776 = vmatpush3.bf16.msra.mxu1 %v19471_v23  ;;  %v19508_v22 = vld [vmem:[%s20437_s3 + $0x14a8] sm:$0xff]  }
 0x2b2   : > { %v17453_v21 = vpop.f32.mrb[48].mxu0  ;;  %17777 = vmatprep.subr.bf16.mxu1 %v19473_v27 }
 0x2b3   : > { %v17454_v24 = vpop.f32.mrb[49].mxu0  ;;  %v17475_v25 = vpop.f32.mrb[48].mxu1 }
 0x2b4   : > { %v17455_v26 = vadd.f32 %v17454_v24, %v17453_v21  ;;  %v17456_v28 = vpop.f32.mrb[50].mxu0  ;;  %v17476_v30 = vpop.f32.mrb[49].mxu1  ;;  %17756 = vmatpush3.bf16.msra.mxu0 %v19474_v29  ;;  %v19509_v24 = vld [vmem:[%s20437_s3 + $0x1470] sm:$0xff]  }
 0x2b5   : > { %v17457_v32 = vpop.f32.mrb[51].mxu0  ;;  %v17477_v34 = vadd.f32 %v17476_v30, %v17475_v25  ;;  %v17478_v35 = vpop.f32.mrb[50].mxu1  ;;  %17757 = vmatprep.subr.bf16.mxu0 %v19476_v36  ;;  %17778 = vmatpush3.bf16.msra.mxu1 %v19475_v31  ;;  %v19510_v28 = vld [vmem:[%s20437_s3 + $0x14f0] sm:$0xff]   ;;  %v239_v36 = vld [vmem:[%s20447_s30 + $0xa0] sm:$0xff] }
 0x2b6   : > { %v13100_v33 = vadd.f32 %v17455_v26, %v21141_v49  ;;  %v17479_v37 = vpop.f32.mrb[51].mxu1  ;;  %17779 = vmatprep.subr.bf16.mxu1 %v19477_v38  ;;  %v626_v49 = vcombine.high %v238_v46, %v238_v46  ;;  %v19511_v30 = vld [vmem:[%s20437_s3 + $0x1430] sm:$0xff]   ;;  %v19513_v32 = vld [vmem:[%s20437_s3 + $0x1478] sm:$0xff]   ;;  %v643_v38 = vcombine.high %v239_v36, %v239_v36  ;;  %v19520_v46 = vld [vmem:[%s20437_s3 + $0x1500] sm:$0xff]  }
 0x2b7   : > { %v19515_v35 = vld [vmem:[%s20437_s3 + $0x1438] sm:$0xff]   ;;  %v650_v37 = vrot.slane %v239_v36, %v20485_v42  ;;  %v19553_v36 = vld [vmem:[%s20437_s3 + $0x1600] sm:$0xff]  }
 0x2b8   : > { %v21179_v39 = vadd.f32 %v17477_v34, %v13100_v33  ;;  %17758 = vmatpush3.bf16.msra.mxu0 %v19478_v40  ;;  %v640_v52 = vrot.slane %v626_v49, %v20485_v42  ;;  %v19512_v33 = vld [vmem:[%s20437_s3 + $0x14b0] sm:$0xff]   ;;  %v19514_v34 = vld [vmem:[%s20437_s3 + $0x14f8] sm:$0xff]   ;;  %v19521_v49 = vld [vmem:[%s20437_s3 + $0x1580] sm:$0xff]  }
 0x2b9   : > { %17759 = vmatprep.subr.bf16.mxu0 %v19480_v43  ;;  %17780 = vmatpush3.bf16.msra.mxu1 %v19479_v41  ;;  %v19516_v40 = vld [vmem:[%s20437_s3 + $0x14b8] sm:$0xff]   ;;  %v658_v41 = vcombine.high %v650_v37, %v650_v37  ;;  %v657_v43 = vrot.slane %v643_v38, %v20485_v42 }
 0x2ba   : > { %17781 = vmatprep.subr.bf16.mxu1 %v19481_v44  ;;  %v642_v57 = vcombine.high %v640_v52, %v640_v52  ;;  %v1263_v59 = vpack.c.bf16 %v640_v52, %v640_v52  ;;  %v19519_v44 = vld [vmem:[%s20437_s3 + $0x15c0] sm:$0xff]  }
 0x2bb   : > { %v659_v48 = vcombine.high %v657_v43, %v657_v43 }
 0x2bc   : > { %17760 = vmatpush3.bf16.msra.mxu0 %v19482_v45  ;;  %v1264_v61 = vpack.c.bf16 %v642_v57, %v642_v57  ;;  %v1265_v45 = vpack.c.bf16 %v650_v37, %v650_v37  ;;  %v19527_v57 = vld [vmem:[%s20437_s3 + $0x15d0] sm:$0xff]  }
 0x2bd   : > { %17789 = vmatprep.subr.bf16.mxu0 %v19485_v50  ;;  %17782 = vmatpush3.bf16.msra.mxu1 %v19483_v47  ;;  %v1266_v47 = vpack.c.bf16 %v658_v41, %v658_v41  ;;  %v1267_v50 = vpack.c.bf16 %v657_v43, %v657_v43  ;;  %v1268_v52 = vpack.c.bf16 %v659_v48, %v659_v48  ;;  %v19555_v41 = vld [vmem:[%s20437_s3 + $0x1648] sm:$0xff]   ;;  %v19560_v48 = vld [vmem:[%s20437_s3 + $0x16d0] sm:$0xff]  }
 0x2be   : > { %17811 = vmatprep.subr.bf16.mxu1 %v19486_v53  ;;  %13697 = vmatprep.mubr.bf16.mxu1 %v1264_v61  ;;  %v19523_v53 = vld [vmem:[%s20437_s3 + $0x15c8] sm:$0xff]   ;;  %v19531_v61 = vld [vmem:[%s20437_s3 + $0x15d8] sm:$0xff]  }
 0x2bf   : > { %13658 = vmatmul.mubr.bf16.vlgmr.msra.gmra.mrb[76].mxu0 %v1261_v54  ;;  %v19524_v54 = vld [vmem:[%s20437_s3 + $0x1508] sm:$0xff]  }
 0x2c0   : > { %17790 = vmatpush3.bf16.msra.mxu0 %v19487_v55  ;;  %13698 = vmatmul.mubr.bf16.vlgmr.msra.gmra.mrb[76].mxu1 %v1263_v59  ;;  %v19525_v55 = vld [vmem:[%s20437_s3 + $0x1588] sm:$0xff]   ;;  %v19529_v59 = vld [vmem:[%s20437_s3 + $0x1590] sm:$0xff]  }
 0x2c1   : > { %17791 = vmatprep.subr.bf16.mxu0 %v19489_v60  ;;  %17812 = vmatpush3.bf16.msra.mxu1 %v19488_v58  ;;  %v19528_v58 = vld [vmem:[%s20437_s3 + $0x1510] sm:$0xff]   ;;  %v19530_v60 = vld [vmem:[%s20437_s3 + $0x1558] sm:$0xff]  }
 0x2c2   : > { %17813 = vmatprep.subr.bf16.mxu1 %v19490_v62  ;;  %13737 = vmatprep.mubr.bf16.mxu0 %v1266_v47  ;;  %v19532_v62 = vld [vmem:[%s20437_s3 + $0x1518] sm:$0xff]   ;;  %v19559_v47 = vld [vmem:[%s20437_s3 + $0x1650] sm:$0xff]  }
 0x2c3   : > { %13777 = vmatprep.mubr.bf16.mxu1 %v1268_v52  ;;  %v19564_v52 = vld [vmem:[%s20437_s3 + $0x16d8] sm:$0xff]  }
 0x2c4   : > { %17792 = vmatpush3.bf16.msra.mxu0 %v19491_v63  ;;  %v19533_v63 = vld [vmem:[%s20437_s3 + $0x1598] sm:$0xff]  }
 0x2c5   : > { %17793 = vmatprep.subr.bf16.mxu0 %v19493_v1  ;;  %17814 = vmatpush3.bf16.msra.mxu1 %v19492_v0  ;;  %v19534_v0 = vld [vmem:[%s20437_s3 + $0x1560] sm:$0xff]  }
 0x2c6   : > { %17815 = vmatprep.subr.bf16.mxu1 %v19494_v2  ;;  %v19535_v1 = vld [vmem:[%s20437_s3 + $0x15e0] sm:$0xff]  }
 0x2c7   : > { %v19536_v2 = vld [vmem:[%s20437_s3 + $0x1520] sm:$0xff]  }
 0x2c8   : > { %17794 = vmatpush3.bf16.msra.mxu0 %v19495_v3  ;;  %v19537_v3 = vld [vmem:[%s20437_s3 + $0x15a0] sm:$0xff]  }
 0x2c9   : > { %17795 = vmatprep.subr.bf16.mxu0 %v19497_v5  ;;  %17816 = vmatpush3.bf16.msra.mxu1 %v19496_v4  ;;  %v19538_v4 = vld [vmem:[%s20437_s3 + $0x1568] sm:$0xff]  }
 0x2ca   : > { %17817 = vmatprep.subr.bf16.mxu1 %v19498_v6  ;;  %v19539_v6 = vld [vmem:[%s20437_s3 + $0x15e8] sm:$0xff]  }
 0x2cc   : > { %17796 = vmatpush3.bf16.msra.mxu0 %v19499_v7 }
 0x2cd   : > { %17797 = vmatprep.subr.bf16.mxu0 %v19501_v9  ;;  %17818 = vmatpush3.bf16.msra.mxu1 %v19500_v8  ;;  %v19540_v8 = vld [vmem:[%s20437_s3 + $0x1528] sm:$0xff]  }
 0x2ce   : > { %17819 = vmatprep.subr.bf16.mxu1 %v19502_v10 }
 0x2d0   : > { %17798 = vmatpush3.bf16.msra.mxu0 %v19503_v11 }
 0x2d1   : > { %17799 = vmatprep.subr.bf16.mxu0 %v19505_v13  ;;  %17820 = vmatpush3.bf16.msra.mxu1 %v19504_v12  ;;  %v19541_v12 = vld [vmem:[%s20437_s3 + $0x15a8] sm:$0xff]   ;;  %v19542_v13 = vld [vmem:[%s20437_s3 + $0x1570] sm:$0xff]  }
 0x2d2   : > { %v17497_v14 = vpop.f32.mrb[52].mxu0  ;;  %17821 = vmatprep.subr.bf16.mxu1 %v19506_v15 }
 0x2d3   : > { %v17498_v16 = vpop.f32.mrb[53].mxu0  ;;  %v17519_v18 = vpop.f32.mrb[52].mxu1 }
 0x2d4   : > { %v17499_v19 = vadd.f32 %v17498_v16, %v17497_v14  ;;  %v17500_v20 = vpop.f32.mrb[54].mxu0  ;;  %v17520_v21 = vpop.f32.mrb[53].mxu1  ;;  %17800 = vmatpush3.bf16.msra.mxu0 %v19507_v17 }
 0x2d5   : > { %v17501_v23 = vpop.f32.mrb[55].mxu0  ;;  %v17521_v26 = vadd.f32 %v17520_v21, %v17519_v18  ;;  %v17522_v27 = vpop.f32.mrb[54].mxu1  ;;  %17801 = vmatprep.subr.bf16.mxu0 %v19509_v24  ;;  %17822 = vmatpush3.bf16.msra.mxu1 %v19508_v22  ;;  %v19544_v21 = vld [vmem:[%s20437_s3 + $0x1530] sm:$0xff]   ;;  %v19546_v24 = vld [vmem:[%s20437_s3 + $0x1578] sm:$0xff]  }
 0x2d6   : > { %v13180_v25 = vadd.f32 %v17499_v19, %v21179_v39  ;;  %v17523_v29 = vpop.f32.mrb[55].mxu1  ;;  %17823 = vmatprep.subr.bf16.mxu1 %v19510_v28  ;;  %v19518_v39 = vld [vmem:[%s20437_s3 + $0x1540] sm:$0xff]   ;;  %v19543_v19 = vld [vmem:[%s20437_s3 + $0x15f0] sm:$0xff]   ;;  %v240_v27 = vld [vmem:[%s20447_s30 + $0xa8] sm:$0xff] }
 0x2d7   : > { %v19545_v23 = vld [vmem:[%s20437_s3 + $0x15b0] sm:$0xff]   ;;  %v667_v28 = vrot.slane %v240_v27, %v20485_v42  ;;  %v660_v29 = vcombine.high %v240_v27, %v240_v27  ;;  %v19586_v27 = vld [vmem:[%s20437_s3 + $0x1700] sm:$0xff]  }
 0x2d8   : > { %v21218_v31 = vadd.f32 %v17521_v26, %v13180_v25  ;;  %17802 = vmatpush3.bf16.msra.mxu0 %v19511_v30  ;;  %v19547_v25 = vld [vmem:[%s20437_s3 + $0x15f8] sm:$0xff]   ;;  %v19551_v30 = vld [vmem:[%s20437_s3 + $0x1640] sm:$0xff]  }
 0x2d9   : > { %17803 = vmatprep.subr.bf16.mxu0 %v19513_v32  ;;  %17824 = vmatpush3.bf16.msra.mxu1 %v19512_v33  ;;  %v19548_v26 = vld [vmem:[%s20437_s3 + $0x1538] sm:$0xff]   ;;  %v675_v32 = vcombine.high %v667_v28, %v667_v28  ;;  %v674_v33 = vrot.slane %v660_v29, %v20485_v42 }
 0x2da   : > { %17825 = vmatprep.subr.bf16.mxu1 %v19514_v34  ;;  %v19552_v34 = vld [vmem:[%s20437_s3 + $0x16c0] sm:$0xff]  }
 0x2db   : > { %v1270_v37 = vpack.c.bf16 %v675_v32, %v675_v32  ;;  %v676_v38 = vcombine.high %v674_v33, %v674_v33  ;;  %v19588_v32 = vld [vmem:[%s20437_s3 + $0x1748] sm:$0xff]  }
 0x2dc   : > { %17804 = vmatpush3.bf16.msra.mxu0 %v19515_v35  ;;  %v1269_v35 = vpack.c.bf16 %v667_v28, %v667_v28 }
 0x2dd   : > { %17833 = vmatprep.subr.bf16.mxu0 %v19518_v39  ;;  %17826 = vmatpush3.bf16.msra.mxu1 %v19516_v40  ;;  %v19554_v39 = vld [vmem:[%s20437_s3 + $0x1680] sm:$0xff]   ;;  %v1271_v40 = vpack.c.bf16 %v674_v33, %v674_v33  ;;  %v1272_v43 = vpack.c.bf16 %v676_v38, %v676_v38  ;;  %v19593_v38 = vld [vmem:[%s20437_s3 + $0x17d0] sm:$0xff]  }
 0x2de   : > { %17855 = vmatprep.subr.bf16.mxu1 %v19519_v44  ;;  %v19556_v44 = vld [vmem:[%s20437_s3 + $0x16c8] sm:$0xff]  }
 0x2df   : > { %13738 = vmatmul.mubr.bf16.vlgmr.msra.gmra.mrb[80].mxu0 %v1265_v45  ;;  %v19557_v45 = vld [vmem:[%s20437_s3 + $0x1608] sm:$0xff]  }
 0x2e0   : > { %17834 = vmatpush3.bf16.msra.mxu0 %v19520_v46  ;;  %13778 = vmatmul.mubr.bf16.vlgmr.msra.gmra.mrb[80].mxu1 %v1267_v50  ;;  %v19558_v46 = vld [vmem:[%s20437_s3 + $0x1688] sm:$0xff]   ;;  %v19562_v50 = vld [vmem:[%s20437_s3 + $0x1690] sm:$0xff]  }
 0x2e1   : > { %17835 = vmatprep.subr.bf16.mxu0 %v19522_v51  ;;  %17856 = vmatpush3.bf16.msra.mxu1 %v19521_v49  ;;  %v19561_v49 = vld [vmem:[%s20437_s3 + $0x1610] sm:$0xff]   ;;  %v19563_v51 = vld [vmem:[%s20437_s3 + $0x1658] sm:$0xff]  }
 0x2e2   : > { %17857 = vmatprep.subr.bf16.mxu1 %v19523_v53  ;;  %13817 = vmatprep.mubr.bf16.mxu0 %v1270_v37  ;;  %v19565_v53 = vld [vmem:[%s20437_s3 + $0x1618] sm:$0xff]   ;;  %v19592_v37 = vld [vmem:[%s20437_s3 + $0x1750] sm:$0xff]  }
 0x2e3   : > { %13857 = vmatprep.mubr.bf16.mxu1 %v1272_v43  ;;  %v19597_v43 = vld [vmem:[%s20437_s3 + $0x17d8] sm:$0xff]  }
 0x2e4   : > { %17836 = vmatpush3.bf16.msra.mxu0 %v19524_v54  ;;  %v19566_v54 = vld [vmem:[%s20437_s3 + $0x1698] sm:$0xff]  }
 0x2e5   : > { %17837 = vmatprep.subr.bf16.mxu0 %v19526_v56  ;;  %17858 = vmatpush3.bf16.msra.mxu1 %v19525_v55  ;;  %v19567_v55 = vld [vmem:[%s20437_s3 + $0x1660] sm:$0xff]  }
 0x2e6   : > { %17859 = vmatprep.subr.bf16.mxu1 %v19527_v57  ;;  %v19568_v56 = vld [vmem:[%s20437_s3 + $0x16e0] sm:$0xff]  }
 0x2e7   : > { %v19569_v57 = vld [vmem:[%s20437_s3 + $0x1620] sm:$0xff]  }
 0x2e8   : > { %17838 = vmatpush3.bf16.msra.mxu0 %v19528_v58  ;;  %v19570_v58 = vld [vmem:[%s20437_s3 + $0x16a0] sm:$0xff]  }
 0x2e9   : > { %17839 = vmatprep.subr.bf16.mxu0 %v19530_v60  ;;  %17860 = vmatpush3.bf16.msra.mxu1 %v19529_v59  ;;  %v19571_v59 = vld [vmem:[%s20437_s3 + $0x1668] sm:$0xff]  }
 0x2ea   : > { %17861 = vmatprep.subr.bf16.mxu1 %v19531_v61  ;;  %v19572_v61 = vld [vmem:[%s20437_s3 + $0x16e8] sm:$0xff]  }
 0x2ec   : > { %17840 = vmatpush3.bf16.msra.mxu0 %v19532_v62 }
 0x2ed   : > { %17841 = vmatprep.subr.bf16.mxu0 %v19534_v0  ;;  %17862 = vmatpush3.bf16.msra.mxu1 %v19533_v63  ;;  %v19573_v63 = vld [vmem:[%s20437_s3 + $0x1628] sm:$0xff]  }
 0x2ee   : > { %17863 = vmatprep.subr.bf16.mxu1 %v19535_v1 }
 0x2f0   : > { %17842 = vmatpush3.bf16.msra.mxu0 %v19536_v2 }
 0x2f1   : > { %17843 = vmatprep.subr.bf16.mxu0 %v19538_v4  ;;  %17864 = vmatpush3.bf16.msra.mxu1 %v19537_v3  ;;  %v19574_v3 = vld [vmem:[%s20437_s3 + $0x16a8] sm:$0xff]   ;;  %v19575_v4 = vld [vmem:[%s20437_s3 + $0x1670] sm:$0xff]  }
 0x2f2   : > { %v17541_v5 = vpop.f32.mrb[56].mxu0  ;;  %17865 = vmatprep.subr.bf16.mxu1 %v19539_v6 }
 0x2f3   : > { %v17542_v7 = vpop.f32.mrb[57].mxu0  ;;  %v17563_v9 = vpop.f32.mrb[56].mxu1 }
 0x2f4   : > { %v17543_v10 = vadd.f32 %v17542_v7, %v17541_v5  ;;  %v17544_v11 = vpop.f32.mrb[58].mxu0  ;;  %v17564_v14 = vpop.f32.mrb[57].mxu1  ;;  %17844 = vmatpush3.bf16.msra.mxu0 %v19540_v8 }
 0x2f5   : > { %v17545_v15 = vpop.f32.mrb[59].mxu0  ;;  %v17565_v17 = vadd.f32 %v17564_v14, %v17563_v9  ;;  %v17566_v18 = vpop.f32.mrb[58].mxu1  ;;  %17845 = vmatprep.subr.bf16.mxu0 %v19542_v13  ;;  %17866 = vmatpush3.bf16.msra.mxu1 %v19541_v12  ;;  %v19577_v12 = vld [vmem:[%s20437_s3 + $0x1630] sm:$0xff]  }
 0x2f6   : > { %v13260_v16 = vadd.f32 %v17543_v10, %v21218_v31  ;;  %v17567_v20 = vpop.f32.mrb[59].mxu1  ;;  %17867 = vmatprep.subr.bf16.mxu1 %v19543_v19  ;;  %v19549_v31 = vld [vmem:[%s20437_s3 + $0x15b8] sm:$0xff]   ;;  %v19576_v10 = vld [vmem:[%s20437_s3 + $0x16f0] sm:$0xff]  }
 0x2f7   : > { %v19578_v14 = vld [vmem:[%s20437_s3 + $0x16b0] sm:$0xff]   ;;  %v19579_v15 = vld [vmem:[%s20437_s3 + $0x1678] sm:$0xff]  }
 0x2f8   : > { %v21256_v22 = vadd.f32 %v17565_v17, %v13260_v16  ;;  %17846 = vmatpush3.bf16.msra.mxu0 %v19544_v21  ;;  %v19580_v16 = vld [vmem:[%s20437_s3 + $0x16f8] sm:$0xff]   ;;  %v241_v18 = vld [vmem:[%s20447_s30 + $0xb0] sm:$0xff] }
 0x2f9   : > { %17847 = vmatprep.subr.bf16.mxu0 %v19546_v24  ;;  %17868 = vmatpush3.bf16.msra.mxu1 %v19545_v23  ;;  %v19581_v17 = vld [vmem:[%s20437_s3 + $0x1638] sm:$0xff]   ;;  %v684_v20 = vrot.slane %v241_v18, %v20485_v42  ;;  %v677_v21 = vcombine.high %v241_v18, %v241_v18  ;;  %v19619_v18 = vld [vmem:[%s20437_s3 + $0x1800] sm:$0xff]  }
 0x2fa   : > { %17869 = vmatprep.subr.bf16.mxu1 %v19547_v25  ;;  %v19582_v19 = vld [vmem:[%s20437_s3 + $0x16b8] sm:$0xff]   ;;  %v19585_v25 = vld [vmem:[%s20437_s3 + $0x17c0] sm:$0xff]  }
 0x2fb   : > { %v692_v23 = vcombine.high %v684_v20, %v684_v20  ;;  %v691_v24 = vrot.slane %v677_v21, %v20485_v42  ;;  %v19620_v21 = vld [vmem:[%s20437_s3 + $0x1880] sm:$0xff]  }
 0x2fc   : > { %17848 = vmatpush3.bf16.msra.mxu0 %v19548_v26  ;;  %v1273_v26 = vpack.c.bf16 %v684_v20, %v684_v20 }
 0x2fd   : > { %17877 = vmatprep.subr.bf16.mxu0 %v19551_v30  ;;  %17870 = vmatpush3.bf16.msra.mxu1 %v19549_v31  ;;  %v1274_v28 = vpack.c.bf16 %v692_v23, %v692_v23  ;;  %v693_v29 = vcombine.high %v691_v24, %v691_v24  ;;  %v19587_v30 = vld [vmem:[%s20437_s3 + $0x1780] sm:$0xff]   ;;  %v1275_v31 = vpack.c.bf16 %v691_v24, %v691_v24  ;;  %v19621_v23 = vld [vmem:[%s20437_s3 + $0x1848] sm:$0xff]  }
 0x2fe   : > { %17899 = vmatprep.subr.bf16.mxu1 %v19552_v34  ;;  %v19589_v34 = vld [vmem:[%s20437_s3 + $0x17c8] sm:$0xff]  }
 0x2ff   : > { %13818 = vmatmul.mubr.bf16.vlgmr.msra.gmra.mrb[84].mxu0 %v1269_v35  ;;  %v1276_v33 = vpack.c.bf16 %v693_v29, %v693_v29  ;;  %v19590_v35 = vld [vmem:[%s20437_s3 + $0x1708] sm:$0xff]   ;;  %v19626_v29 = vld [vmem:[%s20437_s3 + $0x18d0] sm:$0xff]  }
 0x300   : > { %17878 = vmatpush3.bf16.msra.mxu0 %v19553_v36  ;;  %13858 = vmatmul.mubr.bf16.vlgmr.msra.gmra.mrb[84].mxu1 %v1271_v40  ;;  %v19591_v36 = vld [vmem:[%s20437_s3 + $0x1788] sm:$0xff]   ;;  %v19595_v40 = vld [vmem:[%s20437_s3 + $0x1790] sm:$0xff]  }
 0x301   : > { %17879 = vmatprep.subr.bf16.mxu0 %v19555_v41  ;;  %17900 = vmatpush3.bf16.msra.mxu1 %v19554_v39  ;;  %v19594_v39 = vld [vmem:[%s20437_s3 + $0x1710] sm:$0xff]   ;;  %v19596_v41 = vld [vmem:[%s20437_s3 + $0x1758] sm:$0xff]  }
 0x302   : > { %17901 = vmatprep.subr.bf16.mxu1 %v19556_v44  ;;  %13897 = vmatprep.mubr.bf16.mxu0 %v1274_v28  ;;  %v19598_v44 = vld [vmem:[%s20437_s3 + $0x1718] sm:$0xff]   ;;  %v19625_v28 = vld [vmem:[%s20437_s3 + $0x1850] sm:$0xff]  }
 0x303   : > { %13937 = vmatprep.mubr.bf16.mxu1 %v1276_v33  ;;  %v19630_v33 = vld [vmem:[%s20437_s3 + $0x18d8] sm:$0xff]  }
 0x304   : > { %17880 = vmatpush3.bf16.msra.mxu0 %v19557_v45  ;;  %v19599_v45 = vld [vmem:[%s20437_s3 + $0x1798] sm:$0xff]  }
 0x305   : > { %17881 = vmatprep.subr.bf16.mxu0 %v19559_v47  ;;  %17902 = vmatpush3.bf16.msra.mxu1 %v19558_v46  ;;  %v19600_v46 = vld [vmem:[%s20437_s3 + $0x1760] sm:$0xff]  }
 0x306   : > { %17903 = vmatprep.subr.bf16.mxu1 %v19560_v48  ;;  %v19601_v47 = vld [vmem:[%s20437_s3 + $0x17e0] sm:$0xff]  }
 0x307   : > { %v19602_v48 = vld [vmem:[%s20437_s3 + $0x1720] sm:$0xff]  }
 0x308   : > { %17882 = vmatpush3.bf16.msra.mxu0 %v19561_v49  ;;  %v19603_v49 = vld [vmem:[%s20437_s3 + $0x17a0] sm:$0xff]  }
 0x309   : > { %17883 = vmatprep.subr.bf16.mxu0 %v19563_v51  ;;  %17904 = vmatpush3.bf16.msra.mxu1 %v19562_v50  ;;  %v19604_v50 = vld [vmem:[%s20437_s3 + $0x1768] sm:$0xff]  }
 0x30a   : > { %17905 = vmatprep.subr.bf16.mxu1 %v19564_v52  ;;  %v19605_v52 = vld [vmem:[%s20437_s3 + $0x17e8] sm:$0xff]  }
 0x30c   : > { %17884 = vmatpush3.bf16.msra.mxu0 %v19565_v53 }
 0x30d   : > { %17885 = vmatprep.subr.bf16.mxu0 %v19567_v55  ;;  %17906 = vmatpush3.bf16.msra.mxu1 %v19566_v54  ;;  %v19606_v54 = vld [vmem:[%s20437_s3 + $0x1728] sm:$0xff]  }
 0x30e   : > { %17907 = vmatprep.subr.bf16.mxu1 %v19568_v56 }
 0x310   : > { %17886 = vmatpush3.bf16.msra.mxu0 %v19569_v57 }
 0x311   : > { %17887 = vmatprep.subr.bf16.mxu0 %v19571_v59  ;;  %17908 = vmatpush3.bf16.msra.mxu1 %v19570_v58  ;;  %v19607_v59 = vld [vmem:[%s20437_s3 + $0x17a8] sm:$0xff]  }
 0x312   : > { %v17585_v60 = vpop.f32.mrb[60].mxu0  ;;  %17909 = vmatprep.subr.bf16.mxu1 %v19572_v61  ;;  %v19608_v61 = vld [vmem:[%s20437_s3 + $0x1770] sm:$0xff]  }
 0x313   : > { %v17586_v62 = vpop.f32.mrb[61].mxu0  ;;  %v17607_v0 = vpop.f32.mrb[60].mxu1 }
 0x314   : > { %v17587_v1 = vadd.f32 %v17586_v62, %v17585_v60  ;;  %v17588_v2 = vpop.f32.mrb[62].mxu0  ;;  %v17608_v5 = vpop.f32.mrb[61].mxu1  ;;  %17888 = vmatpush3.bf16.msra.mxu0 %v19573_v63 }
 0x315   : > { %v17589_v6 = vpop.f32.mrb[63].mxu0  ;;  %v17609_v8 = vadd.f32 %v17608_v5, %v17607_v0  ;;  %v17610_v9 = vpop.f32.mrb[62].mxu1  ;;  %17889 = vmatprep.subr.bf16.mxu0 %v19575_v4  ;;  %17910 = vmatpush3.bf16.msra.mxu1 %v19574_v3  ;;  %v19610_v3 = vld [vmem:[%s20437_s3 + $0x1730] sm:$0xff]   ;;  %v19612_v5 = vld [vmem:[%s20437_s3 + $0x1778] sm:$0xff]  }
 0x316   : > { %v13340_v7 = vadd.f32 %v17587_v1, %v21256_v22  ;;  %v17611_v11 = vpop.f32.mrb[63].mxu1  ;;  %17911 = vmatprep.subr.bf16.mxu1 %v19576_v10  ;;  %v19584_v22 = vld [vmem:[%s20437_s3 + $0x1740] sm:$0xff]   ;;  %v19609_v1 = vld [vmem:[%s20437_s3 + $0x17f0] sm:$0xff]   ;;  %v242_v9 = vld [vmem:[%s20447_s30 + $0xb8] sm:$0xff] }
 0x317   : > { %v19611_v6 = vld [vmem:[%s20437_s3 + $0x17b0] sm:$0xff]   ;;  %v701_v10 = vrot.slane %v242_v9, %v20485_v42  ;;  %v694_v11 = vcombine.high %v242_v9, %v242_v9  ;;  %v19652_v9 = vld [vmem:[%s20437_s3 + $0x1900] sm:$0xff]  }
 0x318   : > { %v21294_v13 = vadd.f32 %v17609_v8, %v13340_v7  ;;  %17890 = vmatpush3.bf16.msra.mxu0 %v19577_v12  ;;  %v19613_v7 = vld [vmem:[%s20437_s3 + $0x17f8] sm:$0xff]   ;;  %v19617_v12 = vld [vmem:[%s20437_s3 + $0x1840] sm:$0xff]  }
 0x319   : > { %17891 = vmatprep.subr.bf16.mxu0 %v19579_v15  ;;  %17912 = vmatpush3.bf16.msra.mxu1 %v19578_v14  ;;  %v19614_v8 = vld [vmem:[%s20437_s3 + $0x1738] sm:$0xff]   ;;  %v709_v14 = vcombine.high %v701_v10, %v701_v10  ;;  %v708_v15 = vrot.slane %v694_v11, %v20485_v42 }
 0x31a   : > { %17913 = vmatprep.subr.bf16.mxu1 %v19580_v16  ;;  %v19618_v16 = vld [vmem:[%s20437_s3 + $0x18c0] sm:$0xff]  }
 0x31b   : > { %v710_v20 = vcombine.high %v708_v15, %v708_v15 }
 0x31c   : > { %17892 = vmatpush3.bf16.msra.mxu0 %v19581_v17  ;;  %v1277_v17 = vpack.c.bf16 %v701_v10, %v701_v10 }
 0x31d   : > { %17921 = vmatprep.subr.bf16.mxu0 %v19584_v22  ;;  %17914 = vmatpush3.bf16.msra.mxu1 %v19582_v19  ;;  %v1278_v19 = vpack.c.bf16 %v709_v14, %v709_v14  ;;  %v1279_v22 = vpack.c.bf16 %v708_v15, %v708_v15  ;;  %v1280_v24 = vpack.c.bf16 %v710_v20, %v710_v20  ;;  %v19654_v14 = vld [vmem:[%s20437_s3 + $0x1948] sm:$0xff]   ;;  %v19659_v20 = vld [vmem:[%s20437_s3 + $0x19d0] sm:$0xff]  }
 0x31e   : > { %17943 = vmatprep.subr.bf16.mxu1 %v19585_v25  ;;  %v19622_v25 = vld [vmem:[%s20437_s3 + $0x18c8] sm:$0xff]  }
 0x31f   : > { %13898 = vmatmul.mubr.bf16.vlgmr.msra.gmra.mrb[88].mxu0 %v1273_v26  ;;  %v19623_v26 = vld [vmem:[%s20437_s3 + $0x1808] sm:$0xff]  }
 0x320   : > { %17922 = vmatpush3.bf16.msra.mxu0 %v19586_v27  ;;  %13938 = vmatmul.mubr.bf16.vlgmr.msra.gmra.mrb[88].mxu1 %v1275_v31  ;;  %v19624_v27 = vld [vmem:[%s20437_s3 + $0x1888] sm:$0xff]   ;;  %v19628_v31 = vld [vmem:[%s20437_s3 + $0x1890] sm:$0xff]  }
 0x321   : > { %17923 = vmatprep.subr.bf16.mxu0 %v19588_v32  ;;  %17944 = vmatpush3.bf16.msra.mxu1 %v19587_v30  ;;  %v19627_v30 = vld [vmem:[%s20437_s3 + $0x1810] sm:$0xff]   ;;  %v19629_v32 = vld [vmem:[%s20437_s3 + $0x1858] sm:$0xff]  }
 0x322   : > { %17945 = vmatprep.subr.bf16.mxu1 %v19589_v34  ;;  %13977 = vmatprep.mubr.bf16.mxu0 %v1278_v19  ;;  %v19631_v34 = vld [vmem:[%s20437_s3 + $0x1818] sm:$0xff]   ;;  %v19658_v19 = vld [vmem:[%s20437_s3 + $0x1950] sm:$0xff]  }
 0x323   : > { %14017 = vmatprep.mubr.bf16.mxu1 %v1280_v24  ;;  %v19663_v24 = vld [vmem:[%s20437_s3 + $0x19d8] sm:$0xff]  }
 0x324   : > { %17924 = vmatpush3.bf16.msra.mxu0 %v19590_v35  ;;  %v19632_v35 = vld [vmem:[%s20437_s3 + $0x1898] sm:$0xff]  }
 0x325   : > { %17925 = vmatprep.subr.bf16.mxu0 %v19592_v37  ;;  %17946 = vmatpush3.bf16.msra.mxu1 %v19591_v36  ;;  %v19633_v36 = vld [vmem:[%s20437_s3 + $0x1860] sm:$0xff]  }
 0x326   : > { %17947 = vmatprep.subr.bf16.mxu1 %v19593_v38  ;;  %v19634_v37 = vld [vmem:[%s20437_s3 + $0x18e0] sm:$0xff]  }
 0x327   : > { %v19635_v38 = vld [vmem:[%s20437_s3 + $0x1820] sm:$0xff]  }
 0x328   : > { %17926 = vmatpush3.bf16.msra.mxu0 %v19594_v39  ;;  %v19636_v39 = vld [vmem:[%s20437_s3 + $0x18a0] sm:$0xff]  }
 0x329   : > { %17927 = vmatprep.subr.bf16.mxu0 %v19596_v41  ;;  %17948 = vmatpush3.bf16.msra.mxu1 %v19595_v40  ;;  %v19637_v40 = vld [vmem:[%s20437_s3 + $0x1868] sm:$0xff]  }
 0x32a   : > { %17949 = vmatprep.subr.bf16.mxu1 %v19597_v43  ;;  %v19638_v43 = vld [vmem:[%s20437_s3 + $0x18e8] sm:$0xff]  }
 0x32c   : > { %17928 = vmatpush3.bf16.msra.mxu0 %v19598_v44 }
 0x32d   : > { %17929 = vmatprep.subr.bf16.mxu0 %v19600_v46  ;;  %17950 = vmatpush3.bf16.msra.mxu1 %v19599_v45  ;;  %v19639_v45 = vld [vmem:[%s20437_s3 + $0x1828] sm:$0xff]  }
 0x32e   : > { %17951 = vmatprep.subr.bf16.mxu1 %v19601_v47 }
 0x330   : > { %17930 = vmatpush3.bf16.msra.mxu0 %v19602_v48 }
 0x331   : > { %17931 = vmatprep.subr.bf16.mxu0 %v19604_v50  ;;  %17952 = vmatpush3.bf16.msra.mxu1 %v19603_v49  ;;  %v19640_v49 = vld [vmem:[%s20437_s3 + $0x18a8] sm:$0xff]   ;;  %v19641_v50 = vld [vmem:[%s20437_s3 + $0x1870] sm:$0xff]  }
 0x332   : > { %v17629_v51 = vpop.f32.mrb[64].mxu0  ;;  %17953 = vmatprep.subr.bf16.mxu1 %v19605_v52 }
 0x333   : > { %v17630_v53 = vpop.f32.mrb[65].mxu0  ;;  %v17651_v55 = vpop.f32.mrb[64].mxu1 }
 0x334   : > { %v17631_v56 = vadd.f32 %v17630_v53, %v17629_v51  ;;  %v17632_v57 = vpop.f32.mrb[66].mxu0  ;;  %v17652_v58 = vpop.f32.mrb[65].mxu1  ;;  %17932 = vmatpush3.bf16.msra.mxu0 %v19606_v54 }
 0x335   : > { %v17633_v60 = vpop.f32.mrb[67].mxu0  ;;  %v17653_v63 = vadd.f32 %v17652_v58, %v17651_v55  ;;  %v17654_v0 = vpop.f32.mrb[66].mxu1  ;;  %17933 = vmatprep.subr.bf16.mxu0 %v19608_v61  ;;  %17954 = vmatpush3.bf16.msra.mxu1 %v19607_v59  ;;  %v19643_v58 = vld [vmem:[%s20437_s3 + $0x1830] sm:$0xff]   ;;  %v19645_v61 = vld [vmem:[%s20437_s3 + $0x1878] sm:$0xff]  }
 0x336   : > { %v13420_v62 = vadd.f32 %v17631_v56, %v21294_v13  ;;  %v17655_v2 = vpop.f32.mrb[67].mxu1  ;;  %17955 = vmatprep.subr.bf16.mxu1 %v19609_v1  ;;  %v19615_v13 = vld [vmem:[%s20437_s3 + $0x17b8] sm:$0xff]   ;;  %v19642_v56 = vld [vmem:[%s20437_s3 + $0x18f0] sm:$0xff]   ;;  %v243_v0 = vld [vmem:[%s20447_s30 + $0xc0] sm:$0xff] }
 0x337   : > { %v19644_v60 = vld [vmem:[%s20437_s3 + $0x18b0] sm:$0xff]   ;;  %v718_v1 = vrot.slane %v243_v0, %v20485_v42  ;;  %v711_v2 = vcombine.high %v243_v0, %v243_v0  ;;  %v19685_v0 = vld [vmem:[%s20437_s3 + $0x1a00] sm:$0xff]  }
 0x338   : > { %v21332_v4 = vadd.f32 %v17653_v63, %v13420_v62  ;;  %17934 = vmatpush3.bf16.msra.mxu0 %v19610_v3  ;;  %v19646_v62 = vld [vmem:[%s20437_s3 + $0x18f8] sm:$0xff]   ;;  %v19650_v3 = vld [vmem:[%s20437_s3 + $0x1940] sm:$0xff]  }
 0x339   : > { %17935 = vmatprep.subr.bf16.mxu0 %v19612_v5  ;;  %17956 = vmatpush3.bf16.msra.mxu1 %v19611_v6  ;;  %v19647_v63 = vld [vmem:[%s20437_s3 + $0x1838] sm:$0xff]   ;;  %v726_v5 = vcombine.high %v718_v1, %v718_v1  ;;  %v725_v6 = vrot.slane %v711_v2, %v20485_v42 }
 0x33a   : > { %17957 = vmatprep.subr.bf16.mxu1 %v19613_v7  ;;  %v19651_v7 = vld [vmem:[%s20437_s3 + $0x19c0] sm:$0xff]  }
 0x33b   : > { %v1282_v10 = vpack.c.bf16 %v726_v5, %v726_v5  ;;  %v727_v11 = vcombine.high %v725_v6, %v725_v6  ;;  %v19687_v5 = vld [vmem:[%s20437_s3 + $0x1a48] sm:$0xff]  }
 0x33c   : > { %17936 = vmatpush3.bf16.msra.mxu0 %v19614_v8  ;;  %v1281_v8 = vpack.c.bf16 %v718_v1, %v718_v1 }
 0x33d   : > { %17965 = vmatprep.subr.bf16.mxu0 %v19617_v12  ;;  %17958 = vmatpush3.bf16.msra.mxu1 %v19615_v13  ;;  %v19653_v12 = vld [vmem:[%s20437_s3 + $0x1980] sm:$0xff]   ;;  %v1283_v13 = vpack.c.bf16 %v725_v6, %v725_v6  ;;  %v1284_v15 = vpack.c.bf16 %v727_v11, %v727_v11  ;;  %v19692_v11 = vld [vmem:[%s20437_s3 + $0x1ad0] sm:$0xff]  }
 0x33e   : > { %17987 = vmatprep.subr.bf16.mxu1 %v19618_v16  ;;  %v19655_v16 = vld [vmem:[%s20437_s3 + $0x19c8] sm:$0xff]  }
 0x33f   : > { %13978 = vmatmul.mubr.bf16.vlgmr.msra.gmra.mrb[92].mxu0 %v1277_v17  ;;  %v19656_v17 = vld [vmem:[%s20437_s3 + $0x1908] sm:$0xff]  }
 0x340   : > { %17966 = vmatpush3.bf16.msra.mxu0 %v19619_v18  ;;  %14018 = vmatmul.mubr.bf16.vlgmr.msra.gmra.mrb[92].mxu1 %v1279_v22  ;;  %v19657_v18 = vld [vmem:[%s20437_s3 + $0x1988] sm:$0xff]   ;;  %v19661_v22 = vld [vmem:[%s20437_s3 + $0x1990] sm:$0xff]  }
 0x341   : > { %17967 = vmatprep.subr.bf16.mxu0 %v19621_v23  ;;  %17988 = vmatpush3.bf16.msra.mxu1 %v19620_v21  ;;  %v19660_v21 = vld [vmem:[%s20437_s3 + $0x1910] sm:$0xff]   ;;  %v19662_v23 = vld [vmem:[%s20437_s3 + $0x1958] sm:$0xff]  }
 0x342   : > { %17989 = vmatprep.subr.bf16.mxu1 %v19622_v25  ;;  %14057 = vmatprep.mubr.bf16.mxu0 %v1282_v10  ;;  %v19664_v25 = vld [vmem:[%s20437_s3 + $0x1918] sm:$0xff]   ;;  %v19691_v10 = vld [vmem:[%s20437_s3 + $0x1a50] sm:$0xff]  }
 0x343   : > { %14097 = vmatprep.mubr.bf16.mxu1 %v1284_v15  ;;  %v19696_v15 = vld [vmem:[%s20437_s3 + $0x1ad8] sm:$0xff]  }
 0x344   : > { %17968 = vmatpush3.bf16.msra.mxu0 %v19623_v26  ;;  %v19665_v26 = vld [vmem:[%s20437_s3 + $0x1998] sm:$0xff]  }
 0x345   : > { %17969 = vmatprep.subr.bf16.mxu0 %v19625_v28  ;;  %17990 = vmatpush3.bf16.msra.mxu1 %v19624_v27  ;;  %v19666_v27 = vld [vmem:[%s20437_s3 + $0x1960] sm:$0xff]  }
 0x346   : > { %17991 = vmatprep.subr.bf16.mxu1 %v19626_v29  ;;  %v19667_v28 = vld [vmem:[%s20437_s3 + $0x19e0] sm:$0xff]  }
 0x347   : > { %v19668_v29 = vld [vmem:[%s20437_s3 + $0x1920] sm:$0xff]  }
 0x348   : > { %17970 = vmatpush3.bf16.msra.mxu0 %v19627_v30  ;;  %v19669_v30 = vld [vmem:[%s20437_s3 + $0x19a0] sm:$0xff]  }
 0x349   : > { %17971 = vmatprep.subr.bf16.mxu0 %v19629_v32  ;;  %17992 = vmatpush3.bf16.msra.mxu1 %v19628_v31  ;;  %v19670_v31 = vld [vmem:[%s20437_s3 + $0x1968] sm:$0xff]  }
 0x34a   : > { %17993 = vmatprep.subr.bf16.mxu1 %v19630_v33  ;;  %v19671_v33 = vld [vmem:[%s20437_s3 + $0x19e8] sm:$0xff]  }
 0x34c   : > { %17972 = vmatpush3.bf16.msra.mxu0 %v19631_v34 }
 0x34d   : > { %17973 = vmatprep.subr.bf16.mxu0 %v19633_v36  ;;  %17994 = vmatpush3.bf16.msra.mxu1 %v19632_v35  ;;  %v19672_v35 = vld [vmem:[%s20437_s3 + $0x1928] sm:$0xff]  }
 0x34e   : > { %17995 = vmatprep.subr.bf16.mxu1 %v19634_v37 }
 0x350   : > { %17974 = vmatpush3.bf16.msra.mxu0 %v19635_v38 }
 0x351   : > { %17975 = vmatprep.subr.bf16.mxu0 %v19637_v40  ;;  %17996 = vmatpush3.bf16.msra.mxu1 %v19636_v39  ;;  %v19673_v39 = vld [vmem:[%s20437_s3 + $0x19a8] sm:$0xff]   ;;  %v19674_v40 = vld [vmem:[%s20437_s3 + $0x1970] sm:$0xff]  }
 0x352   : > { %v17673_v41 = vpop.f32.mrb[68].mxu0  ;;  %17997 = vmatprep.subr.bf16.mxu1 %v19638_v43 }
 0x353   : > { %v17674_v44 = vpop.f32.mrb[69].mxu0  ;;  %v17695_v46 = vpop.f32.mrb[68].mxu1 }
 0x354   : > { %v17675_v47 = vadd.f32 %v17674_v44, %v17673_v41  ;;  %v17676_v48 = vpop.f32.mrb[70].mxu0  ;;  %v17696_v51 = vpop.f32.mrb[69].mxu1  ;;  %17976 = vmatpush3.bf16.msra.mxu0 %v19639_v45 }
 0x355   : > { %v17677_v52 = vpop.f32.mrb[71].mxu0  ;;  %v17697_v54 = vadd.f32 %v17696_v51, %v17695_v46  ;;  %v17698_v55 = vpop.f32.mrb[70].mxu1  ;;  %17977 = vmatprep.subr.bf16.mxu0 %v19641_v50  ;;  %17998 = vmatpush3.bf16.msra.mxu1 %v19640_v49  ;;  %v19676_v49 = vld [vmem:[%s20437_s3 + $0x1930] sm:$0xff]  }
 0x356   : > { %v13500_v53 = vadd.f32 %v17675_v47, %v21332_v4  ;;  %v17699_v57 = vpop.f32.mrb[71].mxu1  ;;  %17999 = vmatprep.subr.bf16.mxu1 %v19642_v56  ;;  %v19648_v4 = vld [vmem:[%s20437_s3 + $0x18b8] sm:$0xff]   ;;  %v19675_v47 = vld [vmem:[%s20437_s3 + $0x19f0] sm:$0xff]   ;;  %v244_v55 = vld [vmem:[%s20447_s30 + $0xc8] sm:$0xff] }
 0x357   : > { %v19677_v51 = vld [vmem:[%s20437_s3 + $0x19b0] sm:$0xff]   ;;  %v19678_v52 = vld [vmem:[%s20437_s3 + $0x1978] sm:$0xff]   ;;  %v735_v57 = vrot.slane %v244_v55, %v20485_v42 }
 0x358   : > { %v21370_v59 = vadd.f32 %v17697_v54, %v13500_v53  ;;  %17978 = vmatpush3.bf16.msra.mxu0 %v19643_v58  ;;  %v19679_v53 = vld [vmem:[%s20437_s3 + $0x19f8] sm:$0xff]   ;;  %v728_v58 = vcombine.high %v244_v55, %v244_v55  ;;  %v19718_v55 = vld [vmem:[%s20437_s3 + $0x1b00] sm:$0xff]  }
 0x359   : > { %17979 = vmatprep.subr.bf16.mxu0 %v19645_v61  ;;  %18000 = vmatpush3.bf16.msra.mxu1 %v19644_v60  ;;  %v19680_v54 = vld [vmem:[%s20437_s3 + $0x1938] sm:$0xff]   ;;  %v743_v60 = vcombine.high %v735_v57, %v735_v57 }
 0x35a   : > { %18001 = vmatprep.subr.bf16.mxu1 %v19646_v62  ;;  %v19681_v56 = vld [vmem:[%s20437_s3 + $0x19b8] sm:$0xff]   ;;  %v742_v61 = vrot.slane %v728_v58, %v20485_v42  ;;  %v19684_v62 = vld [vmem:[%s20437_s3 + $0x1ac0] sm:$0xff]  }
 0x35b   : > { %v1286_v1 = vpack.c.bf16 %v743_v60, %v743_v60  ;;  %v19719_v58 = vld [vmem:[%s20437_s3 + $0x1b80] sm:$0xff]   ;;  %v19720_v60 = vld [vmem:[%s20437_s3 + $0x1b48] sm:$0xff]  }
 0x35c   : > { %17980 = vmatpush3.bf16.msra.mxu0 %v19647_v63  ;;  %v1285_v63 = vpack.c.bf16 %v735_v57, %v735_v57  ;;  %v744_v2 = vcombine.high %v742_v61, %v742_v61 }
 0x35d   : > { %18009 = vmatprep.subr.bf16.mxu0 %v19650_v3  ;;  %18002 = vmatpush3.bf16.msra.mxu1 %v19648_v4  ;;  %v19686_v3 = vld [vmem:[%s20437_s3 + $0x1a80] sm:$0xff]   ;;  %v1287_v4 = vpack.c.bf16 %v742_v61, %v742_v61 }
 0x35e   : > { %18031 = vmatprep.subr.bf16.mxu1 %v19651_v7  ;;  %v1288_v6 = vpack.c.bf16 %v744_v2, %v744_v2  ;;  %v19688_v7 = vld [vmem:[%s20437_s3 + $0x1ac8] sm:$0xff]   ;;  %v19725_v2 = vld [vmem:[%s20437_s3 + $0x1bd0] sm:$0xff]  }
 0x35f   : > { %14058 = vmatmul.mubr.bf16.vlgmr.msra.gmra.mrb[96].mxu0 %v1281_v8  ;;  %v19689_v8 = vld [vmem:[%s20437_s3 + $0x1a08] sm:$0xff]  }
 0x360   : > { %18010 = vmatpush3.bf16.msra.mxu0 %v19652_v9  ;;  %14098 = vmatmul.mubr.bf16.vlgmr.msra.gmra.mrb[96].mxu1 %v1283_v13  ;;  %v19690_v9 = vld [vmem:[%s20437_s3 + $0x1a88] sm:$0xff]   ;;  %v19694_v13 = vld [vmem:[%s20437_s3 + $0x1a90] sm:$0xff]  }
 0x361   : > { %18011 = vmatprep.subr.bf16.mxu0 %v19654_v14  ;;  %18032 = vmatpush3.bf16.msra.mxu1 %v19653_v12  ;;  %v19693_v12 = vld [vmem:[%s20437_s3 + $0x1a10] sm:$0xff]   ;;  %v19695_v14 = vld [vmem:[%s20437_s3 + $0x1a58] sm:$0xff]  }
 0x362   : > { %18033 = vmatprep.subr.bf16.mxu1 %v19655_v16  ;;  %14137 = vmatprep.mubr.bf16.mxu0 %v1286_v1  ;;  %v19697_v16 = vld [vmem:[%s20437_s3 + $0x1a18] sm:$0xff]   ;;  %v19724_v1 = vld [vmem:[%s20437_s3 + $0x1b50] sm:$0xff]  }
 0x363   : > { %14177 = vmatprep.mubr.bf16.mxu1 %v1288_v6  ;;  %v19729_v6 = vld [vmem:[%s20437_s3 + $0x1bd8] sm:$0xff]  }
 0x364   : > { %18012 = vmatpush3.bf16.msra.mxu0 %v19656_v17  ;;  %v19698_v17 = vld [vmem:[%s20437_s3 + $0x1a98] sm:$0xff]  }
 0x365   : > { %18013 = vmatprep.subr.bf16.mxu0 %v19658_v19  ;;  %18034 = vmatpush3.bf16.msra.mxu1 %v19657_v18  ;;  %v19699_v18 = vld [vmem:[%s20437_s3 + $0x1a60] sm:$0xff]  }
 0x366   : > { %18035 = vmatprep.subr.bf16.mxu1 %v19659_v20  ;;  %v19700_v19 = vld [vmem:[%s20437_s3 + $0x1ae0] sm:$0xff]  }
 0x367   : > { %v19701_v20 = vld [vmem:[%s20437_s3 + $0x1a20] sm:$0xff]  }
 0x368   : > { %18014 = vmatpush3.bf16.msra.mxu0 %v19660_v21  ;;  %v19702_v21 = vld [vmem:[%s20437_s3 + $0x1aa0] sm:$0xff]  }
 0x369   : > { %18015 = vmatprep.subr.bf16.mxu0 %v19662_v23  ;;  %18036 = vmatpush3.bf16.msra.mxu1 %v19661_v22  ;;  %v19703_v22 = vld [vmem:[%s20437_s3 + $0x1a68] sm:$0xff]  }
 0x36a   : > { %18037 = vmatprep.subr.bf16.mxu1 %v19663_v24  ;;  %v19704_v24 = vld [vmem:[%s20437_s3 + $0x1ae8] sm:$0xff]  }
 0x36c   : > { %18016 = vmatpush3.bf16.msra.mxu0 %v19664_v25 }
 0x36d   : > { %18017 = vmatprep.subr.bf16.mxu0 %v19666_v27  ;;  %18038 = vmatpush3.bf16.msra.mxu1 %v19665_v26  ;;  %v19705_v26 = vld [vmem:[%s20437_s3 + $0x1a28] sm:$0xff]  }
 0x36e   : > { %18039 = vmatprep.subr.bf16.mxu1 %v19667_v28 }
 0x370   : > { %18018 = vmatpush3.bf16.msra.mxu0 %v19668_v29 }
 0x371   : > { %18019 = vmatprep.subr.bf16.mxu0 %v19670_v31  ;;  %18040 = vmatpush3.bf16.msra.mxu1 %v19669_v30  ;;  %v19706_v31 = vld [vmem:[%s20437_s3 + $0x1aa8] sm:$0xff]  }
 0x372   : > { %v17717_v32 = vpop.f32.mrb[72].mxu0  ;;  %18041 = vmatprep.subr.bf16.mxu1 %v19671_v33  ;;  %v19707_v33 = vld [vmem:[%s20437_s3 + $0x1a70] sm:$0xff]  }
 0x373   : > { %v17718_v34 = vpop.f32.mrb[73].mxu0  ;;  %v17739_v36 = vpop.f32.mrb[72].mxu1 }
 0x374   : > { %v17719_v37 = vadd.f32 %v17718_v34, %v17717_v32  ;;  %v17720_v38 = vpop.f32.mrb[74].mxu0  ;;  %v17740_v41 = vpop.f32.mrb[73].mxu1  ;;  %18020 = vmatpush3.bf16.msra.mxu0 %v19672_v35 }
 0x375   : > { %v17721_v43 = vpop.f32.mrb[75].mxu0  ;;  %v17741_v45 = vadd.f32 %v17740_v41, %v17739_v36  ;;  %v17742_v46 = vpop.f32.mrb[74].mxu1  ;;  %18021 = vmatprep.subr.bf16.mxu0 %v19674_v40  ;;  %18042 = vmatpush3.bf16.msra.mxu1 %v19673_v39  ;;  %v19709_v39 = vld [vmem:[%s20437_s3 + $0x1a30] sm:$0xff]   ;;  %v19711_v41 = vld [vmem:[%s20437_s3 + $0x1a78] sm:$0xff]  }
 0x376   : > { %v13580_v44 = vadd.f32 %v17719_v37, %v21370_v59  ;;  %v17743_v48 = vpop.f32.mrb[75].mxu1  ;;  %18043 = vmatprep.subr.bf16.mxu1 %v19675_v47  ;;  %v19683_v59 = vld [vmem:[%s20437_s3 + $0x1a40] sm:$0xff]   ;;  %v19708_v37 = vld [vmem:[%s20437_s3 + $0x1af0] sm:$0xff]  }
 0x377   : > { %v19710_v43 = vld [vmem:[%s20437_s3 + $0x1ab0] sm:$0xff]  }
 0x378   : > { %v21408_v50 = vadd.f32 %v17741_v45, %v13580_v44  ;;  %18022 = vmatpush3.bf16.msra.mxu0 %v19676_v49  ;;  %v19712_v44 = vld [vmem:[%s20437_s3 + $0x1af8] sm:$0xff]   ;;  %v245_v46 = vld [vmem:[%s20447_s30 + $0xd0] sm:$0xff]  ;;  %v19716_v49 = vld [vmem:[%s20437_s3 + $0x1b40] sm:$0xff]  }
 0x379   : > { %18023 = vmatprep.subr.bf16.mxu0 %v19678_v52  ;;  %18044 = vmatpush3.bf16.msra.mxu1 %v19677_v51  ;;  %v19713_v45 = vld [vmem:[%s20437_s3 + $0x1a38] sm:$0xff]   ;;  %v752_v47 = vrot.slane %v245_v46, %v20485_v42  ;;  %v745_v48 = vcombine.high %v245_v46, %v245_v46  ;;  %v19751_v46 = vld [vmem:[%s20437_s3 + $0x1c00] sm:$0xff]  }
 0x37a   : > { %18045 = vmatprep.subr.bf16.mxu1 %v19679_v53  ;;  %v19717_v53 = vld [vmem:[%s20437_s3 + $0x1bc0] sm:$0xff]  }
 0x37b   : > { %v760_v51 = vcombine.high %v752_v47, %v752_v47  ;;  %v759_v52 = vrot.slane %v745_v48, %v20485_v42 }
 0x37c   : > { %18024 = vmatpush3.bf16.msra.mxu0 %v19680_v54  ;;  %v1289_v54 = vpack.c.bf16 %v752_v47, %v752_v47 }
 0x37d   : > { %18053 = vmatprep.subr.bf16.mxu0 %v19683_v59  ;;  %18046 = vmatpush3.bf16.msra.mxu1 %v19681_v56  ;;  %v1290_v56 = vpack.c.bf16 %v760_v51, %v760_v51  ;;  %v761_v57 = vcombine.high %v759_v52, %v759_v52  ;;  %v1291_v59 = vpack.c.bf16 %v759_v52, %v759_v52  ;;  %v19753_v51 = vld [vmem:[%s20437_s3 + $0x1c48] sm:$0xff]  }
 0x37e   : > { %18075 = vmatprep.subr.bf16.mxu1 %v19684_v62  ;;  %v19721_v62 = vld [vmem:[%s20437_s3 + $0x1bc8] sm:$0xff]  }
 0x37f   : > { %14138 = vmatmul.mubr.bf16.vlgmr.msra.gmra.mrb[100].mxu0 %v1285_v63  ;;  %v1292_v61 = vpack.c.bf16 %v761_v57, %v761_v57  ;;  %v19722_v63 = vld [vmem:[%s20437_s3 + $0x1b08] sm:$0xff]   ;;  %v19758_v57 = vld [vmem:[%s20437_s3 + $0x1cd0] sm:$0xff]  }
 0x380   : > { %18054 = vmatpush3.bf16.msra.mxu0 %v19685_v0  ;;  %14178 = vmatmul.mubr.bf16.vlgmr.msra.gmra.mrb[100].mxu1 %v1287_v4  ;;  %v19723_v0 = vld [vmem:[%s20437_s3 + $0x1b88] sm:$0xff]   ;;  %v19727_v4 = vld [vmem:[%s20437_s3 + $0x1b90] sm:$0xff]  }
 0x381   : > { %18055 = vmatprep.subr.bf16.mxu0 %v19687_v5  ;;  %18076 = vmatpush3.bf16.msra.mxu1 %v19686_v3  ;;  %v19726_v3 = vld [vmem:[%s20437_s3 + $0x1b10] sm:$0xff]   ;;  %v19728_v5 = vld [vmem:[%s20437_s3 + $0x1b58] sm:$0xff]  }
 0x382   : > { %18077 = vmatprep.subr.bf16.mxu1 %v19688_v7  ;;  %14217 = vmatprep.mubr.bf16.mxu0 %v1290_v56  ;;  %v19730_v7 = vld [vmem:[%s20437_s3 + $0x1b18] sm:$0xff]   ;;  %v19757_v56 = vld [vmem:[%s20437_s3 + $0x1c50] sm:$0xff]  }
 0x383   : > { %14257 = vmatprep.mubr.bf16.mxu1 %v1292_v61  ;;  %v19762_v61 = vld [vmem:[%s20437_s3 + $0x1cd8] sm:$0xff]  }
 0x384   : > { %18056 = vmatpush3.bf16.msra.mxu0 %v19689_v8  ;;  %v19731_v8 = vld [vmem:[%s20437_s3 + $0x1b98] sm:$0xff]  }
 0x385   : > { %18057 = vmatprep.subr.bf16.mxu0 %v19691_v10  ;;  %18078 = vmatpush3.bf16.msra.mxu1 %v19690_v9  ;;  %v19732_v9 = vld [vmem:[%s20437_s3 + $0x1b60] sm:$0xff]  }
 0x386   : > { %18079 = vmatprep.subr.bf16.mxu1 %v19692_v11  ;;  %v19733_v10 = vld [vmem:[%s20437_s3 + $0x1be0] sm:$0xff]  }
 0x387   : > { %v19734_v11 = vld [vmem:[%s20437_s3 + $0x1b20] sm:$0xff]  }
 0x388   : > { %18058 = vmatpush3.bf16.msra.mxu0 %v19693_v12  ;;  %v19735_v12 = vld [vmem:[%s20437_s3 + $0x1ba0] sm:$0xff]  }
 0x389   : > { %18059 = vmatprep.subr.bf16.mxu0 %v19695_v14  ;;  %18080 = vmatpush3.bf16.msra.mxu1 %v19694_v13  ;;  %v19736_v13 = vld [vmem:[%s20437_s3 + $0x1b68] sm:$0xff]  }
 0x38a   : > { %18081 = vmatprep.subr.bf16.mxu1 %v19696_v15  ;;  %v19737_v15 = vld [vmem:[%s20437_s3 + $0x1be8] sm:$0xff]  }
 0x38c   : > { %18060 = vmatpush3.bf16.msra.mxu0 %v19697_v16 }
 0x38d   : > { %18061 = vmatprep.subr.bf16.mxu0 %v19699_v18  ;;  %18082 = vmatpush3.bf16.msra.mxu1 %v19698_v17  ;;  %v19738_v17 = vld [vmem:[%s20437_s3 + $0x1b28] sm:$0xff]  }
 0x38e   : > { %18083 = vmatprep.subr.bf16.mxu1 %v19700_v19 }
 0x390   : > { %18062 = vmatpush3.bf16.msra.mxu0 %v19701_v20 }
 0x391   : > { %18063 = vmatprep.subr.bf16.mxu0 %v19703_v22  ;;  %18084 = vmatpush3.bf16.msra.mxu1 %v19702_v21  ;;  %v19739_v21 = vld [vmem:[%s20437_s3 + $0x1ba8] sm:$0xff]   ;;  %v19740_v22 = vld [vmem:[%s20437_s3 + $0x1b70] sm:$0xff]  }
 0x392   : > { %v17761_v23 = vpop.f32.mrb[76].mxu0  ;;  %18085 = vmatprep.subr.bf16.mxu1 %v19704_v24 }
 0x393   : > { %v17762_v25 = vpop.f32.mrb[77].mxu0  ;;  %v17783_v27 = vpop.f32.mrb[76].mxu1 }
 0x394   : > { %v17763_v28 = vadd.f32 %v17762_v25, %v17761_v23  ;;  %v17764_v29 = vpop.f32.mrb[78].mxu0  ;;  %v17784_v30 = vpop.f32.mrb[77].mxu1  ;;  %18064 = vmatpush3.bf16.msra.mxu0 %v19705_v26 }
 0x395   : > { %v17765_v32 = vpop.f32.mrb[79].mxu0  ;;  %v17785_v35 = vadd.f32 %v17784_v30, %v17783_v27  ;;  %v17786_v36 = vpop.f32.mrb[78].mxu1  ;;  %18065 = vmatprep.subr.bf16.mxu0 %v19707_v33  ;;  %18086 = vmatpush3.bf16.msra.mxu1 %v19706_v31  ;;  %v19742_v30 = vld [vmem:[%s20437_s3 + $0x1b30] sm:$0xff]   ;;  %v19744_v33 = vld [vmem:[%s20437_s3 + $0x1b78] sm:$0xff]  }
 0x396   : > { %v13660_v34 = vadd.f32 %v17763_v28, %v21408_v50  ;;  %v17787_v38 = vpop.f32.mrb[79].mxu1  ;;  %18087 = vmatprep.subr.bf16.mxu1 %v19708_v37  ;;  %v19714_v50 = vld [vmem:[%s20437_s3 + $0x1ab8] sm:$0xff]   ;;  %v19741_v28 = vld [vmem:[%s20437_s3 + $0x1bf0] sm:$0xff]  }
 0x397   : > { %v19743_v32 = vld [vmem:[%s20437_s3 + $0x1bb0] sm:$0xff]   ;;  %v246_v36 = vld [vmem:[%s20447_s30 + $0xd8] sm:$0xff] }
 0x398   : > { %v21446_v40 = vadd.f32 %v17785_v35, %v13660_v34  ;;  %18066 = vmatpush3.bf16.msra.mxu0 %v19709_v39  ;;  %v19745_v34 = vld [vmem:[%s20437_s3 + $0x1bf8] sm:$0xff]   ;;  %v769_v37 = vrot.slane %v246_v36, %v20485_v42  ;;  %v762_v38 = vcombine.high %v246_v36, %v246_v36  ;;  %v19749_v39 = vld [vmem:[%s20437_s3 + $0x1c40] sm:$0xff]  }
 0x399   : > { %18067 = vmatprep.subr.bf16.mxu0 %v19711_v41  ;;  %18088 = vmatpush3.bf16.msra.mxu1 %v19710_v43  ;;  %v19746_v35 = vld [vmem:[%s20437_s3 + $0x1b38] sm:$0xff]   ;;  %v19784_v36 = vld [vmem:[%s20437_s3 + $0x1d00] sm:$0xff]  }
 0x39a   : > { %18089 = vmatprep.subr.bf16.mxu1 %v19712_v44  ;;  %v777_v41 = vcombine.high %v769_v37, %v769_v37  ;;  %v776_v43 = vrot.slane %v762_v38, %v20485_v42  ;;  %v19750_v44 = vld [vmem:[%s20437_s3 + $0x1cc0] sm:$0xff]  }
 0x39c   : > { %18068 = vmatpush3.bf16.msra.mxu0 %v19713_v45  ;;  %v1293_v45 = vpack.c.bf16 %v769_v37, %v769_v37  ;;  %v1294_v47 = vpack.c.bf16 %v777_v41, %v777_v41  ;;  %v778_v48 = vcombine.high %v776_v43, %v776_v43  ;;  %v19786_v41 = vld [vmem:[%s20437_s3 + $0x1d48] sm:$0xff]  }
 0x39d   : > { %18097 = vmatprep.subr.bf16.mxu0 %v19716_v49  ;;  %18090 = vmatpush3.bf16.msra.mxu1 %v19714_v50  ;;  %v19752_v49 = vld [vmem:[%s20437_s3 + $0x1c80] sm:$0xff]   ;;  %v1295_v50 = vpack.c.bf16 %v776_v43, %v776_v43 }
 0x39e   : > { %18119 = vmatprep.subr.bf16.mxu1 %v19717_v53  ;;  %v1296_v52 = vpack.c.bf16 %v778_v48, %v778_v48  ;;  %v19754_v53 = vld [vmem:[%s20437_s3 + $0x1cc8] sm:$0xff]   ;;  %v19791_v48 = vld [vmem:[%s20437_s3 + $0x1dd0] sm:$0xff]  }
 0x39f   : > { %14218 = vmatmul.mubr.bf16.vlgmr.msra.gmra.mrb[104].mxu0 %v1289_v54  ;;  %v19755_v54 = vld [vmem:[%s20437_s3 + $0x1c08] sm:$0xff]  }
 0x3a0   : > { %18098 = vmatpush3.bf16.msra.mxu0 %v19718_v55  ;;  %14258 = vmatmul.mubr.bf16.vlgmr.msra.gmra.mrb[104].mxu1 %v1291_v59  ;;  %v19756_v55 = vld [vmem:[%s20437_s3 + $0x1c88] sm:$0xff]   ;;  %v19760_v59 = vld [vmem:[%s20437_s3 + $0x1c90] sm:$0xff]  }
 0x3a1   : > { %18099 = vmatprep.subr.bf16.mxu0 %v19720_v60  ;;  %18120 = vmatpush3.bf16.msra.mxu1 %v19719_v58  ;;  %v19759_v58 = vld [vmem:[%s20437_s3 + $0x1c10] sm:$0xff]   ;;  %v19761_v60 = vld [vmem:[%s20437_s3 + $0x1c58] sm:$0xff]  }
 0x3a2   : > { %18121 = vmatprep.subr.bf16.mxu1 %v19721_v62  ;;  %14297 = vmatprep.mubr.bf16.mxu0 %v1294_v47  ;;  %v19763_v62 = vld [vmem:[%s20437_s3 + $0x1c18] sm:$0xff]   ;;  %v19790_v47 = vld [vmem:[%s20437_s3 + $0x1d50] sm:$0xff]  }
 0x3a3   : > { %14337 = vmatprep.mubr.bf16.mxu1 %v1296_v52  ;;  %v19795_v52 = vld [vmem:[%s20437_s3 + $0x1dd8] sm:$0xff]  }
 0x3a4   : > { %18100 = vmatpush3.bf16.msra.mxu0 %v19722_v63  ;;  %v19764_v63 = vld [vmem:[%s20437_s3 + $0x1c98] sm:$0xff]  }
 0x3a5   : > { %18101 = vmatprep.subr.bf16.mxu0 %v19724_v1  ;;  %18122 = vmatpush3.bf16.msra.mxu1 %v19723_v0  ;;  %v19765_v0 = vld [vmem:[%s20437_s3 + $0x1c60] sm:$0xff]  }
 0x3a6   : > { %18123 = vmatprep.subr.bf16.mxu1 %v19725_v2  ;;  %v19766_v1 = vld [vmem:[%s20437_s3 + $0x1ce0] sm:$0xff]  }
 0x3a7   : > { %v19767_v2 = vld [vmem:[%s20437_s3 + $0x1c20] sm:$0xff]  }
 0x3a8   : > { %18102 = vmatpush3.bf16.msra.mxu0 %v19726_v3  ;;  %v19768_v3 = vld [vmem:[%s20437_s3 + $0x1ca0] sm:$0xff]  }
 0x3a9   : > { %18103 = vmatprep.subr.bf16.mxu0 %v19728_v5  ;;  %18124 = vmatpush3.bf16.msra.mxu1 %v19727_v4  ;;  %v19769_v4 = vld [vmem:[%s20437_s3 + $0x1c68] sm:$0xff]  }
 0x3aa   : > { %18125 = vmatprep.subr.bf16.mxu1 %v19729_v6  ;;  %v19770_v6 = vld [vmem:[%s20437_s3 + $0x1ce8] sm:$0xff]  }
 0x3ac   : > { %18104 = vmatpush3.bf16.msra.mxu0 %v19730_v7 }
 0x3ad   : > { %18105 = vmatprep.subr.bf16.mxu0 %v19732_v9  ;;  %18126 = vmatpush3.bf16.msra.mxu1 %v19731_v8  ;;  %v19771_v8 = vld [vmem:[%s20437_s3 + $0x1c28] sm:$0xff]  }
 0x3ae   : > { %18127 = vmatprep.subr.bf16.mxu1 %v19733_v10 }
 0x3b0   : > { %18106 = vmatpush3.bf16.msra.mxu0 %v19734_v11 }
 0x3b1   : > { %18107 = vmatprep.subr.bf16.mxu0 %v19736_v13  ;;  %18128 = vmatpush3.bf16.msra.mxu1 %v19735_v12  ;;  %v19772_v12 = vld [vmem:[%s20437_s3 + $0x1ca8] sm:$0xff]   ;;  %v19773_v13 = vld [vmem:[%s20437_s3 + $0x1c70] sm:$0xff]  }
 0x3b2   : > { %v17805_v14 = vpop.f32.mrb[80].mxu0  ;;  %18129 = vmatprep.subr.bf16.mxu1 %v19737_v15 }
 0x3b3   : > { %v17806_v16 = vpop.f32.mrb[81].mxu0  ;;  %v17827_v18 = vpop.f32.mrb[80].mxu1 }
 0x3b4   : > { %v17807_v19 = vadd.f32 %v17806_v16, %v17805_v14  ;;  %v17808_v20 = vpop.f32.mrb[82].mxu0  ;;  %v17828_v23 = vpop.f32.mrb[81].mxu1  ;;  %18108 = vmatpush3.bf16.msra.mxu0 %v19738_v17 }
 0x3b5   : > { %v17809_v24 = vpop.f32.mrb[83].mxu0  ;;  %v17829_v26 = vadd.f32 %v17828_v23, %v17827_v18  ;;  %v17830_v27 = vpop.f32.mrb[82].mxu1  ;;  %18109 = vmatprep.subr.bf16.mxu0 %v19740_v22  ;;  %18130 = vmatpush3.bf16.msra.mxu1 %v19739_v21  ;;  %v19775_v21 = vld [vmem:[%s20437_s3 + $0x1c30] sm:$0xff]  }
 0x3b6   : > { %v13740_v25 = vadd.f32 %v17807_v19, %v21446_v40  ;;  %v17831_v29 = vpop.f32.mrb[83].mxu1  ;;  %18131 = vmatprep.subr.bf16.mxu1 %v19741_v28  ;;  %v19747_v40 = vld [vmem:[%s20437_s3 + $0x1bb8] sm:$0xff]   ;;  %v19774_v19 = vld [vmem:[%s20437_s3 + $0x1cf0] sm:$0xff]   ;;  %v247_v27 = vld [vmem:[%s20447_s30 + $0xe0] sm:$0xff] }
 0x3b7   : > { %v19776_v23 = vld [vmem:[%s20437_s3 + $0x1cb0] sm:$0xff]   ;;  %v19777_v24 = vld [vmem:[%s20437_s3 + $0x1c78] sm:$0xff]   ;;  %v786_v29 = vrot.slane %v247_v27, %v20485_v42 }
 0x3b8   : > { %v21484_v31 = vadd.f32 %v17829_v26, %v13740_v25  ;;  %18110 = vmatpush3.bf16.msra.mxu0 %v19742_v30  ;;  %v19778_v25 = vld [vmem:[%s20437_s3 + $0x1cf8] sm:$0xff]   ;;  %v779_v30 = vcombine.high %v247_v27, %v247_v27  ;;  %v19817_v27 = vld [vmem:[%s20437_s3 + $0x1e00] sm:$0xff]  }
 0x3b9   : > { %18111 = vmatprep.subr.bf16.mxu0 %v19744_v33  ;;  %18132 = vmatpush3.bf16.msra.mxu1 %v19743_v32  ;;  %v19779_v26 = vld [vmem:[%s20437_s3 + $0x1c38] sm:$0xff]   ;;  %v794_v32 = vcombine.high %v786_v29, %v786_v29 }
 0x3ba   : > { %18133 = vmatprep.subr.bf16.mxu1 %v19745_v34  ;;  %v19780_v28 = vld [vmem:[%s20437_s3 + $0x1cb8] sm:$0xff]   ;;  %v793_v33 = vrot.slane %v779_v30, %v20485_v42  ;;  %v19783_v34 = vld [vmem:[%s20437_s3 + $0x1dc0] sm:$0xff]  }
 0x3bb   : > { %v1298_v37 = vpack.c.bf16 %v794_v32, %v794_v32  ;;  %v19818_v30 = vld [vmem:[%s20437_s3 + $0x1e80] sm:$0xff]   ;;  %v19819_v32 = vld [vmem:[%s20437_s3 + $0x1e48] sm:$0xff]  }
 0x3bc   : > { %18112 = vmatpush3.bf16.msra.mxu0 %v19746_v35  ;;  %v1297_v35 = vpack.c.bf16 %v786_v29, %v786_v29  ;;  %v795_v38 = vcombine.high %v793_v33, %v793_v33 }
 0x3bd   : > { %18141 = vmatprep.subr.bf16.mxu0 %v19749_v39  ;;  %18134 = vmatpush3.bf16.msra.mxu1 %v19747_v40  ;;  %v19785_v39 = vld [vmem:[%s20437_s3 + $0x1d80] sm:$0xff]   ;;  %v1299_v40 = vpack.c.bf16 %v793_v33, %v793_v33 }
 0x3be   : > { %18163 = vmatprep.subr.bf16.mxu1 %v19750_v44  ;;  %v1300_v43 = vpack.c.bf16 %v795_v38, %v795_v38  ;;  %v19787_v44 = vld [vmem:[%s20437_s3 + $0x1dc8] sm:$0xff]   ;;  %v19824_v38 = vld [vmem:[%s20437_s3 + $0x1ed0] sm:$0xff]  }
 0x3bf   : > { %14298 = vmatmul.mubr.bf16.vlgmr.msra.gmra.mrb[108].mxu0 %v1293_v45  ;;  %v19788_v45 = vld [vmem:[%s20437_s3 + $0x1d08] sm:$0xff]  }
 0x3c0   : > { %18142 = vmatpush3.bf16.msra.mxu0 %v19751_v46  ;;  %14338 = vmatmul.mubr.bf16.vlgmr.msra.gmra.mrb[108].mxu1 %v1295_v50  ;;  %v19789_v46 = vld [vmem:[%s20437_s3 + $0x1d88] sm:$0xff]   ;;  %v19793_v50 = vld [vmem:[%s20437_s3 + $0x1d90] sm:$0xff]  }
 0x3c1   : > { %18143 = vmatprep.subr.bf16.mxu0 %v19753_v51  ;;  %18164 = vmatpush3.bf16.msra.mxu1 %v19752_v49  ;;  %v19792_v49 = vld [vmem:[%s20437_s3 + $0x1d10] sm:$0xff]   ;;  %v19794_v51 = vld [vmem:[%s20437_s3 + $0x1d58] sm:$0xff]  }
 0x3c2   : > { %18165 = vmatprep.subr.bf16.mxu1 %v19754_v53  ;;  %14377 = vmatprep.mubr.bf16.mxu0 %v1298_v37  ;;  %v19796_v53 = vld [vmem:[%s20437_s3 + $0x1d18] sm:$0xff]   ;;  %v19823_v37 = vld [vmem:[%s20437_s3 + $0x1e50] sm:$0xff]  }
 0x3c3   : > { %14417 = vmatprep.mubr.bf16.mxu1 %v1300_v43  ;;  %v19828_v43 = vld [vmem:[%s20437_s3 + $0x1ed8] sm:$0xff]  }
 0x3c4   : > { %18144 = vmatpush3.bf16.msra.mxu0 %v19755_v54  ;;  %v19797_v54 = vld [vmem:[%s20437_s3 + $0x1d98] sm:$0xff]  }
 0x3c5   : > { %18145 = vmatprep.subr.bf16.mxu0 %v19757_v56  ;;  %18166 = vmatpush3.bf16.msra.mxu1 %v19756_v55  ;;  %v19798_v55 = vld [vmem:[%s20437_s3 + $0x1d60] sm:$0xff]  }
 0x3c6   : > { %18167 = vmatprep.subr.bf16.mxu1 %v19758_v57  ;;  %v19799_v56 = vld [vmem:[%s20437_s3 + $0x1de0] sm:$0xff]  }
 0x3c7   : > { %v19800_v57 = vld [vmem:[%s20437_s3 + $0x1d20] sm:$0xff]  }
 0x3c8   : > { %18146 = vmatpush3.bf16.msra.mxu0 %v19759_v58  ;;  %v19801_v58 = vld [vmem:[%s20437_s3 + $0x1da0] sm:$0xff]  }
 0x3c9   : > { %18147 = vmatprep.subr.bf16.mxu0 %v19761_v60  ;;  %18168 = vmatpush3.bf16.msra.mxu1 %v19760_v59  ;;  %v19802_v59 = vld [vmem:[%s20437_s3 + $0x1d68] sm:$0xff]  }
 0x3ca   : > { %18169 = vmatprep.subr.bf16.mxu1 %v19762_v61  ;;  %v19803_v61 = vld [vmem:[%s20437_s3 + $0x1de8] sm:$0xff]  }
 0x3cc   : > { %18148 = vmatpush3.bf16.msra.mxu0 %v19763_v62 }
 0x3cd   : > { %18149 = vmatprep.subr.bf16.mxu0 %v19765_v0  ;;  %18170 = vmatpush3.bf16.msra.mxu1 %v19764_v63  ;;  %v19804_v63 = vld [vmem:[%s20437_s3 + $0x1d28] sm:$0xff]  }
 0x3ce   : > { %18171 = vmatprep.subr.bf16.mxu1 %v19766_v1 }
 0x3d0   : > { %18150 = vmatpush3.bf16.msra.mxu0 %v19767_v2 }
 0x3d1   : > { %18151 = vmatprep.subr.bf16.mxu0 %v19769_v4  ;;  %18172 = vmatpush3.bf16.msra.mxu1 %v19768_v3  ;;  %v19805_v4 = vld [vmem:[%s20437_s3 + $0x1da8] sm:$0xff]  }
 0x3d2   : > { %v17849_v5 = vpop.f32.mrb[84].mxu0  ;;  %18173 = vmatprep.subr.bf16.mxu1 %v19770_v6  ;;  %v19806_v6 = vld [vmem:[%s20437_s3 + $0x1d70] sm:$0xff]  }
 0x3d3   : > { %v17850_v7 = vpop.f32.mrb[85].mxu0  ;;  %v17871_v9 = vpop.f32.mrb[84].mxu1 }
 0x3d4   : > { %v17851_v10 = vadd.f32 %v17850_v7, %v17849_v5  ;;  %v17852_v11 = vpop.f32.mrb[86].mxu0  ;;  %v17872_v14 = vpop.f32.mrb[85].mxu1  ;;  %18152 = vmatpush3.bf16.msra.mxu0 %v19771_v8 }
 0x3d5   : > { %v17853_v15 = vpop.f32.mrb[87].mxu0  ;;  %v17873_v17 = vadd.f32 %v17872_v14, %v17871_v9  ;;  %v17874_v18 = vpop.f32.mrb[86].mxu1  ;;  %18153 = vmatprep.subr.bf16.mxu0 %v19773_v13  ;;  %18174 = vmatpush3.bf16.msra.mxu1 %v19772_v12  ;;  %v19808_v12 = vld [vmem:[%s20437_s3 + $0x1d30] sm:$0xff]   ;;  %v19810_v14 = vld [vmem:[%s20437_s3 + $0x1d78] sm:$0xff]  }
 0x3d6   : > { %v13820_v16 = vadd.f32 %v17851_v10, %v21484_v31  ;;  %v17875_v20 = vpop.f32.mrb[87].mxu1  ;;  %18175 = vmatprep.subr.bf16.mxu1 %v19774_v19  ;;  %v19782_v31 = vld [vmem:[%s20437_s3 + $0x1d40] sm:$0xff]   ;;  %v19807_v10 = vld [vmem:[%s20437_s3 + $0x1df0] sm:$0xff]   ;;  %v248_v18 = vld [vmem:[%s20447_s30 + $0xe8] sm:$0xff] }
 0x3d7   : > { %v19809_v15 = vld [vmem:[%s20437_s3 + $0x1db0] sm:$0xff]   ;;  %v803_v19 = vrot.slane %v248_v18, %v20485_v42  ;;  %v796_v20 = vcombine.high %v248_v18, %v248_v18  ;;  %v19850_v18 = vld [vmem:[%s20437_s3 + $0x1f00] sm:$0xff]  }
 0x3d8   : > { %v21522_v22 = vadd.f32 %v17873_v17, %v13820_v16  ;;  %18154 = vmatpush3.bf16.msra.mxu0 %v19775_v21  ;;  %v19811_v16 = vld [vmem:[%s20437_s3 + $0x1df8] sm:$0xff]   ;;  %v19815_v21 = vld [vmem:[%s20437_s3 + $0x1e40] sm:$0xff]  }
 0x3d9   : > { %18155 = vmatprep.subr.bf16.mxu0 %v19777_v24  ;;  %18176 = vmatpush3.bf16.msra.mxu1 %v19776_v23  ;;  %v19812_v17 = vld [vmem:[%s20437_s3 + $0x1d38] sm:$0xff]   ;;  %v811_v23 = vcombine.high %v803_v19, %v803_v19  ;;  %v810_v24 = vrot.slane %v796_v20, %v20485_v42 }
 0x3da   : > { %18177 = vmatprep.subr.bf16.mxu1 %v19778_v25  ;;  %v19816_v25 = vld [vmem:[%s20437_s3 + $0x1ec0] sm:$0xff]  }
 0x3db   : > { %v812_v29 = vcombine.high %v810_v24, %v810_v24 }
 0x3dc   : > { %18156 = vmatpush3.bf16.msra.mxu0 %v19779_v26  ;;  %v1301_v26 = vpack.c.bf16 %v803_v19, %v803_v19 }
 0x3dd   : > { %18185 = vmatprep.subr.bf16.mxu0 %v19782_v31  ;;  %18178 = vmatpush3.bf16.msra.mxu1 %v19780_v28  ;;  %v1302_v28 = vpack.c.bf16 %v811_v23, %v811_v23  ;;  %v1303_v31 = vpack.c.bf16 %v810_v24, %v810_v24  ;;  %v1304_v33 = vpack.c.bf16 %v812_v29, %v812_v29  ;;  %v19852_v23 = vld [vmem:[%s20437_s3 + $0x1f48] sm:$0xff]   ;;  %v19857_v29 = vld [vmem:[%s20437_s3 + $0x1fd0] sm:$0xff]  }
 0x3de   : > { %18207 = vmatprep.subr.bf16.mxu1 %v19783_v34  ;;  %v19820_v34 = vld [vmem:[%s20437_s3 + $0x1ec8] sm:$0xff]  }
 0x3df   : > { %14378 = vmatmul.mubr.bf16.vlgmr.msra.gmra.mrb[112].mxu0 %v1297_v35  ;;  %v19821_v35 = vld [vmem:[%s20437_s3 + $0x1e08] sm:$0xff]  }
 0x3e0   : > { %18186 = vmatpush3.bf16.msra.mxu0 %v19784_v36  ;;  %14418 = vmatmul.mubr.bf16.vlgmr.msra.gmra.mrb[112].mxu1 %v1299_v40  ;;  %v19822_v36 = vld [vmem:[%s20437_s3 + $0x1e88] sm:$0xff]   ;;  %v19826_v40 = vld [vmem:[%s20437_s3 + $0x1e90] sm:$0xff]  }
 0x3e1   : > { %18187 = vmatprep.subr.bf16.mxu0 %v19786_v41  ;;  %18208 = vmatpush3.bf16.msra.mxu1 %v19785_v39  ;;  %v19825_v39 = vld [vmem:[%s20437_s3 + $0x1e10] sm:$0xff]   ;;  %v19827_v41 = vld [vmem:[%s20437_s3 + $0x1e58] sm:$0xff]  }
 0x3e2   : > { %18209 = vmatprep.subr.bf16.mxu1 %v19787_v44  ;;  %14457 = vmatprep.mubr.bf16.mxu0 %v1302_v28  ;;  %v19829_v44 = vld [vmem:[%s20437_s3 + $0x1e18] sm:$0xff]   ;;  %v19856_v28 = vld [vmem:[%s20437_s3 + $0x1f50] sm:$0xff]  }
 0x3e3   : > { %14497 = vmatprep.mubr.bf16.mxu1 %v1304_v33  ;;  %v19861_v33 = vld [vmem:[%s20437_s3 + $0x1fd8] sm:$0xff]  }
 0x3e4   : > { %18188 = vmatpush3.bf16.msra.mxu0 %v19788_v45  ;;  %v19830_v45 = vld [vmem:[%s20437_s3 + $0x1e98] sm:$0xff]  }
 0x3e5   : > { %18189 = vmatprep.subr.bf16.mxu0 %v19790_v47  ;;  %18210 = vmatpush3.bf16.msra.mxu1 %v19789_v46  ;;  %v19831_v46 = vld [vmem:[%s20437_s3 + $0x1e60] sm:$0xff]  }
 0x3e6   : > { %18211 = vmatprep.subr.bf16.mxu1 %v19791_v48  ;;  %v19832_v47 = vld [vmem:[%s20437_s3 + $0x1ee0] sm:$0xff]  }
 0x3e7   : > { %v19833_v48 = vld [vmem:[%s20437_s3 + $0x1e20] sm:$0xff]  }
 0x3e8   : > { %18190 = vmatpush3.bf16.msra.mxu0 %v19792_v49  ;;  %v19834_v49 = vld [vmem:[%s20437_s3 + $0x1ea0] sm:$0xff]  }
 0x3e9   : > { %18191 = vmatprep.subr.bf16.mxu0 %v19794_v51  ;;  %18212 = vmatpush3.bf16.msra.mxu1 %v19793_v50  ;;  %v19835_v50 = vld [vmem:[%s20437_s3 + $0x1e68] sm:$0xff]  }
 0x3ea   : > { %18213 = vmatprep.subr.bf16.mxu1 %v19795_v52  ;;  %v19836_v52 = vld [vmem:[%s20437_s3 + $0x1ee8] sm:$0xff]  }
 0x3ec   : > { %18192 = vmatpush3.bf16.msra.mxu0 %v19796_v53 }
 0x3ed   : > { %18193 = vmatprep.subr.bf16.mxu0 %v19798_v55  ;;  %18214 = vmatpush3.bf16.msra.mxu1 %v19797_v54  ;;  %v19837_v54 = vld [vmem:[%s20437_s3 + $0x1e28] sm:$0xff]  }
 0x3ee   : > { %18215 = vmatprep.subr.bf16.mxu1 %v19799_v56 }
 0x3f0   : > { %18194 = vmatpush3.bf16.msra.mxu0 %v19800_v57 }
 0x3f1   : > { %18195 = vmatprep.subr.bf16.mxu0 %v19802_v59  ;;  %18216 = vmatpush3.bf16.msra.mxu1 %v19801_v58  ;;  %v19838_v58 = vld [vmem:[%s20437_s3 + $0x1ea8] sm:$0xff]   ;;  %v19839_v59 = vld [vmem:[%s20437_s3 + $0x1e70] sm:$0xff]  }
 0x3f2   : > { %v17893_v60 = vpop.f32.mrb[88].mxu0  ;;  %18217 = vmatprep.subr.bf16.mxu1 %v19803_v61 }
 0x3f3   : > { %v17894_v62 = vpop.f32.mrb[89].mxu0  ;;  %v17915_v0 = vpop.f32.mrb[88].mxu1 }
 0x3f4   : > { %v17895_v1 = vadd.f32 %v17894_v62, %v17893_v60  ;;  %v17896_v2 = vpop.f32.mrb[90].mxu0  ;;  %v17916_v3 = vpop.f32.mrb[89].mxu1  ;;  %18196 = vmatpush3.bf16.msra.mxu0 %v19804_v63 }
 0x3f5   : > { %v17897_v5 = vpop.f32.mrb[91].mxu0  ;;  %v17917_v8 = vadd.f32 %v17916_v3, %v17915_v0  ;;  %v17918_v9 = vpop.f32.mrb[90].mxu1  ;;  %18197 = vmatprep.subr.bf16.mxu0 %v19806_v6  ;;  %18218 = vmatpush3.bf16.msra.mxu1 %v19805_v4  ;;  %v19841_v3 = vld [vmem:[%s20437_s3 + $0x1e30] sm:$0xff]   ;;  %v19843_v6 = vld [vmem:[%s20437_s3 + $0x1e78] sm:$0xff]  }
 0x3f6   : > { %v13900_v7 = vadd.f32 %v17895_v1, %v21522_v22  ;;  %v17919_v11 = vpop.f32.mrb[91].mxu1  ;;  %18219 = vmatprep.subr.bf16.mxu1 %v19807_v10  ;;  %v19813_v22 = vld [vmem:[%s20437_s3 + $0x1db8] sm:$0xff]   ;;  %v19840_v1 = vld [vmem:[%s20437_s3 + $0x1ef0] sm:$0xff]  }
 0x3f7   : > { %v19842_v5 = vld [vmem:[%s20437_s3 + $0x1eb0] sm:$0xff]  }
 0x3f8   : > { %v21560_v13 = vadd.f32 %v17917_v8, %v13900_v7  ;;  %18198 = vmatpush3.bf16.msra.mxu0 %v19808_v12  ;;  %v19844_v7 = vld [vmem:[%s20437_s3 + $0x1ef8] sm:$0xff]   ;;  %v249_v9 = vld [vmem:[%s20447_s30 + $0xf0] sm:$0xff]  ;;  %v19848_v12 = vld [vmem:[%s20437_s3 + $0x1f40] sm:$0xff]  }
 0x3f9   : > { %18199 = vmatprep.subr.bf16.mxu0 %v19810_v14  ;;  %18220 = vmatpush3.bf16.msra.mxu1 %v19809_v15  ;;  %v19845_v8 = vld [vmem:[%s20437_s3 + $0x1e38] sm:$0xff]   ;;  %v820_v10 = vrot.slane %v249_v9, %v20485_v42  ;;  %v813_v11 = vcombine.high %v249_v9, %v249_v9  ;;  %v19883_v9 = vld [vmem:[%s20437_s3 + $0x2000] sm:$0xff]  }
 0x3fa   : > { %18221 = vmatprep.subr.bf16.mxu1 %v19811_v16  ;;  %v19849_v16 = vld [vmem:[%s20437_s3 + $0x1fc0] sm:$0xff]  }
 0x3fb   : > { %v828_v14 = vcombine.high %v820_v10, %v820_v10  ;;  %v827_v15 = vrot.slane %v813_v11, %v20485_v42 }
 0x3fc   : > { %18200 = vmatpush3.bf16.msra.mxu0 %v19812_v17  ;;  %v1305_v17 = vpack.c.bf16 %v820_v10, %v820_v10 }
 0x3fd   : > { %18229 = vmatprep.subr.bf16.mxu0 %v19815_v21  ;;  %18222 = vmatpush3.bf16.msra.mxu1 %v19813_v22  ;;  %v1306_v19 = vpack.c.bf16 %v828_v14, %v828_v14  ;;  %v829_v20 = vcombine.high %v827_v15, %v827_v15  ;;  %v19851_v21 = vld [vmem:[%s20437_s3 + $0x1f80] sm:$0xff]   ;;  %v1307_v22 = vpack.c.bf16 %v827_v15, %v827_v15  ;;  %v19885_v14 = vld [vmem:[%s20437_s3 + $0x2048] sm:$0xff]  }
 0x3fe   : > { %18251 = vmatprep.subr.bf16.mxu1 %v19816_v25  ;;  %v19853_v25 = vld [vmem:[%s20437_s3 + $0x1fc8] sm:$0xff]  }
 0x3ff   : > { %14458 = vmatmul.mubr.bf16.vlgmr.msra.gmra.mrb[116].mxu0 %v1301_v26  ;;  %v1308_v24 = vpack.c.bf16 %v829_v20, %v829_v20  ;;  %v19854_v26 = vld [vmem:[%s20437_s3 + $0x1f08] sm:$0xff]   ;;  %v19890_v20 = vld [vmem:[%s20437_s3 + $0x20d0] sm:$0xff]  }
 0x400   : > { %18230 = vmatpush3.bf16.msra.mxu0 %v19817_v27  ;;  %14498 = vmatmul.mubr.bf16.vlgmr.msra.gmra.mrb[116].mxu1 %v1303_v31  ;;  %v19855_v27 = vld [vmem:[%s20437_s3 + $0x1f88] sm:$0xff]   ;;  %v19859_v31 = vld [vmem:[%s20437_s3 + $0x1f90] sm:$0xff]  }
 0x401   : > { %18231 = vmatprep.subr.bf16.mxu0 %v19819_v32  ;;  %18252 = vmatpush3.bf16.msra.mxu1 %v19818_v30  ;;  %v19858_v30 = vld [vmem:[%s20437_s3 + $0x1f10] sm:$0xff]   ;;  %v19860_v32 = vld [vmem:[%s20437_s3 + $0x1f58] sm:$0xff]  }
 0x402   : > { %18253 = vmatprep.subr.bf16.mxu1 %v19820_v34  ;;  %14537 = vmatprep.mubr.bf16.mxu0 %v1306_v19  ;;  %v19862_v34 = vld [vmem:[%s20437_s3 + $0x1f18] sm:$0xff]   ;;  %v19889_v19 = vld [vmem:[%s20437_s3 + $0x2050] sm:$0xff]  }
 0x403   : > { %14577 = vmatprep.mubr.bf16.mxu1 %v1308_v24  ;;  %v19894_v24 = vld [vmem:[%s20437_s3 + $0x20d8] sm:$0xff]  }
 0x404   : > { %18232 = vmatpush3.bf16.msra.mxu0 %v19821_v35  ;;  %v19863_v35 = vld [vmem:[%s20437_s3 + $0x1f98] sm:$0xff]  }
 0x405   : > { %18233 = vmatprep.subr.bf16.mxu0 %v19823_v37  ;;  %18254 = vmatpush3.bf16.msra.mxu1 %v19822_v36  ;;  %v19864_v36 = vld [vmem:[%s20437_s3 + $0x1f60] sm:$0xff]  }
 0x406   : > { %18255 = vmatprep.subr.bf16.mxu1 %v19824_v38  ;;  %v19865_v37 = vld [vmem:[%s20437_s3 + $0x1fe0] sm:$0xff]  }
 0x407   : > { %v19866_v38 = vld [vmem:[%s20437_s3 + $0x1f20] sm:$0xff]  }
 0x408   : > { %18234 = vmatpush3.bf16.msra.mxu0 %v19825_v39  ;;  %v19867_v39 = vld [vmem:[%s20437_s3 + $0x1fa0] sm:$0xff]  }
 0x409   : > { %18235 = vmatprep.subr.bf16.mxu0 %v19827_v41  ;;  %18256 = vmatpush3.bf16.msra.mxu1 %v19826_v40  ;;  %v19868_v40 = vld [vmem:[%s20437_s3 + $0x1f68] sm:$0xff]  }
 0x40a   : > { %18257 = vmatprep.subr.bf16.mxu1 %v19828_v43  ;;  %v19869_v43 = vld [vmem:[%s20437_s3 + $0x1fe8] sm:$0xff]  }
 0x40c   : > { %18236 = vmatpush3.bf16.msra.mxu0 %v19829_v44 }
 0x40d   : > { %18237 = vmatprep.subr.bf16.mxu0 %v19831_v46  ;;  %18258 = vmatpush3.bf16.msra.mxu1 %v19830_v45  ;;  %v19870_v45 = vld [vmem:[%s20437_s3 + $0x1f28] sm:$0xff]  }
 0x40e   : > { %18259 = vmatprep.subr.bf16.mxu1 %v19832_v47 }
 0x410   : > { %18238 = vmatpush3.bf16.msra.mxu0 %v19833_v48 }
 0x411   : > { %18239 = vmatprep.subr.bf16.mxu0 %v19835_v50  ;;  %18260 = vmatpush3.bf16.msra.mxu1 %v19834_v49  ;;  %v19871_v49 = vld [vmem:[%s20437_s3 + $0x1fa8] sm:$0xff]   ;;  %v19872_v50 = vld [vmem:[%s20437_s3 + $0x1f70] sm:$0xff]  }
 0x412   : > { %v17937_v51 = vpop.f32.mrb[92].mxu0  ;;  %18261 = vmatprep.subr.bf16.mxu1 %v19836_v52 }
 0x413   : > { %v17938_v53 = vpop.f32.mrb[93].mxu0  ;;  %v17959_v55 = vpop.f32.mrb[92].mxu1 }
 0x414   : > { %v17939_v56 = vadd.f32 %v17938_v53, %v17937_v51  ;;  %v17940_v57 = vpop.f32.mrb[94].mxu0  ;;  %v17960_v60 = vpop.f32.mrb[93].mxu1  ;;  %18240 = vmatpush3.bf16.msra.mxu0 %v19837_v54 }
 0x415   : > { %v17941_v61 = vpop.f32.mrb[95].mxu0  ;;  %v17961_v63 = vadd.f32 %v17960_v60, %v17959_v55  ;;  %v17962_v0 = vpop.f32.mrb[94].mxu1  ;;  %18241 = vmatprep.subr.bf16.mxu0 %v19839_v59  ;;  %18262 = vmatpush3.bf16.msra.mxu1 %v19838_v58  ;;  %v19874_v58 = vld [vmem:[%s20437_s3 + $0x1f30] sm:$0xff]  }
 0x416   : > { %v13980_v62 = vadd.f32 %v17939_v56, %v21560_v13  ;;  %v17963_v2 = vpop.f32.mrb[95].mxu1  ;;  %18263 = vmatprep.subr.bf16.mxu1 %v19840_v1  ;;  %v19846_v13 = vld [vmem:[%s20437_s3 + $0x1eb8] sm:$0xff]   ;;  %v19873_v56 = vld [vmem:[%s20437_s3 + $0x1ff0] sm:$0xff]  }
 0x417   : > { %v19875_v60 = vld [vmem:[%s20437_s3 + $0x1fb0] sm:$0xff]   ;;  %v19876_v61 = vld [vmem:[%s20437_s3 + $0x1f78] sm:$0xff]  }
 0x418   : > { %v21598_v4 = vadd.f32 %v17961_v63, %v13980_v62  ;;  %18242 = vmatpush3.bf16.msra.mxu0 %v19841_v3  ;;  %v19877_v62 = vld [vmem:[%s20437_s3 + $0x1ff8] sm:$0xff]  }
 0x419   : > { %18243 = vmatprep.subr.bf16.mxu0 %v19843_v6  ;;  %18264 = vmatpush3.bf16.msra.mxu1 %v19842_v5  ;;  %v19878_v63 = vld [vmem:[%s20437_s3 + $0x1f38] sm:$0xff]  }
 0x41a   : > { %18265 = vmatprep.subr.bf16.mxu1 %v19844_v7  ;;  %v250_v0 = vld [vmem:[%s20447_s30 + $0xf8] sm:$0xff]  ;;  %v19882_v7 = vld [vmem:[%s20437_s3 + $0x20c0] sm:$0xff]  }
 0x41b   : > { %v19879_v1 = vld [vmem:[%s20437_s3 + $0x1fb8] sm:$0xff]   ;;  %v837_v2 = vrot.slane %v250_v0, %v20485_v42  ;;  %v830_v3 = vcombine.high %v250_v0, %v250_v0  ;;  %v19916_v0 = vld [vmem:[%s20437_s3 + $0x2100] sm:$0xff]  }
 0x41c   : > { %18244 = vmatpush3.bf16.msra.mxu0 %v19845_v8 }
 0x41d   : > { %18273 = vmatprep.subr.bf16.mxu0 %v19848_v12  ;;  %18266 = vmatpush3.bf16.msra.mxu1 %v19846_v13  ;;  %v845_v5 = vcombine.high %v837_v2, %v837_v2  ;;  %v844_v6 = vrot.slane %v830_v3, %v20485_v42  ;;  %v1309_v8 = vpack.c.bf16 %v837_v2, %v837_v2  ;;  %v19884_v12 = vld [vmem:[%s20437_s3 + $0x2080] sm:$0xff]  }
 0x41e   : > { %18295 = vmatprep.subr.bf16.mxu1 %v19849_v16  ;;  %v19886_v16 = vld [vmem:[%s20437_s3 + $0x20c8] sm:$0xff]   ;;  %v19917_v3 = vld [vmem:[%s20437_s3 + $0x2180] sm:$0xff]  }
 0x41f   : > { %14538 = vmatmul.mubr.bf16.vlgmr.msra.gmra.mrb[120].mxu0 %v1305_v17  ;;  %v1310_v10 = vpack.c.bf16 %v845_v5, %v845_v5  ;;  %v846_v11 = vcombine.high %v844_v6, %v844_v6  ;;  %v1311_v13 = vpack.c.bf16 %v844_v6, %v844_v6  ;;  %v19887_v17 = vld [vmem:[%s20437_s3 + $0x2008] sm:$0xff]  }
 0x420   : > { %18274 = vmatpush3.bf16.msra.mxu0 %v19850_v18  ;;  %14578 = vmatmul.mubr.bf16.vlgmr.msra.gmra.mrb[120].mxu1 %v1307_v22  ;;  %v19888_v18 = vld [vmem:[%s20437_s3 + $0x2088] sm:$0xff]   ;;  %v19892_v22 = vld [vmem:[%s20437_s3 + $0x2090] sm:$0xff]  }
 0x421   : > { %18275 = vmatprep.subr.bf16.mxu0 %v19852_v23  ;;  %18296 = vmatpush3.bf16.msra.mxu1 %v19851_v21  ;;  %v1312_v15 = vpack.c.bf16 %v846_v11, %v846_v11  ;;  %v19891_v21 = vld [vmem:[%s20437_s3 + $0x2010] sm:$0xff]   ;;  %v19893_v23 = vld [vmem:[%s20437_s3 + $0x2058] sm:$0xff]   ;;  %v19918_v5 = vld [vmem:[%s20437_s3 + $0x2148] sm:$0xff]  }
 0x422   : > { %18297 = vmatprep.subr.bf16.mxu1 %v19853_v25  ;;  %14617 = vmatprep.mubr.bf16.mxu0 %v1310_v10  ;;  %v19895_v25 = vld [vmem:[%s20437_s3 + $0x2018] sm:$0xff]   ;;  %v19922_v10 = vld [vmem:[%s20437_s3 + $0x2150] sm:$0xff]  }
 0x423   : > { %14657 = vmatprep.mubr.bf16.mxu1 %v1312_v15  ;;  %v19923_v11 = vld [vmem:[%s20437_s3 + $0x21d0] sm:$0xff]   ;;  %v19927_v15 = vld [vmem:[%s20437_s3 + $0x21d8] sm:$0xff]  }
 0x424   : > { %18276 = vmatpush3.bf16.msra.mxu0 %v19854_v26  ;;  %v19896_v26 = vld [vmem:[%s20437_s3 + $0x2098] sm:$0xff]  }
 0x425   : > { %18277 = vmatprep.subr.bf16.mxu0 %v19856_v28  ;;  %18298 = vmatpush3.bf16.msra.mxu1 %v19855_v27  ;;  %v19897_v27 = vld [vmem:[%s20437_s3 + $0x2060] sm:$0xff]  }
 0x426   : > { %18299 = vmatprep.subr.bf16.mxu1 %v19857_v29  ;;  %v19898_v28 = vld [vmem:[%s20437_s3 + $0x20e0] sm:$0xff]  }
 0x427   : > { %v19899_v29 = vld [vmem:[%s20437_s3 + $0x2020] sm:$0xff]  }
 0x428   : > { %18278 = vmatpush3.bf16.msra.mxu0 %v19858_v30  ;;  %v19900_v30 = vld [vmem:[%s20437_s3 + $0x20a0] sm:$0xff]  }
 0x429   : > { %18279 = vmatprep.subr.bf16.mxu0 %v19860_v32  ;;  %18300 = vmatpush3.bf16.msra.mxu1 %v19859_v31  ;;  %v19901_v31 = vld [vmem:[%s20437_s3 + $0x2068] sm:$0xff]  }
 0x42a   : > { %18301 = vmatprep.subr.bf16.mxu1 %v19861_v33  ;;  %v19902_v33 = vld [vmem:[%s20437_s3 + $0x20e8] sm:$0xff]  }
 0x42c   : > { %18280 = vmatpush3.bf16.msra.mxu0 %v19862_v34 }
 0x42d   : > { %18281 = vmatprep.subr.bf16.mxu0 %v19864_v36  ;;  %18302 = vmatpush3.bf16.msra.mxu1 %v19863_v35  ;;  %v19903_v35 = vld [vmem:[%s20437_s3 + $0x2028] sm:$0xff]  }
 0x42e   : > { %18303 = vmatprep.subr.bf16.mxu1 %v19865_v37 }
 0x430   : > { %18282 = vmatpush3.bf16.msra.mxu0 %v19866_v38 }
 0x431   : > { %18283 = vmatprep.subr.bf16.mxu0 %v19868_v40  ;;  %18304 = vmatpush3.bf16.msra.mxu1 %v19867_v39  ;;  %v19904_v40 = vld [vmem:[%s20437_s3 + $0x20a8] sm:$0xff]  }
 0x432   : > { %v17981_v41 = vpop.f32.mrb[96].mxu0  ;;  %18305 = vmatprep.subr.bf16.mxu1 %v19869_v43  ;;  %v19905_v43 = vld [vmem:[%s20437_s3 + $0x2070] sm:$0xff]  }
 0x433   : > { %v17982_v44 = vpop.f32.mrb[97].mxu0  ;;  %v18003_v46 = vpop.f32.mrb[96].mxu1 }
 0x434   : > { %v17983_v47 = vadd.f32 %v17982_v44, %v17981_v41  ;;  %v17984_v48 = vpop.f32.mrb[98].mxu0  ;;  %v18004_v51 = vpop.f32.mrb[97].mxu1  ;;  %18284 = vmatpush3.bf16.msra.mxu0 %v19870_v45 }
 0x435   : > { %v17985_v52 = vpop.f32.mrb[99].mxu0  ;;  %v18005_v54 = vadd.f32 %v18004_v51, %v18003_v46  ;;  %v18006_v55 = vpop.f32.mrb[98].mxu1  ;;  %18285 = vmatprep.subr.bf16.mxu0 %v19872_v50  ;;  %18306 = vmatpush3.bf16.msra.mxu1 %v19871_v49  ;;  %v19907_v49 = vld [vmem:[%s20437_s3 + $0x2030] sm:$0xff]   ;;  %v19909_v51 = vld [vmem:[%s20437_s3 + $0x2078] sm:$0xff]  }
 0x436   : > { %v14060_v53 = vadd.f32 %v17983_v47, %v21598_v4  ;;  %v18007_v57 = vpop.f32.mrb[99].mxu1  ;;  %18307 = vmatprep.subr.bf16.mxu1 %v19873_v56  ;;  %v19881_v4 = vld [vmem:[%s20437_s3 + $0x2040] sm:$0xff]   ;;  %v19906_v47 = vld [vmem:[%s20437_s3 + $0x20f0] sm:$0xff]  }
 0x437   : > { %v19908_v52 = vld [vmem:[%s20437_s3 + $0x20b0] sm:$0xff]   ;;  %v251_v55 = vld [vmem:[%s20447_s30 + $0x100] sm:$0xff] }
 0x438   : > { %v21636_v59 = vadd.f32 %v18005_v54, %v14060_v53  ;;  %18286 = vmatpush3.bf16.msra.mxu0 %v19874_v58  ;;  %v19910_v53 = vld [vmem:[%s20437_s3 + $0x20f8] sm:$0xff]   ;;  %v854_v56 = vrot.slane %v251_v55, %v20485_v42  ;;  %v847_v57 = vcombine.high %v251_v55, %v251_v55  ;;  %v19914_v58 = vld [vmem:[%s20437_s3 + $0x2140] sm:$0xff]  }
 0x439   : > { %18287 = vmatprep.subr.bf16.mxu0 %v19876_v61  ;;  %18308 = vmatpush3.bf16.msra.mxu1 %v19875_v60  ;;  %v19911_v54 = vld [vmem:[%s20437_s3 + $0x2038] sm:$0xff]   ;;  %v19949_v55 = vld [vmem:[%s20437_s3 + $0x2200] sm:$0xff]  }
 0x43a   : > { %18309 = vmatprep.subr.bf16.mxu1 %v19877_v62  ;;  %v862_v60 = vcombine.high %v854_v56, %v854_v56  ;;  %v861_v61 = vrot.slane %v847_v57, %v20485_v42  ;;  %v19915_v62 = vld [vmem:[%s20437_s3 + $0x21c0] sm:$0xff]  }
 0x43c   : > { %18288 = vmatpush3.bf16.msra.mxu0 %v19878_v63  ;;  %v1313_v63 = vpack.c.bf16 %v854_v56, %v854_v56  ;;  %v863_v2 = vcombine.high %v861_v61, %v861_v61 }
 0x43d   : > { %18317 = vmatprep.subr.bf16.mxu0 %v19881_v4  ;;  %18310 = vmatpush3.bf16.msra.mxu1 %v19879_v1  ;;  %v1314_v1 = vpack.c.bf16 %v862_v60, %v862_v60  ;;  %v1315_v4 = vpack.c.bf16 %v861_v61, %v861_v61  ;;  %v19951_v60 = vld [vmem:[%s20437_s3 + $0x2248] sm:$0xff]  }
 0x43e   : > { %18339 = vmatprep.subr.bf16.mxu1 %v19882_v7  ;;  %v1316_v6 = vpack.c.bf16 %v863_v2, %v863_v2  ;;  %v19919_v7 = vld [vmem:[%s20437_s3 + $0x21c8] sm:$0xff]   ;;  %v19956_v2 = vld [vmem:[%s20437_s3 + $0x22d0] sm:$0xff]  }
 0x43f   : > { %14618 = vmatmul.mubr.bf16.vlgmr.msra.gmra.mrb[124].mxu0 %v1309_v8  ;;  %v19920_v8 = vld [vmem:[%s20437_s3 + $0x2108] sm:$0xff]  }
 0x440   : > { %18318 = vmatpush3.bf16.msra.mxu0 %v19883_v9  ;;  %14658 = vmatmul.mubr.bf16.vlgmr.msra.gmra.mrb[124].mxu1 %v1311_v13  ;;  %v19921_v9 = vld [vmem:[%s20437_s3 + $0x2188] sm:$0xff]   ;;  %v19925_v13 = vld [vmem:[%s20437_s3 + $0x2190] sm:$0xff]  }
 0x441   : > { %18319 = vmatprep.subr.bf16.mxu0 %v19885_v14  ;;  %18340 = vmatpush3.bf16.msra.mxu1 %v19884_v12  ;;  %v19924_v12 = vld [vmem:[%s20437_s3 + $0x2110] sm:$0xff]   ;;  %v19926_v14 = vld [vmem:[%s20437_s3 + $0x2158] sm:$0xff]  }
 0x442   : > { %18341 = vmatprep.subr.bf16.mxu1 %v19886_v16  ;;  %14697 = vmatprep.mubr.bf16.mxu0 %v1314_v1  ;;  %v19928_v16 = vld [vmem:[%s20437_s3 + $0x2118] sm:$0xff]   ;;  %v19955_v1 = vld [vmem:[%s20437_s3 + $0x2250] sm:$0xff]  }
 0x443   : > { %14737 = vmatprep.mubr.bf16.mxu1 %v1316_v6  ;;  %v19960_v6 = vld [vmem:[%s20437_s3 + $0x22d8] sm:$0xff]  }
 0x444   : > { %18320 = vmatpush3.bf16.msra.mxu0 %v19887_v17  ;;  %v19929_v17 = vld [vmem:[%s20437_s3 + $0x2198] sm:$0xff]  }
 0x445   : > { %18321 = vmatprep.subr.bf16.mxu0 %v19889_v19  ;;  %18342 = vmatpush3.bf16.msra.mxu1 %v19888_v18  ;;  %v19930_v18 = vld [vmem:[%s20437_s3 + $0x2160] sm:$0xff]  }
 0x446   : > { %18343 = vmatprep.subr.bf16.mxu1 %v19890_v20  ;;  %v19931_v19 = vld [vmem:[%s20437_s3 + $0x21e0] sm:$0xff]  }
 0x447   : > { %v19932_v20 = vld [vmem:[%s20437_s3 + $0x2120] sm:$0xff]  }
 0x448   : > { %18322 = vmatpush3.bf16.msra.mxu0 %v19891_v21  ;;  %v19933_v21 = vld [vmem:[%s20437_s3 + $0x21a0] sm:$0xff]  }
 0x449   : > { %18323 = vmatprep.subr.bf16.mxu0 %v19893_v23  ;;  %18344 = vmatpush3.bf16.msra.mxu1 %v19892_v22  ;;  %v19934_v22 = vld [vmem:[%s20437_s3 + $0x2168] sm:$0xff]  }
 0x44a   : > { %18345 = vmatprep.subr.bf16.mxu1 %v19894_v24  ;;  %v19935_v24 = vld [vmem:[%s20437_s3 + $0x21e8] sm:$0xff]  }
 0x44c   : > { %18324 = vmatpush3.bf16.msra.mxu0 %v19895_v25 }
 0x44d   : > { %18325 = vmatprep.subr.bf16.mxu0 %v19897_v27  ;;  %18346 = vmatpush3.bf16.msra.mxu1 %v19896_v26  ;;  %v19936_v26 = vld [vmem:[%s20437_s3 + $0x2128] sm:$0xff]  }
 0x44e   : > { %18347 = vmatprep.subr.bf16.mxu1 %v19898_v28 }
 0x450   : > { %18326 = vmatpush3.bf16.msra.mxu0 %v19899_v29 }
 0x451   : > { %18327 = vmatprep.subr.bf16.mxu0 %v19901_v31  ;;  %18348 = vmatpush3.bf16.msra.mxu1 %v19900_v30  ;;  %v19937_v30 = vld [vmem:[%s20437_s3 + $0x21a8] sm:$0xff]   ;;  %v19938_v31 = vld [vmem:[%s20437_s3 + $0x2170] sm:$0xff]  }
 0x452   : > { %v18025_v32 = vpop.f32.mrb[100].mxu0  ;;  %18349 = vmatprep.subr.bf16.mxu1 %v19902_v33 }
 0x453   : > { %v18026_v34 = vpop.f32.mrb[101].mxu0  ;;  %v18047_v36 = vpop.f32.mrb[100].mxu1 }
 0x454   : > { %v18027_v37 = vadd.f32 %v18026_v34, %v18025_v32  ;;  %v18028_v38 = vpop.f32.mrb[102].mxu0  ;;  %v18048_v39 = vpop.f32.mrb[101].mxu1  ;;  %18328 = vmatpush3.bf16.msra.mxu0 %v19903_v35 }
 0x455   : > { %v18029_v41 = vpop.f32.mrb[103].mxu0  ;;  %v18049_v45 = vadd.f32 %v18048_v39, %v18047_v36  ;;  %v18050_v46 = vpop.f32.mrb[102].mxu1  ;;  %18329 = vmatprep.subr.bf16.mxu0 %v19905_v43  ;;  %18350 = vmatpush3.bf16.msra.mxu1 %v19904_v40  ;;  %v19940_v39 = vld [vmem:[%s20437_s3 + $0x2130] sm:$0xff]   ;;  %v19942_v43 = vld [vmem:[%s20437_s3 + $0x2178] sm:$0xff]  }
 0x456   : > { %v14140_v44 = vadd.f32 %v18027_v37, %v21636_v59  ;;  %v18051_v48 = vpop.f32.mrb[103].mxu1  ;;  %18351 = vmatprep.subr.bf16.mxu1 %v19906_v47  ;;  %v19912_v59 = vld [vmem:[%s20437_s3 + $0x20b8] sm:$0xff]   ;;  %v19939_v37 = vld [vmem:[%s20437_s3 + $0x21f0] sm:$0xff]   ;;  %v252_v46 = vld [vmem:[%s20447_s30 + $0x108] sm:$0xff] }
 0x457   : > { %v19941_v41 = vld [vmem:[%s20437_s3 + $0x21b0] sm:$0xff]   ;;  %v871_v47 = vrot.slane %v252_v46, %v20485_v42  ;;  %v864_v48 = vcombine.high %v252_v46, %v252_v46  ;;  %v19982_v46 = vld [vmem:[%s20437_s3 + $0x2300] sm:$0xff]  }
 0x458   : > { %v21674_v50 = vadd.f32 %v18049_v45, %v14140_v44  ;;  %18330 = vmatpush3.bf16.msra.mxu0 %v19907_v49  ;;  %v19943_v44 = vld [vmem:[%s20437_s3 + $0x21f8] sm:$0xff]   ;;  %v19947_v49 = vld [vmem:[%s20437_s3 + $0x2240] sm:$0xff]  }
 0x459   : > { %18331 = vmatprep.subr.bf16.mxu0 %v19909_v51  ;;  %18352 = vmatpush3.bf16.msra.mxu1 %v19908_v52  ;;  %v19944_v45 = vld [vmem:[%s20437_s3 + $0x2138] sm:$0xff]   ;;  %v879_v51 = vcombine.high %v871_v47, %v871_v47  ;;  %v878_v52 = vrot.slane %v864_v48, %v20485_v42 }
 0x45a   : > { %18353 = vmatprep.subr.bf16.mxu1 %v19910_v53  ;;  %v19948_v53 = vld [vmem:[%s20437_s3 + $0x22c0] sm:$0xff]  }
 0x45b   : > { %v1318_v56 = vpack.c.bf16 %v879_v51, %v879_v51  ;;  %v880_v57 = vcombine.high %v878_v52, %v878_v52  ;;  %v19984_v51 = vld [vmem:[%s20437_s3 + $0x2348] sm:$0xff]  }
 0x45c   : > { %18332 = vmatpush3.bf16.msra.mxu0 %v19911_v54  ;;  %v1317_v54 = vpack.c.bf16 %v871_v47, %v871_v47 }
 0x45d   : > { %18361 = vmatprep.subr.bf16.mxu0 %v19914_v58  ;;  %18354 = vmatpush3.bf16.msra.mxu1 %v19912_v59  ;;  %v19950_v58 = vld [vmem:[%s20437_s3 + $0x2280] sm:$0xff]   ;;  %v1319_v59 = vpack.c.bf16 %v878_v52, %v878_v52  ;;  %v1320_v61 = vpack.c.bf16 %v880_v57, %v880_v57  ;;  %v19989_v57 = vld [vmem:[%s20437_s3 + $0x23d0] sm:$0xff]  }
 0x45e   : > { %18383 = vmatprep.subr.bf16.mxu1 %v19915_v62  ;;  %v19952_v62 = vld [vmem:[%s20437_s3 + $0x22c8] sm:$0xff]  }
 0x45f   : > { %14698 = vmatmul.mubr.bf16.vlgmr.msra.gmra.mrb[128].mxu0 %v1313_v63  ;;  %v19953_v63 = vld [vmem:[%s20437_s3 + $0x2208] sm:$0xff]  }
 0x460   : > { %18362 = vmatpush3.bf16.msra.mxu0 %v19916_v0  ;;  %14738 = vmatmul.mubr.bf16.vlgmr.msra.gmra.mrb[128].mxu1 %v1315_v4  ;;  %v19954_v0 = vld [vmem:[%s20437_s3 + $0x2288] sm:$0xff]   ;;  %v19958_v4 = vld [vmem:[%s20437_s3 + $0x2290] sm:$0xff]  }
 0x461   : > { %18363 = vmatprep.subr.bf16.mxu0 %v19918_v5  ;;  %18384 = vmatpush3.bf16.msra.mxu1 %v19917_v3  ;;  %v19957_v3 = vld [vmem:[%s20437_s3 + $0x2210] sm:$0xff]   ;;  %v19959_v5 = vld [vmem:[%s20437_s3 + $0x2258] sm:$0xff]  }
 0x462   : > { %18385 = vmatprep.subr.bf16.mxu1 %v19919_v7  ;;  %14777 = vmatprep.mubr.bf16.mxu0 %v1318_v56  ;;  %v19961_v7 = vld [vmem:[%s20437_s3 + $0x2218] sm:$0xff]   ;;  %v19988_v56 = vld [vmem:[%s20437_s3 + $0x2350] sm:$0xff]  }
 0x463   : > { %14817 = vmatprep.mubr.bf16.mxu1 %v1320_v61  ;;  %v19993_v61 = vld [vmem:[%s20437_s3 + $0x23d8] sm:$0xff]  }
 0x464   : > { %18364 = vmatpush3.bf16.msra.mxu0 %v19920_v8  ;;  %v19962_v8 = vld [vmem:[%s20437_s3 + $0x2298] sm:$0xff]  }
 0x465   : > { %18365 = vmatprep.subr.bf16.mxu0 %v19922_v10  ;;  %18386 = vmatpush3.bf16.msra.mxu1 %v19921_v9  ;;  %v19963_v9 = vld [vmem:[%s20437_s3 + $0x2260] sm:$0xff]  }
 0x466   : > { %18387 = vmatprep.subr.bf16.mxu1 %v19923_v11  ;;  %v19964_v10 = vld [vmem:[%s20437_s3 + $0x22e0] sm:$0xff]  }
 0x467   : > { %v19965_v11 = vld [vmem:[%s20437_s3 + $0x2220] sm:$0xff]  }
 0x468   : > { %18366 = vmatpush3.bf16.msra.mxu0 %v19924_v12  ;;  %v19966_v12 = vld [vmem:[%s20437_s3 + $0x22a0] sm:$0xff]  }
 0x469   : > { %18367 = vmatprep.subr.bf16.mxu0 %v19926_v14  ;;  %18388 = vmatpush3.bf16.msra.mxu1 %v19925_v13  ;;  %v19967_v13 = vld [vmem:[%s20437_s3 + $0x2268] sm:$0xff]  }
 0x46a   : > { %18389 = vmatprep.subr.bf16.mxu1 %v19927_v15  ;;  %v19968_v15 = vld [vmem:[%s20437_s3 + $0x22e8] sm:$0xff]  }
 0x46c   : > { %18368 = vmatpush3.bf16.msra.mxu0 %v19928_v16 }
 0x46d   : > { %18369 = vmatprep.subr.bf16.mxu0 %v19930_v18  ;;  %18390 = vmatpush3.bf16.msra.mxu1 %v19929_v17  ;;  %v19969_v17 = vld [vmem:[%s20437_s3 + $0x2228] sm:$0xff]  }
 0x46e   : > { %18391 = vmatprep.subr.bf16.mxu1 %v19931_v19 }
 0x470   : > { %18370 = vmatpush3.bf16.msra.mxu0 %v19932_v20 }
 0x471   : > { %18371 = vmatprep.subr.bf16.mxu0 %v19934_v22  ;;  %18392 = vmatpush3.bf16.msra.mxu1 %v19933_v21  ;;  %v19970_v21 = vld [vmem:[%s20437_s3 + $0x22a8] sm:$0xff]   ;;  %v19971_v22 = vld [vmem:[%s20437_s3 + $0x2270] sm:$0xff]  }
 0x472   : > { %v18069_v23 = vpop.f32.mrb[104].mxu0  ;;  %18393 = vmatprep.subr.bf16.mxu1 %v19935_v24 }
 0x473   : > { %v18070_v25 = vpop.f32.mrb[105].mxu0  ;;  %v18091_v27 = vpop.f32.mrb[104].mxu1 }
 0x474   : > { %v18071_v28 = vadd.f32 %v18070_v25, %v18069_v23  ;;  %v18072_v29 = vpop.f32.mrb[106].mxu0  ;;  %v18092_v32 = vpop.f32.mrb[105].mxu1  ;;  %18372 = vmatpush3.bf16.msra.mxu0 %v19936_v26 }
 0x475   : > { %v18073_v33 = vpop.f32.mrb[107].mxu0  ;;  %v18093_v35 = vadd.f32 %v18092_v32, %v18091_v27  ;;  %v18094_v36 = vpop.f32.mrb[106].mxu1  ;;  %18373 = vmatprep.subr.bf16.mxu0 %v19938_v31  ;;  %18394 = vmatpush3.bf16.msra.mxu1 %v19937_v30  ;;  %v19973_v30 = vld [vmem:[%s20437_s3 + $0x2230] sm:$0xff]  }
 0x476   : > { %v14220_v34 = vadd.f32 %v18071_v28, %v21674_v50  ;;  %v18095_v38 = vpop.f32.mrb[107].mxu1  ;;  %18395 = vmatprep.subr.bf16.mxu1 %v19939_v37  ;;  %v19945_v50 = vld [vmem:[%s20437_s3 + $0x21b8] sm:$0xff]   ;;  %v19972_v28 = vld [vmem:[%s20437_s3 + $0x22f0] sm:$0xff]  }
 0x477   : > { %v19974_v32 = vld [vmem:[%s20437_s3 + $0x22b0] sm:$0xff]   ;;  %v19975_v33 = vld [vmem:[%s20437_s3 + $0x2278] sm:$0xff]  }
 0x478   : > { %v21712_v40 = vadd.f32 %v18093_v35, %v14220_v34  ;;  %18374 = vmatpush3.bf16.msra.mxu0 %v19940_v39  ;;  %v19976_v34 = vld [vmem:[%s20437_s3 + $0x22f8] sm:$0xff]   ;;  %v253_v36 = vld [vmem:[%s20447_s30 + $0x110] sm:$0xff] }
 0x479   : > { %18375 = vmatprep.subr.bf16.mxu0 %v19942_v43  ;;  %18396 = vmatpush3.bf16.msra.mxu1 %v19941_v41  ;;  %v19977_v35 = vld [vmem:[%s20437_s3 + $0x2238] sm:$0xff]   ;;  %v888_v38 = vrot.slane %v253_v36, %v20485_v42  ;;  %v881_v39 = vcombine.high %v253_v36, %v253_v36  ;;  %v20015_v36 = vld [vmem:[%s20437_s3 + $0x2400] sm:$0xff]  }
 0x47a   : > { %18397 = vmatprep.subr.bf16.mxu1 %v19943_v44  ;;  %v19978_v37 = vld [vmem:[%s20437_s3 + $0x22b8] sm:$0xff]   ;;  %v19981_v44 = vld [vmem:[%s20437_s3 + $0x23c0] sm:$0xff]  }
 0x47b   : > { %v896_v41 = vcombine.high %v888_v38, %v888_v38  ;;  %v895_v43 = vrot.slane %v881_v39, %v20485_v42  ;;  %v20016_v39 = vld [vmem:[%s20437_s3 + $0x2480] sm:$0xff]  }
 0x47c   : > { %18376 = vmatpush3.bf16.msra.mxu0 %v19944_v45  ;;  %v1321_v45 = vpack.c.bf16 %v888_v38, %v888_v38 }
 0x47d   : > { %18405 = vmatprep.subr.bf16.mxu0 %v19947_v49  ;;  %18398 = vmatpush3.bf16.msra.mxu1 %v19945_v50  ;;  %v1322_v47 = vpack.c.bf16 %v896_v41, %v896_v41  ;;  %v897_v48 = vcombine.high %v895_v43, %v895_v43  ;;  %v19983_v49 = vld [vmem:[%s20437_s3 + $0x2380] sm:$0xff]   ;;  %v1323_v50 = vpack.c.bf16 %v895_v43, %v895_v43  ;;  %v20017_v41 = vld [vmem:[%s20437_s3 + $0x2448] sm:$0xff]  }
 0x47e   : > { %18427 = vmatprep.subr.bf16.mxu1 %v19948_v53  ;;  %v19985_v53 = vld [vmem:[%s20437_s3 + $0x23c8] sm:$0xff]  }
 0x47f   : > { %14778 = vmatmul.mubr.bf16.vlgmr.msra.gmra.mrb[132].mxu0 %v1317_v54  ;;  %v1324_v52 = vpack.c.bf16 %v897_v48, %v897_v48  ;;  %v19986_v54 = vld [vmem:[%s20437_s3 + $0x2308] sm:$0xff]   ;;  %v20022_v48 = vld [vmem:[%s20437_s3 + $0x24d0] sm:$0xff]  }
 0x480   : > { %18406 = vmatpush3.bf16.msra.mxu0 %v19949_v55  ;;  %14818 = vmatmul.mubr.bf16.vlgmr.msra.gmra.mrb[132].mxu1 %v1319_v59  ;;  %v19987_v55 = vld [vmem:[%s20437_s3 + $0x2388] sm:$0xff]   ;;  %v19991_v59 = vld [vmem:[%s20437_s3 + $0x2390] sm:$0xff]  }
 0x481   : > { %18407 = vmatprep.subr.bf16.mxu0 %v19951_v60  ;;  %18428 = vmatpush3.bf16.msra.mxu1 %v19950_v58  ;;  %v19990_v58 = vld [vmem:[%s20437_s3 + $0x2310] sm:$0xff]   ;;  %v19992_v60 = vld [vmem:[%s20437_s3 + $0x2358] sm:$0xff]  }
 0x482   : > { %18429 = vmatprep.subr.bf16.mxu1 %v19952_v62  ;;  %14857 = vmatprep.mubr.bf16.mxu0 %v1322_v47  ;;  %v19994_v62 = vld [vmem:[%s20437_s3 + $0x2318] sm:$0xff]   ;;  %v20021_v47 = vld [vmem:[%s20437_s3 + $0x2450] sm:$0xff]  }
 0x483   : > { %14897 = vmatprep.mubr.bf16.mxu1 %v1324_v52  ;;  %v20026_v52 = vld [vmem:[%s20437_s3 + $0x24d8] sm:$0xff]  }
 0x484   : > { %18408 = vmatpush3.bf16.msra.mxu0 %v19953_v63  ;;  %v19995_v63 = vld [vmem:[%s20437_s3 + $0x2398] sm:$0xff]  }
 0x485   : > { %18409 = vmatprep.subr.bf16.mxu0 %v19955_v1  ;;  %18430 = vmatpush3.bf16.msra.mxu1 %v19954_v0  ;;  %v19996_v0 = vld [vmem:[%s20437_s3 + $0x2360] sm:$0xff]  }
 0x486   : > { %18431 = vmatprep.subr.bf16.mxu1 %v19956_v2  ;;  %v19997_v1 = vld [vmem:[%s20437_s3 + $0x23e0] sm:$0xff]  }
 0x487   : > { %v19998_v2 = vld [vmem:[%s20437_s3 + $0x2320] sm:$0xff]  }
 0x488   : > { %18410 = vmatpush3.bf16.msra.mxu0 %v19957_v3  ;;  %v19999_v3 = vld [vmem:[%s20437_s3 + $0x23a0] sm:$0xff]  }
 0x489   : > { %18411 = vmatprep.subr.bf16.mxu0 %v19959_v5  ;;  %18432 = vmatpush3.bf16.msra.mxu1 %v19958_v4  ;;  %v20000_v4 = vld [vmem:[%s20437_s3 + $0x2368] sm:$0xff]  }
 0x48a   : > { %18433 = vmatprep.subr.bf16.mxu1 %v19960_v6  ;;  %v20001_v6 = vld [vmem:[%s20437_s3 + $0x23e8] sm:$0xff]  }
 0x48c   : > { %18412 = vmatpush3.bf16.msra.mxu0 %v19961_v7 }
 0x48d   : > { %18413 = vmatprep.subr.bf16.mxu0 %v19963_v9  ;;  %18434 = vmatpush3.bf16.msra.mxu1 %v19962_v8  ;;  %v20002_v8 = vld [vmem:[%s20437_s3 + $0x2328] sm:$0xff]  }
 0x48e   : > { %18435 = vmatprep.subr.bf16.mxu1 %v19964_v10 }
 0x490   : > { %18414 = vmatpush3.bf16.msra.mxu0 %v19965_v11 }
 0x491   : > { %18415 = vmatprep.subr.bf16.mxu0 %v19967_v13  ;;  %18436 = vmatpush3.bf16.msra.mxu1 %v19966_v12  ;;  %v20003_v13 = vld [vmem:[%s20437_s3 + $0x23a8] sm:$0xff]  }
 0x492   : > { %v18113_v14 = vpop.f32.mrb[108].mxu0  ;;  %18437 = vmatprep.subr.bf16.mxu1 %v19968_v15  ;;  %v20004_v15 = vld [vmem:[%s20437_s3 + $0x2370] sm:$0xff]  }
 0x493   : > { %v18114_v16 = vpop.f32.mrb[109].mxu0  ;;  %v18135_v18 = vpop.f32.mrb[108].mxu1 }
 0x494   : > { %v18115_v19 = vadd.f32 %v18114_v16, %v18113_v14  ;;  %v18116_v20 = vpop.f32.mrb[110].mxu0  ;;  %v18136_v23 = vpop.f32.mrb[109].mxu1  ;;  %18416 = vmatpush3.bf16.msra.mxu0 %v19969_v17 }
 0x495   : > { %v18117_v24 = vpop.f32.mrb[111].mxu0  ;;  %v18137_v26 = vadd.f32 %v18136_v23, %v18135_v18  ;;  %v18138_v27 = vpop.f32.mrb[110].mxu1  ;;  %18417 = vmatprep.subr.bf16.mxu0 %v19971_v22  ;;  %18438 = vmatpush3.bf16.msra.mxu1 %v19970_v21  ;;  %v20006_v21 = vld [vmem:[%s20437_s3 + $0x2330] sm:$0xff]   ;;  %v20008_v23 = vld [vmem:[%s20437_s3 + $0x2378] sm:$0xff]  }
 0x496   : > { %v14300_v25 = vadd.f32 %v18115_v19, %v21712_v40  ;;  %v18139_v29 = vpop.f32.mrb[111].mxu1  ;;  %18439 = vmatprep.subr.bf16.mxu1 %v19972_v28  ;;  %v19980_v40 = vld [vmem:[%s20437_s3 + $0x2340] sm:$0xff]   ;;  %v20005_v19 = vld [vmem:[%s20437_s3 + $0x23f0] sm:$0xff]   ;;  %v254_v27 = vld [vmem:[%s20447_s30 + $0x118] sm:$0xff] }
 0x497   : > { %v20007_v24 = vld [vmem:[%s20437_s3 + $0x23b0] sm:$0xff]   ;;  %v905_v28 = vrot.slane %v254_v27, %v20485_v42  ;;  %v898_v29 = vcombine.high %v254_v27, %v254_v27  ;;  %v20048_v27 = vld [vmem:[%s20437_s3 + $0x2500] sm:$0xff]  }
 0x498   : > { %v21750_v31 = vadd.f32 %v18137_v26, %v14300_v25  ;;  %18418 = vmatpush3.bf16.msra.mxu0 %v19973_v30  ;;  %v20009_v25 = vld [vmem:[%s20437_s3 + $0x23f8] sm:$0xff]   ;;  %v20013_v30 = vld [vmem:[%s20437_s3 + $0x2440] sm:$0xff]  }
 0x499   : > { %18419 = vmatprep.subr.bf16.mxu0 %v19975_v33  ;;  %18440 = vmatpush3.bf16.msra.mxu1 %v19974_v32  ;;  %v20010_v26 = vld [vmem:[%s20437_s3 + $0x2338] sm:$0xff]   ;;  %v913_v32 = vcombine.high %v905_v28, %v905_v28  ;;  %v912_v33 = vrot.slane %v898_v29, %v20485_v42 }
 0x49a   : > { %18441 = vmatprep.subr.bf16.mxu1 %v19976_v34  ;;  %v20014_v34 = vld [vmem:[%s20437_s3 + $0x24c0] sm:$0xff]  }
 0x49b   : > { %v914_v38 = vcombine.high %v912_v33, %v912_v33 }
 0x49c   : > { %18420 = vmatpush3.bf16.msra.mxu0 %v19977_v35  ;;  %v1325_v35 = vpack.c.bf16 %v905_v28, %v905_v28 }
 0x49d   : > { %18449 = vmatprep.subr.bf16.mxu0 %v19980_v40  ;;  %18442 = vmatpush3.bf16.msra.mxu1 %v19978_v37  ;;  %v1326_v37 = vpack.c.bf16 %v913_v32, %v913_v32  ;;  %v1327_v40 = vpack.c.bf16 %v912_v33, %v912_v33  ;;  %v1328_v43 = vpack.c.bf16 %v914_v38, %v914_v38  ;;  %v20050_v32 = vld [vmem:[%s20437_s3 + $0x2548] sm:$0xff]   ;;  %v20055_v38 = vld [vmem:[%s20437_s3 + $0x25d0] sm:$0xff]  }
 0x49e   : > { %18471 = vmatprep.subr.bf16.mxu1 %v19981_v44  ;;  %v20018_v44 = vld [vmem:[%s20437_s3 + $0x24c8] sm:$0xff]  }
 0x49f   : > { %14858 = vmatmul.mubr.bf16.vlgmr.msra.gmra.mrb[136].mxu0 %v1321_v45  ;;  %v20019_v45 = vld [vmem:[%s20437_s3 + $0x2408] sm:$0xff]  }
 0x4a0   : > { %18450 = vmatpush3.bf16.msra.mxu0 %v19982_v46  ;;  %14898 = vmatmul.mubr.bf16.vlgmr.msra.gmra.mrb[136].mxu1 %v1323_v50  ;;  %v20020_v46 = vld [vmem:[%s20437_s3 + $0x2488] sm:$0xff]   ;;  %v20024_v50 = vld [vmem:[%s20437_s3 + $0x2490] sm:$0xff]  }
 0x4a1   : > { %18451 = vmatprep.subr.bf16.mxu0 %v19984_v51  ;;  %18472 = vmatpush3.bf16.msra.mxu1 %v19983_v49  ;;  %v20023_v49 = vld [vmem:[%s20437_s3 + $0x2410] sm:$0xff]   ;;  %v20025_v51 = vld [vmem:[%s20437_s3 + $0x2458] sm:$0xff]  }
 0x4a2   : > { %18473 = vmatprep.subr.bf16.mxu1 %v19985_v53  ;;  %14937 = vmatprep.mubr.bf16.mxu0 %v1326_v37  ;;  %v20027_v53 = vld [vmem:[%s20437_s3 + $0x2418] sm:$0xff]   ;;  %v20054_v37 = vld [vmem:[%s20437_s3 + $0x2550] sm:$0xff]  }
 0x4a3   : > { %14977 = vmatprep.mubr.bf16.mxu1 %v1328_v43  ;;  %v20059_v43 = vld [vmem:[%s20437_s3 + $0x25d8] sm:$0xff]  }
 0x4a4   : > { %18452 = vmatpush3.bf16.msra.mxu0 %v19986_v54  ;;  %v20028_v54 = vld [vmem:[%s20437_s3 + $0x2498] sm:$0xff]  }
 0x4a5   : > { %18453 = vmatprep.subr.bf16.mxu0 %v19988_v56  ;;  %18474 = vmatpush3.bf16.msra.mxu1 %v19987_v55  ;;  %v20029_v55 = vld [vmem:[%s20437_s3 + $0x2460] sm:$0xff]  }
 0x4a6   : > { %18475 = vmatprep.subr.bf16.mxu1 %v19989_v57  ;;  %v20030_v56 = vld [vmem:[%s20437_s3 + $0x24e0] sm:$0xff]  }
 0x4a7   : > { %v20031_v57 = vld [vmem:[%s20437_s3 + $0x2420] sm:$0xff]  }
 0x4a8   : > { %18454 = vmatpush3.bf16.msra.mxu0 %v19990_v58  ;;  %v20032_v58 = vld [vmem:[%s20437_s3 + $0x24a0] sm:$0xff]  }
 0x4a9   : > { %18455 = vmatprep.subr.bf16.mxu0 %v19992_v60  ;;  %18476 = vmatpush3.bf16.msra.mxu1 %v19991_v59  ;;  %v20033_v59 = vld [vmem:[%s20437_s3 + $0x2468] sm:$0xff]  }
 0x4aa   : > { %18477 = vmatprep.subr.bf16.mxu1 %v19993_v61  ;;  %v20034_v61 = vld [vmem:[%s20437_s3 + $0x24e8] sm:$0xff]  }
 0x4ac   : > { %18456 = vmatpush3.bf16.msra.mxu0 %v19994_v62 }
 0x4ad   : > { %18457 = vmatprep.subr.bf16.mxu0 %v19996_v0  ;;  %18478 = vmatpush3.bf16.msra.mxu1 %v19995_v63  ;;  %v20035_v63 = vld [vmem:[%s20437_s3 + $0x2428] sm:$0xff]  }
 0x4ae   : > { %18479 = vmatprep.subr.bf16.mxu1 %v19997_v1 }
 0x4b0   : > { %18458 = vmatpush3.bf16.msra.mxu0 %v19998_v2 }
 0x4b1   : > { %18459 = vmatprep.subr.bf16.mxu0 %v20000_v4  ;;  %18480 = vmatpush3.bf16.msra.mxu1 %v19999_v3  ;;  %v20036_v3 = vld [vmem:[%s20437_s3 + $0x24a8] sm:$0xff]   ;;  %v20037_v4 = vld [vmem:[%s20437_s3 + $0x2470] sm:$0xff]  }
 0x4b2   : > { %v18157_v5 = vpop.f32.mrb[112].mxu0  ;;  %18481 = vmatprep.subr.bf16.mxu1 %v20001_v6 }
 0x4b3   : > { %v18158_v7 = vpop.f32.mrb[113].mxu0  ;;  %v18179_v9 = vpop.f32.mrb[112].mxu1 }
 0x4b4   : > { %v18159_v10 = vadd.f32 %v18158_v7, %v18157_v5  ;;  %v18160_v11 = vpop.f32.mrb[114].mxu0  ;;  %v18180_v12 = vpop.f32.mrb[113].mxu1  ;;  %18460 = vmatpush3.bf16.msra.mxu0 %v20002_v8 }
 0x4b5   : > { %v18161_v14 = vpop.f32.mrb[115].mxu0  ;;  %v18181_v17 = vadd.f32 %v18180_v12, %v18179_v9  ;;  %v18182_v18 = vpop.f32.mrb[114].mxu1  ;;  %18461 = vmatprep.subr.bf16.mxu0 %v20004_v15  ;;  %18482 = vmatpush3.bf16.msra.mxu1 %v20003_v13  ;;  %v20039_v12 = vld [vmem:[%s20437_s3 + $0x2430] sm:$0xff]   ;;  %v20041_v15 = vld [vmem:[%s20437_s3 + $0x2478] sm:$0xff]  }
 0x4b6   : > { %v14380_v16 = vadd.f32 %v18159_v10, %v21750_v31  ;;  %v18183_v20 = vpop.f32.mrb[115].mxu1  ;;  %18483 = vmatprep.subr.bf16.mxu1 %v20005_v19  ;;  %v20011_v31 = vld [vmem:[%s20437_s3 + $0x23b8] sm:$0xff]   ;;  %v20038_v10 = vld [vmem:[%s20437_s3 + $0x24f0] sm:$0xff]   ;;  %v255_v18 = vld [vmem:[%s20447_s30 + $0x120] sm:$0xff] }
 0x4b7   : > { %v20040_v14 = vld [vmem:[%s20437_s3 + $0x24b0] sm:$0xff]   ;;  %v922_v19 = vrot.slane %v255_v18, %v20485_v42  ;;  %v915_v20 = vcombine.high %v255_v18, %v255_v18  ;;  %v20081_v18 = vld [vmem:[%s20437_s3 + $0x2600] sm:$0xff]  }
 0x4b8   : > { %v21788_v22 = vadd.f32 %v18181_v17, %v14380_v16  ;;  %18462 = vmatpush3.bf16.msra.mxu0 %v20006_v21  ;;  %v20042_v16 = vld [vmem:[%s20437_s3 + $0x24f8] sm:$0xff]   ;;  %v20046_v21 = vld [vmem:[%s20437_s3 + $0x2540] sm:$0xff]  }
 0x4b9   : > { %18463 = vmatprep.subr.bf16.mxu0 %v20008_v23  ;;  %18484 = vmatpush3.bf16.msra.mxu1 %v20007_v24  ;;  %v20043_v17 = vld [vmem:[%s20437_s3 + $0x2438] sm:$0xff]   ;;  %v930_v23 = vcombine.high %v922_v19, %v922_v19  ;;  %v929_v24 = vrot.slane %v915_v20, %v20485_v42 }
 0x4ba   : > { %18485 = vmatprep.subr.bf16.mxu1 %v20009_v25  ;;  %v20047_v25 = vld [vmem:[%s20437_s3 + $0x25c0] sm:$0xff]  }
 0x4bb   : > { %v1330_v28 = vpack.c.bf16 %v930_v23, %v930_v23  ;;  %v931_v29 = vcombine.high %v929_v24, %v929_v24  ;;  %v20083_v23 = vld [vmem:[%s20437_s3 + $0x2648] sm:$0xff]  }
 0x4bc   : > { %18464 = vmatpush3.bf16.msra.mxu0 %v20010_v26  ;;  %v1329_v26 = vpack.c.bf16 %v922_v19, %v922_v19 }
 0x4bd   : > { %18493 = vmatprep.subr.bf16.mxu0 %v20013_v30  ;;  %18486 = vmatpush3.bf16.msra.mxu1 %v20011_v31  ;;  %v20049_v30 = vld [vmem:[%s20437_s3 + $0x2580] sm:$0xff]   ;;  %v1331_v31 = vpack.c.bf16 %v929_v24, %v929_v24  ;;  %v1332_v33 = vpack.c.bf16 %v931_v29, %v931_v29  ;;  %v20088_v29 = vld [vmem:[%s20437_s3 + $0x26d0] sm:$0xff]  }
 0x4be   : > { %18515 = vmatprep.subr.bf16.mxu1 %v20014_v34  ;;  %v20051_v34 = vld [vmem:[%s20437_s3 + $0x25c8] sm:$0xff]  }
 0x4bf   : > { %14938 = vmatmul.mubr.bf16.vlgmr.msra.gmra.mrb[140].mxu0 %v1325_v35  ;;  %v20052_v35 = vld [vmem:[%s20437_s3 + $0x2508] sm:$0xff]  }
 0x4c0   : > { %18494 = vmatpush3.bf16.msra.mxu0 %v20015_v36  ;;  %14978 = vmatmul.mubr.bf16.vlgmr.msra.gmra.mrb[140].mxu1 %v1327_v40  ;;  %v20053_v36 = vld [vmem:[%s20437_s3 + $0x2588] sm:$0xff]   ;;  %v20057_v40 = vld [vmem:[%s20437_s3 + $0x2590] sm:$0xff]  }
 0x4c1   : > { %18495 = vmatprep.subr.bf16.mxu0 %v20017_v41  ;;  %18516 = vmatpush3.bf16.msra.mxu1 %v20016_v39  ;;  %v20056_v39 = vld [vmem:[%s20437_s3 + $0x2510] sm:$0xff]   ;;  %v20058_v41 = vld [vmem:[%s20437_s3 + $0x2558] sm:$0xff]  }
 0x4c2   : > { %18517 = vmatprep.subr.bf16.mxu1 %v20018_v44  ;;  %15017 = vmatprep.mubr.bf16.mxu0 %v1330_v28  ;;  %v20060_v44 = vld [vmem:[%s20437_s3 + $0x2518] sm:$0xff]   ;;  %v20087_v28 = vld [vmem:[%s20437_s3 + $0x2650] sm:$0xff]  }
 0x4c3   : > { %15057 = vmatprep.mubr.bf16.mxu1 %v1332_v33  ;;  %v20092_v33 = vld [vmem:[%s20437_s3 + $0x26d8] sm:$0xff]  }
 0x4c4   : > { %18496 = vmatpush3.bf16.msra.mxu0 %v20019_v45  ;;  %v20061_v45 = vld [vmem:[%s20437_s3 + $0x2598] sm:$0xff]  }
 0x4c5   : > { %18497 = vmatprep.subr.bf16.mxu0 %v20021_v47  ;;  %18518 = vmatpush3.bf16.msra.mxu1 %v20020_v46  ;;  %v20062_v46 = vld [vmem:[%s20437_s3 + $0x2560] sm:$0xff]  }
 0x4c6   : > { %18519 = vmatprep.subr.bf16.mxu1 %v20022_v48  ;;  %v20063_v47 = vld [vmem:[%s20437_s3 + $0x25e0] sm:$0xff]  }
 0x4c7   : > { %v20064_v48 = vld [vmem:[%s20437_s3 + $0x2520] sm:$0xff]  }
 0x4c8   : > { %18498 = vmatpush3.bf16.msra.mxu0 %v20023_v49  ;;  %v20065_v49 = vld [vmem:[%s20437_s3 + $0x25a0] sm:$0xff]  }
 0x4c9   : > { %18499 = vmatprep.subr.bf16.mxu0 %v20025_v51  ;;  %18520 = vmatpush3.bf16.msra.mxu1 %v20024_v50  ;;  %v20066_v50 = vld [vmem:[%s20437_s3 + $0x2568] sm:$0xff]  }
 0x4ca   : > { %18521 = vmatprep.subr.bf16.mxu1 %v20026_v52  ;;  %v20067_v52 = vld [vmem:[%s20437_s3 + $0x25e8] sm:$0xff]  }
 0x4cc   : > { %18500 = vmatpush3.bf16.msra.mxu0 %v20027_v53 }
 0x4cd   : > { %18501 = vmatprep.subr.bf16.mxu0 %v20029_v55  ;;  %18522 = vmatpush3.bf16.msra.mxu1 %v20028_v54  ;;  %v20068_v54 = vld [vmem:[%s20437_s3 + $0x2528] sm:$0xff]  }
 0x4ce   : > { %18523 = vmatprep.subr.bf16.mxu1 %v20030_v56 }
 0x4d0   : > { %18502 = vmatpush3.bf16.msra.mxu0 %v20031_v57 }
 0x4d1   : > { %18503 = vmatprep.subr.bf16.mxu0 %v20033_v59  ;;  %18524 = vmatpush3.bf16.msra.mxu1 %v20032_v58  ;;  %v20069_v58 = vld [vmem:[%s20437_s3 + $0x25a8] sm:$0xff]   ;;  %v20070_v59 = vld [vmem:[%s20437_s3 + $0x2570] sm:$0xff]  }
 0x4d2   : > { %v18201_v60 = vpop.f32.mrb[116].mxu0  ;;  %18525 = vmatprep.subr.bf16.mxu1 %v20034_v61 }
 0x4d3   : > { %v18202_v62 = vpop.f32.mrb[117].mxu0  ;;  %v18223_v0 = vpop.f32.mrb[116].mxu1 }
 0x4d4   : > { %v18203_v1 = vadd.f32 %v18202_v62, %v18201_v60  ;;  %v18204_v2 = vpop.f32.mrb[118].mxu0  ;;  %v18224_v5 = vpop.f32.mrb[117].mxu1  ;;  %18504 = vmatpush3.bf16.msra.mxu0 %v20035_v63 }
 0x4d5   : > { %v18205_v6 = vpop.f32.mrb[119].mxu0  ;;  %v18225_v8 = vadd.f32 %v18224_v5, %v18223_v0  ;;  %v18226_v9 = vpop.f32.mrb[118].mxu1  ;;  %18505 = vmatprep.subr.bf16.mxu0 %v20037_v4  ;;  %18526 = vmatpush3.bf16.msra.mxu1 %v20036_v3  ;;  %v20072_v3 = vld [vmem:[%s20437_s3 + $0x2530] sm:$0xff]  }
 0x4d6   : > { %v14460_v7 = vadd.f32 %v18203_v1, %v21788_v22  ;;  %v18227_v11 = vpop.f32.mrb[119].mxu1  ;;  %18527 = vmatprep.subr.bf16.mxu1 %v20038_v10  ;;  %v20044_v22 = vld [vmem:[%s20437_s3 + $0x24b8] sm:$0xff]   ;;  %v20071_v1 = vld [vmem:[%s20437_s3 + $0x25f0] sm:$0xff]   ;;  %v256_v9 = vld [vmem:[%s20447_s30 + $0x128] sm:$0xff] }
 0x4d7   : > { %v20073_v5 = vld [vmem:[%s20437_s3 + $0x25b0] sm:$0xff]   ;;  %v20074_v6 = vld [vmem:[%s20437_s3 + $0x2578] sm:$0xff]   ;;  %v939_v11 = vrot.slane %v256_v9, %v20485_v42 }
 0x4d8   : > { %v21826_v13 = vadd.f32 %v18225_v8, %v14460_v7  ;;  %18506 = vmatpush3.bf16.msra.mxu0 %v20039_v12  ;;  %v20075_v7 = vld [vmem:[%s20437_s3 + $0x25f8] sm:$0xff]   ;;  %v932_v12 = vcombine.high %v256_v9, %v256_v9  ;;  %v20114_v9 = vld [vmem:[%s20437_s3 + $0x2700] sm:$0xff]  }
 0x4d9   : > { %18507 = vmatprep.subr.bf16.mxu0 %v20041_v15  ;;  %18528 = vmatpush3.bf16.msra.mxu1 %v20040_v14  ;;  %v20076_v8 = vld [vmem:[%s20437_s3 + $0x2538] sm:$0xff]   ;;  %v947_v14 = vcombine.high %v939_v11, %v939_v11 }
 0x4da   : > { %18529 = vmatprep.subr.bf16.mxu1 %v20042_v16  ;;  %v20077_v10 = vld [vmem:[%s20437_s3 + $0x25b8] sm:$0xff]   ;;  %v946_v15 = vrot.slane %v932_v12, %v20485_v42  ;;  %v20080_v16 = vld [vmem:[%s20437_s3 + $0x26c0] sm:$0xff]  }
 0x4db   : > { %v1334_v19 = vpack.c.bf16 %v947_v14, %v947_v14  ;;  %v20115_v12 = vld [vmem:[%s20437_s3 + $0x2780] sm:$0xff]   ;;  %v20116_v14 = vld [vmem:[%s20437_s3 + $0x2748] sm:$0xff]  }
 0x4dc   : > { %18508 = vmatpush3.bf16.msra.mxu0 %v20043_v17  ;;  %v1333_v17 = vpack.c.bf16 %v939_v11, %v939_v11  ;;  %v948_v20 = vcombine.high %v946_v15, %v946_v15 }
 0x4dd   : > { %18537 = vmatprep.subr.bf16.mxu0 %v20046_v21  ;;  %18530 = vmatpush3.bf16.msra.mxu1 %v20044_v22  ;;  %v20082_v21 = vld [vmem:[%s20437_s3 + $0x2680] sm:$0xff]   ;;  %v1335_v22 = vpack.c.bf16 %v946_v15, %v946_v15 }
 0x4de   : > { %18559 = vmatprep.subr.bf16.mxu1 %v20047_v25  ;;  %v1336_v24 = vpack.c.bf16 %v948_v20, %v948_v20  ;;  %v20084_v25 = vld [vmem:[%s20437_s3 + $0x26c8] sm:$0xff]   ;;  %v20121_v20 = vld [vmem:[%s20437_s3 + $0x27d0] sm:$0xff]  }
 0x4df   : > { %15018 = vmatmul.mubr.bf16.vlgmr.msra.gmra.mrb[144].mxu0 %v1329_v26  ;;  %v20085_v26 = vld [vmem:[%s20437_s3 + $0x2608] sm:$0xff]  }
 0x4e0   : > { %18538 = vmatpush3.bf16.msra.mxu0 %v20048_v27  ;;  %15058 = vmatmul.mubr.bf16.vlgmr.msra.gmra.mrb[144].mxu1 %v1331_v31  ;;  %v20086_v27 = vld [vmem:[%s20437_s3 + $0x2688] sm:$0xff]   ;;  %v20090_v31 = vld [vmem:[%s20437_s3 + $0x2690] sm:$0xff]  }
 0x4e1   : > { %18539 = vmatprep.subr.bf16.mxu0 %v20050_v32  ;;  %18560 = vmatpush3.bf16.msra.mxu1 %v20049_v30  ;;  %v20089_v30 = vld [vmem:[%s20437_s3 + $0x2610] sm:$0xff]   ;;  %v20091_v32 = vld [vmem:[%s20437_s3 + $0x2658] sm:$0xff]  }
 0x4e2   : > { %18561 = vmatprep.subr.bf16.mxu1 %v20051_v34  ;;  %15097 = vmatprep.mubr.bf16.mxu0 %v1334_v19  ;;  %v20093_v34 = vld [vmem:[%s20437_s3 + $0x2618] sm:$0xff]   ;;  %v20120_v19 = vld [vmem:[%s20437_s3 + $0x2750] sm:$0xff]  }
 0x4e3   : > { %15137 = vmatprep.mubr.bf16.mxu1 %v1336_v24  ;;  %v20125_v24 = vld [vmem:[%s20437_s3 + $0x27d8] sm:$0xff]  }
 0x4e4   : > { %18540 = vmatpush3.bf16.msra.mxu0 %v20052_v35  ;;  %v20094_v35 = vld [vmem:[%s20437_s3 + $0x2698] sm:$0xff]  }
 0x4e5   : > { %18541 = vmatprep.subr.bf16.mxu0 %v20054_v37  ;;  %18562 = vmatpush3.bf16.msra.mxu1 %v20053_v36  ;;  %v20095_v36 = vld [vmem:[%s20437_s3 + $0x2660] sm:$0xff]  }
 0x4e6   : > { %18563 = vmatprep.subr.bf16.mxu1 %v20055_v38  ;;  %v20096_v37 = vld [vmem:[%s20437_s3 + $0x26e0] sm:$0xff]  }
 0x4e7   : > { %v20097_v38 = vld [vmem:[%s20437_s3 + $0x2620] sm:$0xff]  }
 0x4e8   : > { %18542 = vmatpush3.bf16.msra.mxu0 %v20056_v39  ;;  %v20098_v39 = vld [vmem:[%s20437_s3 + $0x26a0] sm:$0xff]  }
 0x4e9   : > { %18543 = vmatprep.subr.bf16.mxu0 %v20058_v41  ;;  %18564 = vmatpush3.bf16.msra.mxu1 %v20057_v40  ;;  %v20099_v40 = vld [vmem:[%s20437_s3 + $0x2668] sm:$0xff]  }
 0x4ea   : > { %18565 = vmatprep.subr.bf16.mxu1 %v20059_v43  ;;  %v20100_v43 = vld [vmem:[%s20437_s3 + $0x26e8] sm:$0xff]  }
 0x4ec   : > { %18544 = vmatpush3.bf16.msra.mxu0 %v20060_v44 }
 0x4ed   : > { %18545 = vmatprep.subr.bf16.mxu0 %v20062_v46  ;;  %18566 = vmatpush3.bf16.msra.mxu1 %v20061_v45  ;;  %v20101_v45 = vld [vmem:[%s20437_s3 + $0x2628] sm:$0xff]  }
 0x4ee   : > { %18567 = vmatprep.subr.bf16.mxu1 %v20063_v47 }
 0x4f0   : > { %18546 = vmatpush3.bf16.msra.mxu0 %v20064_v48 }
 0x4f1   : > { %18547 = vmatprep.subr.bf16.mxu0 %v20066_v50  ;;  %18568 = vmatpush3.bf16.msra.mxu1 %v20065_v49  ;;  %v20102_v50 = vld [vmem:[%s20437_s3 + $0x26a8] sm:$0xff]  }
 0x4f2   : > { %v18245_v51 = vpop.f32.mrb[120].mxu0  ;;  %18569 = vmatprep.subr.bf16.mxu1 %v20067_v52  ;;  %v20103_v52 = vld [vmem:[%s20437_s3 + $0x2670] sm:$0xff]  }
 0x4f3   : > { %v18246_v53 = vpop.f32.mrb[121].mxu0  ;;  %v18267_v55 = vpop.f32.mrb[120].mxu1 }
 0x4f4   : > { %v18247_v56 = vadd.f32 %v18246_v53, %v18245_v51  ;;  %v18248_v57 = vpop.f32.mrb[122].mxu0  ;;  %v18268_v60 = vpop.f32.mrb[121].mxu1  ;;  %18548 = vmatpush3.bf16.msra.mxu0 %v20068_v54 }
 0x4f5   : > { %v18249_v61 = vpop.f32.mrb[123].mxu0  ;;  %v18269_v63 = vadd.f32 %v18268_v60, %v18267_v55  ;;  %v18270_v0 = vpop.f32.mrb[122].mxu1  ;;  %18549 = vmatprep.subr.bf16.mxu0 %v20070_v59  ;;  %18570 = vmatpush3.bf16.msra.mxu1 %v20069_v58  ;;  %v20105_v58 = vld [vmem:[%s20437_s3 + $0x2630] sm:$0xff]   ;;  %v20107_v60 = vld [vmem:[%s20437_s3 + $0x2678] sm:$0xff]  }
 0x4f6   : > { %v14540_v62 = vadd.f32 %v18247_v56, %v21826_v13  ;;  %v18271_v2 = vpop.f32.mrb[123].mxu1  ;;  %18571 = vmatprep.subr.bf16.mxu1 %v20071_v1  ;;  %v20079_v13 = vld [vmem:[%s20437_s3 + $0x2640] sm:$0xff]   ;;  %v20104_v56 = vld [vmem:[%s20437_s3 + $0x26f0] sm:$0xff]  }
 0x4f7   : > { %v20106_v61 = vld [vmem:[%s20437_s3 + $0x26b0] sm:$0xff]  }
 0x4f8   : > { %v21864_v4 = vadd.f32 %v18269_v63, %v14540_v62  ;;  %18550 = vmatpush3.bf16.msra.mxu0 %v20072_v3  ;;  %v20108_v62 = vld [vmem:[%s20437_s3 + $0x26f8] sm:$0xff]   ;;  %v257_v0 = vld [vmem:[%s20447_s30 + $0x130] sm:$0xff]  ;;  %v20112_v3 = vld [vmem:[%s20437_s3 + $0x2740] sm:$0xff]  }
 0x4f9   : > { %18551 = vmatprep.subr.bf16.mxu0 %v20074_v6  ;;  %18572 = vmatpush3.bf16.msra.mxu1 %v20073_v5  ;;  %v20109_v63 = vld [vmem:[%s20437_s3 + $0x2638] sm:$0xff]   ;;  %v956_v1 = vrot.slane %v257_v0, %v20485_v42  ;;  %v949_v2 = vcombine.high %v257_v0, %v257_v0  ;;  %v20147_v0 = vld [vmem:[%s20437_s3 + $0x2800] sm:$0xff]  }
 0x4fa   : > { %18573 = vmatprep.subr.bf16.mxu1 %v20075_v7  ;;  %v20113_v7 = vld [vmem:[%s20437_s3 + $0x27c0] sm:$0xff]  }
 0x4fb   : > { %v964_v5 = vcombine.high %v956_v1, %v956_v1  ;;  %v963_v6 = vrot.slane %v949_v2, %v20485_v42 }
 0x4fc   : > { %18552 = vmatpush3.bf16.msra.mxu0 %v20076_v8  ;;  %v1337_v8 = vpack.c.bf16 %v956_v1, %v956_v1 }
 0x4fd   : > { %18581 = vmatprep.subr.bf16.mxu0 %v20079_v13  ;;  %18574 = vmatpush3.bf16.msra.mxu1 %v20077_v10  ;;  %v1338_v10 = vpack.c.bf16 %v964_v5, %v964_v5  ;;  %v965_v11 = vcombine.high %v963_v6, %v963_v6  ;;  %v1339_v13 = vpack.c.bf16 %v963_v6, %v963_v6  ;;  %v20149_v5 = vld [vmem:[%s20437_s3 + $0x2848] sm:$0xff]  }
 0x4fe   : > { %18603 = vmatprep.subr.bf16.mxu1 %v20080_v16  ;;  %v20117_v16 = vld [vmem:[%s20437_s3 + $0x27c8] sm:$0xff]  }
 0x4ff   : > { %15098 = vmatmul.mubr.bf16.vlgmr.msra.gmra.mrb[148].mxu0 %v1333_v17  ;;  %v1340_v15 = vpack.c.bf16 %v965_v11, %v965_v11  ;;  %v20118_v17 = vld [vmem:[%s20437_s3 + $0x2708] sm:$0xff]   ;;  %v20154_v11 = vld [vmem:[%s20437_s3 + $0x28d0] sm:$0xff]  }
 0x500   : > { %18582 = vmatpush3.bf16.msra.mxu0 %v20081_v18  ;;  %15138 = vmatmul.mubr.bf16.vlgmr.msra.gmra.mrb[148].mxu1 %v1335_v22  ;;  %v20119_v18 = vld [vmem:[%s20437_s3 + $0x2788] sm:$0xff]   ;;  %v20123_v22 = vld [vmem:[%s20437_s3 + $0x2790] sm:$0xff]  }
 0x501   : > { %18583 = vmatprep.subr.bf16.mxu0 %v20083_v23  ;;  %18604 = vmatpush3.bf16.msra.mxu1 %v20082_v21  ;;  %v20122_v21 = vld [vmem:[%s20437_s3 + $0x2710] sm:$0xff]   ;;  %v20124_v23 = vld [vmem:[%s20437_s3 + $0x2758] sm:$0xff]  }
 0x502   : > { %18605 = vmatprep.subr.bf16.mxu1 %v20084_v25  ;;  %15177 = vmatprep.mubr.bf16.mxu0 %v1338_v10  ;;  %v20126_v25 = vld [vmem:[%s20437_s3 + $0x2718] sm:$0xff]   ;;  %v20153_v10 = vld [vmem:[%s20437_s3 + $0x2850] sm:$0xff]  }
 0x503   : > { %15217 = vmatprep.mubr.bf16.mxu1 %v1340_v15  ;;  %v20158_v15 = vld [vmem:[%s20437_s3 + $0x28d8] sm:$0xff]  }
 0x504   : > { %18584 = vmatpush3.bf16.msra.mxu0 %v20085_v26  ;;  %v20127_v26 = vld [vmem:[%s20437_s3 + $0x2798] sm:$0xff]  }
 0x505   : > { %18585 = vmatprep.subr.bf16.mxu0 %v20087_v28  ;;  %18606 = vmatpush3.bf16.msra.mxu1 %v20086_v27  ;;  %v20128_v27 = vld [vmem:[%s20437_s3 + $0x2760] sm:$0xff]  }
 0x506   : > { %18607 = vmatprep.subr.bf16.mxu1 %v20088_v29  ;;  %v20129_v28 = vld [vmem:[%s20437_s3 + $0x27e0] sm:$0xff]  }
 0x507   : > { %v20130_v29 = vld [vmem:[%s20437_s3 + $0x2720] sm:$0xff]  }
 0x508   : > { %18586 = vmatpush3.bf16.msra.mxu0 %v20089_v30  ;;  %v20131_v30 = vld [vmem:[%s20437_s3 + $0x27a0] sm:$0xff]  }
 0x509   : > { %18587 = vmatprep.subr.bf16.mxu0 %v20091_v32  ;;  %18608 = vmatpush3.bf16.msra.mxu1 %v20090_v31  ;;  %v20132_v31 = vld [vmem:[%s20437_s3 + $0x2768] sm:$0xff]  }
 0x50a   : > { %18609 = vmatprep.subr.bf16.mxu1 %v20092_v33  ;;  %v20133_v33 = vld [vmem:[%s20437_s3 + $0x27e8] sm:$0xff]  }
 0x50c   : > { %18588 = vmatpush3.bf16.msra.mxu0 %v20093_v34 }
 0x50d   : > { %18589 = vmatprep.subr.bf16.mxu0 %v20095_v36  ;;  %18610 = vmatpush3.bf16.msra.mxu1 %v20094_v35  ;;  %v20134_v35 = vld [vmem:[%s20437_s3 + $0x2728] sm:$0xff]  }
 0x50e   : > { %18611 = vmatprep.subr.bf16.mxu1 %v20096_v37 }
 0x510   : > { %18590 = vmatpush3.bf16.msra.mxu0 %v20097_v38 }
 0x511   : > { %18591 = vmatprep.subr.bf16.mxu0 %v20099_v40  ;;  %18612 = vmatpush3.bf16.msra.mxu1 %v20098_v39  ;;  %v20135_v39 = vld [vmem:[%s20437_s3 + $0x27a8] sm:$0xff]   ;;  %v20136_v40 = vld [vmem:[%s20437_s3 + $0x2770] sm:$0xff]  }
 0x512   : > { %v18289_v41 = vpop.f32.mrb[124].mxu0  ;;  %18613 = vmatprep.subr.bf16.mxu1 %v20100_v43 }
 0x513   : > { %v18290_v44 = vpop.f32.mrb[125].mxu0  ;;  %v18311_v46 = vpop.f32.mrb[124].mxu1 }
 0x514   : > { %v18291_v47 = vadd.f32 %v18290_v44, %v18289_v41  ;;  %v18292_v48 = vpop.f32.mrb[126].mxu0  ;;  %v18312_v49 = vpop.f32.mrb[125].mxu1  ;;  %18592 = vmatpush3.bf16.msra.mxu0 %v20101_v45 }
 0x515   : > { %v18293_v51 = vpop.f32.mrb[127].mxu0  ;;  %v18313_v54 = vadd.f32 %v18312_v49, %v18311_v46  ;;  %v18314_v55 = vpop.f32.mrb[126].mxu1  ;;  %18593 = vmatprep.subr.bf16.mxu0 %v20103_v52  ;;  %18614 = vmatpush3.bf16.msra.mxu1 %v20102_v50  ;;  %v20138_v49 = vld [vmem:[%s20437_s3 + $0x2730] sm:$0xff]   ;;  %v20140_v52 = vld [vmem:[%s20437_s3 + $0x2778] sm:$0xff]  }
 0x516   : > { %v14620_v53 = vadd.f32 %v18291_v47, %v21864_v4  ;;  %v18315_v57 = vpop.f32.mrb[127].mxu1  ;;  %18615 = vmatprep.subr.bf16.mxu1 %v20104_v56  ;;  %v20110_v4 = vld [vmem:[%s20437_s3 + $0x26b8] sm:$0xff]   ;;  %v20137_v47 = vld [vmem:[%s20437_s3 + $0x27f0] sm:$0xff]  }
 0x517   : > { %v20139_v51 = vld [vmem:[%s20437_s3 + $0x27b0] sm:$0xff]   ;;  %v258_v55 = vld [vmem:[%s20447_s30 + $0x138] sm:$0xff] }
 0x518   : > { %v21902_v59 = vadd.f32 %v18313_v54, %v14620_v53  ;;  %18594 = vmatpush3.bf16.msra.mxu0 %v20105_v58  ;;  %v20141_v53 = vld [vmem:[%s20437_s3 + $0x27f8] sm:$0xff]   ;;  %v973_v56 = vrot.slane %v258_v55, %v20485_v42  ;;  %v966_v57 = vcombine.high %v258_v55, %v258_v55  ;;  %v20145_v58 = vld [vmem:[%s20437_s3 + $0x2840] sm:$0xff]  }
 0x519   : > { %18595 = vmatprep.subr.bf16.mxu0 %v20107_v60  ;;  %18616 = vmatpush3.bf16.msra.mxu1 %v20106_v61  ;;  %v20142_v54 = vld [vmem:[%s20437_s3 + $0x2738] sm:$0xff]   ;;  %v20180_v55 = vld [vmem:[%s20437_s3 + $0x2900] sm:$0xff]  }
 0x51a   : > { %18617 = vmatprep.subr.bf16.mxu1 %v20108_v62  ;;  %v981_v60 = vcombine.high %v973_v56, %v973_v56  ;;  %v980_v61 = vrot.slane %v966_v57, %v20485_v42  ;;  %v20146_v62 = vld [vmem:[%s20437_s3 + $0x28c0] sm:$0xff]  }
 0x51c   : > { %18596 = vmatpush3.bf16.msra.mxu0 %v20109_v63  ;;  %v1341_v63 = vpack.c.bf16 %v973_v56, %v973_v56  ;;  %v1342_v1 = vpack.c.bf16 %v981_v60, %v981_v60  ;;  %v982_v2 = vcombine.high %v980_v61, %v980_v61  ;;  %v20182_v60 = vld [vmem:[%s20437_s3 + $0x2948] sm:$0xff]  }
 0x51d   : > { %18625 = vmatprep.subr.bf16.mxu0 %v20112_v3  ;;  %18618 = vmatpush3.bf16.msra.mxu1 %v20110_v4  ;;  %v20148_v3 = vld [vmem:[%s20437_s3 + $0x2880] sm:$0xff]   ;;  %v1343_v4 = vpack.c.bf16 %v980_v61, %v980_v61 }
 0x51e   : > { %18647 = vmatprep.subr.bf16.mxu1 %v20113_v7  ;;  %v1344_v6 = vpack.c.bf16 %v982_v2, %v982_v2  ;;  %v20150_v7 = vld [vmem:[%s20437_s3 + $0x28c8] sm:$0xff]   ;;  %v20187_v2 = vld [vmem:[%s20437_s3 + $0x29d0] sm:$0xff]  }
 0x51f   : > { %15178 = vmatmul.mubr.bf16.vlgmr.msra.gmra.mrb[152].mxu0 %v1337_v8  ;;  %v20151_v8 = vld [vmem:[%s20437_s3 + $0x2808] sm:$0xff]  }
 0x520   : > { %18626 = vmatpush3.bf16.msra.mxu0 %v20114_v9  ;;  %15218 = vmatmul.mubr.bf16.vlgmr.msra.gmra.mrb[152].mxu1 %v1339_v13  ;;  %v20152_v9 = vld [vmem:[%s20437_s3 + $0x2888] sm:$0xff]   ;;  %v20156_v13 = vld [vmem:[%s20437_s3 + $0x2890] sm:$0xff]  }
 0x521   : > { %18627 = vmatprep.subr.bf16.mxu0 %v20116_v14  ;;  %18648 = vmatpush3.bf16.msra.mxu1 %v20115_v12  ;;  %v20155_v12 = vld [vmem:[%s20437_s3 + $0x2810] sm:$0xff]   ;;  %v20157_v14 = vld [vmem:[%s20437_s3 + $0x2858] sm:$0xff]  }
 0x522   : > { %18649 = vmatprep.subr.bf16.mxu1 %v20117_v16  ;;  %15257 = vmatprep.mubr.bf16.mxu0 %v1342_v1  ;;  %v20159_v16 = vld [vmem:[%s20437_s3 + $0x2818] sm:$0xff]   ;;  %v20186_v1 = vld [vmem:[%s20437_s3 + $0x2950] sm:$0xff]  }
 0x523   : > { %15297 = vmatprep.mubr.bf16.mxu1 %v1344_v6  ;;  %v20191_v6 = vld [vmem:[%s20437_s3 + $0x29d8] sm:$0xff]  }
 0x524   : > { %18628 = vmatpush3.bf16.msra.mxu0 %v20118_v17  ;;  %v20160_v17 = vld [vmem:[%s20437_s3 + $0x2898] sm:$0xff]  }
 0x525   : > { %18629 = vmatprep.subr.bf16.mxu0 %v20120_v19  ;;  %18650 = vmatpush3.bf16.msra.mxu1 %v20119_v18  ;;  %v20161_v18 = vld [vmem:[%s20437_s3 + $0x2860] sm:$0xff]  }
 0x526   : > { %18651 = vmatprep.subr.bf16.mxu1 %v20121_v20  ;;  %v20162_v19 = vld [vmem:[%s20437_s3 + $0x28e0] sm:$0xff]  }
 0x527   : > { %v20163_v20 = vld [vmem:[%s20437_s3 + $0x2820] sm:$0xff]  }
 0x528   : > { %18630 = vmatpush3.bf16.msra.mxu0 %v20122_v21  ;;  %v20164_v21 = vld [vmem:[%s20437_s3 + $0x28a0] sm:$0xff]  }
 0x529   : > { %18631 = vmatprep.subr.bf16.mxu0 %v20124_v23  ;;  %18652 = vmatpush3.bf16.msra.mxu1 %v20123_v22  ;;  %v20165_v22 = vld [vmem:[%s20437_s3 + $0x2868] sm:$0xff]  }
 0x52a   : > { %18653 = vmatprep.subr.bf16.mxu1 %v20125_v24  ;;  %v20166_v24 = vld [vmem:[%s20437_s3 + $0x28e8] sm:$0xff]  }
 0x52c   : > { %18632 = vmatpush3.bf16.msra.mxu0 %v20126_v25 }
 0x52d   : > { %18633 = vmatprep.subr.bf16.mxu0 %v20128_v27  ;;  %18654 = vmatpush3.bf16.msra.mxu1 %v20127_v26  ;;  %v20167_v26 = vld [vmem:[%s20437_s3 + $0x2828] sm:$0xff]  }
 0x52e   : > { %18655 = vmatprep.subr.bf16.mxu1 %v20129_v28 }
 0x530   : > { %18634 = vmatpush3.bf16.msra.mxu0 %v20130_v29 }
 0x531   : > { %18635 = vmatprep.subr.bf16.mxu0 %v20132_v31  ;;  %18656 = vmatpush3.bf16.msra.mxu1 %v20131_v30  ;;  %v20168_v30 = vld [vmem:[%s20437_s3 + $0x28a8] sm:$0xff]   ;;  %v20169_v31 = vld [vmem:[%s20437_s3 + $0x2870] sm:$0xff]  }
 0x532   : > { %v18333_v32 = vpop.f32.mrb[128].mxu0  ;;  %18657 = vmatprep.subr.bf16.mxu1 %v20133_v33 }
 0x533   : > { %v18334_v34 = vpop.f32.mrb[129].mxu0  ;;  %v18355_v36 = vpop.f32.mrb[128].mxu1 }
 0x534   : > { %v18335_v37 = vadd.f32 %v18334_v34, %v18333_v32  ;;  %v18336_v38 = vpop.f32.mrb[130].mxu0  ;;  %v18356_v41 = vpop.f32.mrb[129].mxu1  ;;  %18636 = vmatpush3.bf16.msra.mxu0 %v20134_v35 }
 0x535   : > { %v18337_v43 = vpop.f32.mrb[131].mxu0  ;;  %v18357_v45 = vadd.f32 %v18356_v41, %v18355_v36  ;;  %v18358_v46 = vpop.f32.mrb[130].mxu1  ;;  %18637 = vmatprep.subr.bf16.mxu0 %v20136_v40  ;;  %18658 = vmatpush3.bf16.msra.mxu1 %v20135_v39  ;;  %v20171_v39 = vld [vmem:[%s20437_s3 + $0x2830] sm:$0xff]  }
 0x536   : > { %v14700_v44 = vadd.f32 %v18335_v37, %v21902_v59  ;;  %v18359_v48 = vpop.f32.mrb[131].mxu1  ;;  %18659 = vmatprep.subr.bf16.mxu1 %v20137_v47  ;;  %v20143_v59 = vld [vmem:[%s20437_s3 + $0x27b8] sm:$0xff]   ;;  %v20170_v37 = vld [vmem:[%s20437_s3 + $0x28f0] sm:$0xff]   ;;  %v259_v46 = vld [vmem:[%s20447_s30 + $0x140] sm:$0xff] }
 0x537   : > { %v20172_v41 = vld [vmem:[%s20437_s3 + $0x28b0] sm:$0xff]   ;;  %v20173_v43 = vld [vmem:[%s20437_s3 + $0x2878] sm:$0xff]   ;;  %v990_v48 = vrot.slane %v259_v46, %v20485_v42 }
 0x538   : > { %v21940_v50 = vadd.f32 %v18357_v45, %v14700_v44  ;;  %18638 = vmatpush3.bf16.msra.mxu0 %v20138_v49  ;;  %v20174_v44 = vld [vmem:[%s20437_s3 + $0x28f8] sm:$0xff]   ;;  %v983_v49 = vcombine.high %v259_v46, %v259_v46 }
 0x539   : > { %18639 = vmatprep.subr.bf16.mxu0 %v20140_v52  ;;  %18660 = vmatpush3.bf16.msra.mxu1 %v20139_v51  ;;  %v20175_v45 = vld [vmem:[%s20437_s3 + $0x2838] sm:$0xff]   ;;  %v998_v51 = vcombine.high %v990_v48, %v990_v48 }
 0x53a   : > { %18661 = vmatprep.subr.bf16.mxu1 %v20141_v53  ;;  %v20176_v47 = vld [vmem:[%s20437_s3 + $0x28b8] sm:$0xff]   ;;  %v997_v52 = vrot.slane %v983_v49, %v20485_v42  ;;  %v20179_v53 = vld [vmem:[%s20437_s3 + $0x29c0] sm:$0xff]  }
 0x53b   : > { %v1346_v56 = vpack.c.bf16 %v998_v51, %v998_v51 }
 0x53c   : > { %18640 = vmatpush3.bf16.msra.mxu0 %v20142_v54  ;;  %v1345_v54 = vpack.c.bf16 %v990_v48, %v990_v48  ;;  %v999_v57 = vcombine.high %v997_v52, %v997_v52 }
 0x53d   : > { %18669 = vmatprep.subr.bf16.mxu0 %v20145_v58  ;;  %18662 = vmatpush3.bf16.msra.mxu1 %v20143_v59  ;;  %v20181_v58 = vld [vmem:[%s20437_s3 + $0x2980] sm:$0xff]   ;;  %v1347_v59 = vpack.c.bf16 %v997_v52, %v997_v52 }
 0x53e   : > { %18691 = vmatprep.subr.bf16.mxu1 %v20146_v62  ;;  %v1348_v61 = vpack.c.bf16 %v999_v57, %v999_v57  ;;  %v20183_v62 = vld [vmem:[%s20437_s3 + $0x29c8] sm:$0xff]  }
 0x53f   : > { %15258 = vmatmul.mubr.bf16.vlgmr.msra.gmra.mrb[156].mxu0 %v1341_v63  ;;  %v20184_v63 = vld [vmem:[%s20437_s3 + $0x2908] sm:$0xff]  }
 0x540   : > { %18670 = vmatpush3.bf16.msra.mxu0 %v20147_v0  ;;  %15298 = vmatmul.mubr.bf16.vlgmr.msra.gmra.mrb[156].mxu1 %v1343_v4  ;;  %v20185_v0 = vld [vmem:[%s20437_s3 + $0x2988] sm:$0xff]   ;;  %v20189_v4 = vld [vmem:[%s20437_s3 + $0x2990] sm:$0xff]  }
 0x541   : > { %18671 = vmatprep.subr.bf16.mxu0 %v20149_v5  ;;  %18692 = vmatpush3.bf16.msra.mxu1 %v20148_v3  ;;  %v20188_v3 = vld [vmem:[%s20437_s3 + $0x2910] sm:$0xff]   ;;  %v20190_v5 = vld [vmem:[%s20437_s3 + $0x2958] sm:$0xff]  }
 0x542   : > { %18693 = vmatprep.subr.bf16.mxu1 %v20150_v7  ;;  %15337 = vmatprep.mubr.bf16.mxu0 %v1346_v56  ;;  %v20192_v7 = vld [vmem:[%s20437_s3 + $0x2918] sm:$0xff]  }
 0x543   : > { %15377 = vmatprep.mubr.bf16.mxu1 %v1348_v61 }
 0x544   : > { %18672 = vmatpush3.bf16.msra.mxu0 %v20151_v8  ;;  %v20193_v8 = vld [vmem:[%s20437_s3 + $0x2998] sm:$0xff]  }
 0x545   : > { %18673 = vmatprep.subr.bf16.mxu0 %v20153_v10  ;;  %18694 = vmatpush3.bf16.msra.mxu1 %v20152_v9  ;;  %v20194_v9 = vld [vmem:[%s20437_s3 + $0x2960] sm:$0xff]  }
 0x546   : > { %18695 = vmatprep.subr.bf16.mxu1 %v20154_v11  ;;  %v20195_v10 = vld [vmem:[%s20437_s3 + $0x29e0] sm:$0xff]  }
 0x547   : > { %v20196_v11 = vld [vmem:[%s20437_s3 + $0x2920] sm:$0xff]  }
 0x548   : > { %18674 = vmatpush3.bf16.msra.mxu0 %v20155_v12  ;;  %v20197_v12 = vld [vmem:[%s20437_s3 + $0x29a0] sm:$0xff]  }
 0x549   : > { %18675 = vmatprep.subr.bf16.mxu0 %v20157_v14  ;;  %18696 = vmatpush3.bf16.msra.mxu1 %v20156_v13  ;;  %v20198_v13 = vld [vmem:[%s20437_s3 + $0x2968] sm:$0xff]  }
 0x54a   : > { %18697 = vmatprep.subr.bf16.mxu1 %v20158_v15  ;;  %v20199_v15 = vld [vmem:[%s20437_s3 + $0x29e8] sm:$0xff]  }
 0x54c   : > { %18676 = vmatpush3.bf16.msra.mxu0 %v20159_v16 }
 0x54d   : > { %18677 = vmatprep.subr.bf16.mxu0 %v20161_v18  ;;  %18698 = vmatpush3.bf16.msra.mxu1 %v20160_v17  ;;  %v20200_v17 = vld [vmem:[%s20437_s3 + $0x2928] sm:$0xff]  }
 0x54e   : > { %18699 = vmatprep.subr.bf16.mxu1 %v20162_v19 }
 0x550   : > { %18678 = vmatpush3.bf16.msra.mxu0 %v20163_v20 }
 0x551   : > { %18679 = vmatprep.subr.bf16.mxu0 %v20165_v22  ;;  %18700 = vmatpush3.bf16.msra.mxu1 %v20164_v21  ;;  %v20201_v22 = vld [vmem:[%s20437_s3 + $0x29a8] sm:$0xff]  }
 0x552   : > { %v18377_v23 = vpop.f32.mrb[132].mxu0  ;;  %18701 = vmatprep.subr.bf16.mxu1 %v20166_v24  ;;  %v20202_v24 = vld [vmem:[%s20437_s3 + $0x2970] sm:$0xff]  }
 0x553   : > { %v18378_v25 = vpop.f32.mrb[133].mxu0  ;;  %v18399_v27 = vpop.f32.mrb[132].mxu1 }
 0x554   : > { %v18379_v28 = vadd.f32 %v18378_v25, %v18377_v23  ;;  %v18380_v29 = vpop.f32.mrb[134].mxu0  ;;  %v18400_v32 = vpop.f32.mrb[133].mxu1  ;;  %18680 = vmatpush3.bf16.msra.mxu0 %v20167_v26 }
 0x555   : > { %v18381_v33 = vpop.f32.mrb[135].mxu0  ;;  %v18401_v35 = vadd.f32 %v18400_v32, %v18399_v27  ;;  %v18402_v36 = vpop.f32.mrb[134].mxu1  ;;  %18681 = vmatprep.subr.bf16.mxu0 %v20169_v31  ;;  %18702 = vmatpush3.bf16.msra.mxu1 %v20168_v30  ;;  %v20204_v30 = vld [vmem:[%s20437_s3 + $0x2930] sm:$0xff]   ;;  %v20206_v32 = vld [vmem:[%s20437_s3 + $0x2978] sm:$0xff]  }
 0x556   : > { %v14780_v34 = vadd.f32 %v18379_v28, %v21940_v50  ;;  %v18403_v38 = vpop.f32.mrb[135].mxu1  ;;  %18703 = vmatprep.subr.bf16.mxu1 %v20170_v37  ;;  %v20178_v50 = vld [vmem:[%s20437_s3 + $0x2940] sm:$0xff]   ;;  %v20203_v28 = vld [vmem:[%s20437_s3 + $0x29f0] sm:$0xff]   ;;  %v260_v36 = vld [vmem:[%s20447_s30 + $0x148] sm:$0xff] }
 0x557   : > { %v20205_v33 = vld [vmem:[%s20437_s3 + $0x29b0] sm:$0xff]   ;;  %v1007_v37 = vrot.slane %v260_v36, %v20485_v42  ;;  %v1000_v38 = vcombine.high %v260_v36, %v260_v36 }
 0x558   : > { %v21978_v40 = vadd.f32 %v18401_v35, %v14780_v34  ;;  %18682 = vmatpush3.bf16.msra.mxu0 %v20171_v39  ;;  %v20207_v34 = vld [vmem:[%s20437_s3 + $0x29f8] sm:$0xff]  }
 0x559   : > { %18683 = vmatprep.subr.bf16.mxu0 %v20173_v43  ;;  %18704 = vmatpush3.bf16.msra.mxu1 %v20172_v41  ;;  %v20208_v35 = vld [vmem:[%s20437_s3 + $0x2938] sm:$0xff]   ;;  %v1014_v41 = vrot.slane %v1000_v38, %v20485_v42  ;;  %v1349_v43 = vpack.c.bf16 %v1007_v37, %v1007_v37 }
 0x55a   : > { %18705 = vmatprep.subr.bf16.mxu1 %v20174_v44  ;;  %v20209_v39 = vld [vmem:[%s20437_s3 + $0x29b8] sm:$0xff]  }
 0x55b   : > { %v1351_v46 = vpack.c.bf16 %v1014_v41, %v1014_v41 }
 0x55c   : > { %18684 = vmatpush3.bf16.msra.mxu0 %v20175_v45  ;;  %v1016_v45 = vcombine.high %v1014_v41, %v1014_v41 }
 0x55d   : > { %18713 = vmatprep.subr.bf16.mxu0 %v20178_v50  ;;  %18706 = vmatpush3.bf16.msra.mxu1 %v20176_v47 }
 0x55e   : > { %18735 = vmatprep.subr.bf16.mxu1 %v20179_v53  ;;  %v1352_v47 = vpack.c.bf16 %v1016_v45, %v1016_v45 }
 0x55f   : > { %15338 = vmatmul.mubr.bf16.vlgmr.msra.gmra.mrb[160].mxu0 %v1345_v54 }
 0x560   : > { %18714 = vmatpush3.bf16.msra.mxu0 %v20180_v55  ;;  %15378 = vmatmul.mubr.bf16.vlgmr.msra.gmra.mrb[160].mxu1 %v1347_v59 }
 0x561   : > { %18715 = vmatprep.subr.bf16.mxu0 %v20182_v60  ;;  %18736 = vmatpush3.bf16.msra.mxu1 %v20181_v58 }
 0x562   : > { %18737 = vmatprep.subr.bf16.mxu1 %v20183_v62  ;;  %15457 = vmatprep.mubr.bf16.mxu1 %v1352_v47 }
 0x564   : > { %18716 = vmatpush3.bf16.msra.mxu0 %v20184_v63 }
 0x565   : > { %18717 = vmatprep.subr.bf16.mxu0 %v20186_v1  ;;  %18738 = vmatpush3.bf16.msra.mxu1 %v20185_v0 }
 0x566   : > { %18739 = vmatprep.subr.bf16.mxu1 %v20187_v2 }
 0x568   : > { %18718 = vmatpush3.bf16.msra.mxu0 %v20188_v3 }
 0x569   : > { %18719 = vmatprep.subr.bf16.mxu0 %v20190_v5  ;;  %18740 = vmatpush3.bf16.msra.mxu1 %v20189_v4 }
 0x56a   : > { %18741 = vmatprep.subr.bf16.mxu1 %v20191_v6 }
 0x56c   : > { %18720 = vmatpush3.bf16.msra.mxu0 %v20192_v7 }
 0x56d   : > { %18721 = vmatprep.subr.bf16.mxu0 %v20194_v9  ;;  %18742 = vmatpush3.bf16.msra.mxu1 %v20193_v8 }
 0x56e   : > { %18743 = vmatprep.subr.bf16.mxu1 %v20195_v10 }
 0x570   : > { %18722 = vmatpush3.bf16.msra.mxu0 %v20196_v11 }
 0x571   : > { %18723 = vmatprep.subr.bf16.mxu0 %v20198_v13  ;;  %18744 = vmatpush3.bf16.msra.mxu1 %v20197_v12 }
 0x572   : > { %v18421_v14 = vpop.f32.mrb[136].mxu0  ;;  %18745 = vmatprep.subr.bf16.mxu1 %v20199_v15 }
 0x573   : > { %v18422_v16 = vpop.f32.mrb[137].mxu0  ;;  %v18443_v18 = vpop.f32.mrb[136].mxu1 }
 0x574   : > { %v18423_v19 = vadd.f32 %v18422_v16, %v18421_v14  ;;  %v18424_v20 = vpop.f32.mrb[138].mxu0  ;;  %v18444_v21 = vpop.f32.mrb[137].mxu1  ;;  %18724 = vmatpush3.bf16.msra.mxu0 %v20200_v17 }
 0x575   : > { %v18425_v23 = vpop.f32.mrb[139].mxu0  ;;  %v18445_v26 = vadd.f32 %v18444_v21, %v18443_v18  ;;  %v18446_v27 = vpop.f32.mrb[138].mxu1  ;;  %18725 = vmatprep.subr.bf16.mxu0 %v20202_v24  ;;  %18746 = vmatpush3.bf16.msra.mxu1 %v20201_v22 }
 0x576   : > { %v14860_v25 = vadd.f32 %v18423_v19, %v21978_v40  ;;  %v18447_v29 = vpop.f32.mrb[139].mxu1  ;;  %18747 = vmatprep.subr.bf16.mxu1 %v20203_v28  ;;  %v1015_v40 = vcombine.high %v1007_v37, %v1007_v37 }
 0x578   : > { %v14900_v31 = vadd.f32 %v18445_v26, %v14860_v25  ;;  %18726 = vmatpush3.bf16.msra.mxu0 %v20204_v30  ;;  %v1350_v44 = vpack.c.bf16 %v1015_v40, %v1015_v40 }
 0x579   : > { %18727 = vmatprep.subr.bf16.mxu0 %v20206_v32  ;;  %18748 = vmatpush3.bf16.msra.mxu1 %v20205_v33 }
 0x57a   : > { %18749 = vmatprep.subr.bf16.mxu1 %v20207_v34  ;;  %15417 = vmatprep.mubr.bf16.mxu0 %v1350_v44 }
 0x57c   : > { %18728 = vmatpush3.bf16.msra.mxu0 %v20208_v35 }
 0x57d   : > { %18750 = vmatpush3.bf16.msra.mxu1 %v20209_v39 }
 0x57f   : > { %15418 = vmatmul.mubr.bf16.vlgmr.msra.gmra.mrb[164].mxu0 %v1349_v43 }
 0x580   : > { %15458 = vmatmul.mubr.bf16.vlgmr.msra.gmra.mrb[164].mxu1 %v1351_v46 }
 0x592   : > { %v18465_v48 = vpop.f32.mrb[140].mxu0 }
 0x593   : > { %v18466_v49 = vpop.f32.mrb[141].mxu0  ;;  %v18487_v50 = vpop.f32.mrb[140].mxu1 }
 0x594   : > { %v18467_v51 = vadd.f32 %v18466_v49, %v18465_v48  ;;  %v18468_v52 = vpop.f32.mrb[142].mxu0  ;;  %v18488_v53 = vpop.f32.mrb[141].mxu1 }
 0x595   : > { %v18469_v54 = vpop.f32.mrb[143].mxu0  ;;  %v18489_v42 = vadd.f32 %v18488_v53, %v18487_v50  ;;  %v18490_v56 = vpop.f32.mrb[142].mxu1 }
 0x596   : > { %v14940_v55 = vadd.f32 %v18467_v51, %v14900_v31  ;;  %v18491_v57 = vpop.f32.mrb[143].mxu1 }
 0x598   : > { %v14980_v58 = vadd.f32 %v18489_v42, %v14940_v55 }
 0x5b2   : > { %v18509_v59 = vpop.f32.mrb[144].mxu0 }
 0x5b3   : > { %v18510_v60 = vpop.f32.mrb[145].mxu0  ;;  %v18531_v61 = vpop.f32.mrb[144].mxu1 }
 0x5b4   : > { %v18511_v62 = vadd.f32 %v18510_v60, %v18509_v59  ;;  %v18512_v63 = vpop.f32.mrb[146].mxu0  ;;  %v18532_v0 = vpop.f32.mrb[145].mxu1 }
 0x5b5   : > { %v18513_v1 = vpop.f32.mrb[147].mxu0  ;;  %v18533_v3 = vadd.f32 %v18532_v0, %v18531_v61  ;;  %v18534_v4 = vpop.f32.mrb[146].mxu1 }
 0x5b6   : > { %v15020_v2 = vadd.f32 %v18511_v62, %v14980_v58  ;;  %v18535_v5 = vpop.f32.mrb[147].mxu1 }
 0x5b8   : > { %v15060_v6 = vadd.f32 %v18533_v3, %v15020_v2  ;;  %v15465_v2 = vld [vmem:[#allocation5] sm:$0x3] }
 0x5d2   : > { %v18553_v7 = vpop.f32.mrb[148].mxu0 }
 0x5d3   : > { %v18554_v8 = vpop.f32.mrb[149].mxu0  ;;  %v18575_v9 = vpop.f32.mrb[148].mxu1 }
 0x5d4   : > { %v18555_v10 = vadd.f32 %v18554_v8, %v18553_v7  ;;  %v18556_v11 = vpop.f32.mrb[150].mxu0  ;;  %v18576_v12 = vpop.f32.mrb[149].mxu1 }
 0x5d5   : > { %v18557_v13 = vpop.f32.mrb[151].mxu0  ;;  %v18577_v15 = vadd.f32 %v18576_v12, %v18575_v9  ;;  %v18578_v16 = vpop.f32.mrb[150].mxu1 }
 0x5d6   : > { %v15100_v14 = vadd.f32 %v18555_v10, %v15060_v6  ;;  %v18579_v17 = vpop.f32.mrb[151].mxu1 }
 0x5d8   : > { %v15140_v18 = vadd.f32 %v18577_v15, %v15100_v14 }
 0x5f2   : > { %v18597_v19 = vpop.f32.mrb[152].mxu0 }
 0x5f3   : > { %v18598_v20 = vpop.f32.mrb[153].mxu0  ;;  %v18619_v21 = vpop.f32.mrb[152].mxu1 }
 0x5f4   : > { %v18599_v22 = vadd.f32 %v18598_v20, %v18597_v19  ;;  %v18600_v23 = vpop.f32.mrb[154].mxu0  ;;  %v18620_v24 = vpop.f32.mrb[153].mxu1 }
 0x5f5   : > { %v18601_v25 = vpop.f32.mrb[155].mxu0  ;;  %v18621_v27 = vadd.f32 %v18620_v24, %v18619_v21  ;;  %v18622_v28 = vpop.f32.mrb[154].mxu1 }
 0x5f6   : > { %v15180_v26 = vadd.f32 %v18599_v22, %v15140_v18  ;;  %v18623_v29 = vpop.f32.mrb[155].mxu1 }
 0x5f8   : > { %v15220_v30 = vadd.f32 %v18621_v27, %v15180_v26 }
 0x612   : > { %v18641_v31 = vpop.f32.mrb[156].mxu0 }
 0x613   : > { %v18642_v32 = vpop.f32.mrb[157].mxu0  ;;  %v18663_v33 = vpop.f32.mrb[156].mxu1 }
 0x614   : > { %v18643_v34 = vadd.f32 %v18642_v32, %v18641_v31  ;;  %v18644_v35 = vpop.f32.mrb[158].mxu0  ;;  %v18664_v36 = vpop.f32.mrb[157].mxu1 }
 0x615   : > { %v18645_v37 = vpop.f32.mrb[159].mxu0  ;;  %v18665_v39 = vadd.f32 %v18664_v36, %v18663_v33  ;;  %v18666_v40 = vpop.f32.mrb[158].mxu1 }
 0x616   : > { %v15260_v38 = vadd.f32 %v18643_v34, %v15220_v30  ;;  %v18667_v41 = vpop.f32.mrb[159].mxu1 }
 0x618   : > { %v15300_v43 = vadd.f32 %v18665_v39, %v15260_v38 }
 0x632   : > { %v18685_v44 = vpop.f32.mrb[160].mxu0 }
 0x633   : > { %v18686_v45 = vpop.f32.mrb[161].mxu0  ;;  %v18707_v46 = vpop.f32.mrb[160].mxu1 }
 0x634   : > { %v18687_v47 = vadd.f32 %v18686_v45, %v18685_v44  ;;  %v18688_v48 = vpop.f32.mrb[162].mxu0  ;;  %v18708_v49 = vpop.f32.mrb[161].mxu1 }
 0x635   : > { %v18689_v50 = vpop.f32.mrb[163].mxu0  ;;  %v18709_v52 = vadd.f32 %v18708_v49, %v18707_v46  ;;  %v18710_v53 = vpop.f32.mrb[162].mxu1 }
 0x636   : > { %v15340_v51 = vadd.f32 %v18687_v47, %v15300_v43  ;;  %v18711_v54 = vpop.f32.mrb[163].mxu1 }
 0x638   : > { %v15380_v55 = vadd.f32 %v18709_v52, %v15340_v51 }
 0x652   : > { %v18729_v42 = vpop.f32.mrb[164].mxu0 }
 0x653   : > { %v18730_v56 = vpop.f32.mrb[165].mxu0  ;;  %v18751_v57 = vpop.f32.mrb[164].mxu1 }
 0x654   : > { %v18731_v58 = vadd.f32 %v18730_v56, %v18729_v42  ;;  %v18732_v59 = vpop.f32.mrb[166].mxu0  ;;  %v18752_v60 = vpop.f32.mrb[165].mxu1 }
 0x655   : > { %v18733_v61 = vpop.f32.mrb[167].mxu0  ;;  %v18753_v63 = vadd.f32 %v18752_v60, %v18751_v57  ;;  %v18754_v0 = vpop.f32.mrb[166].mxu1 }
 0x656   : > { %v15420_v62 = vadd.f32 %v18731_v58, %v15380_v55  ;;  %v18755_v1 = vpop.f32.mrb[167].mxu1 }
 0x658   : > { %v15460_v3 = vadd.f32 %v18753_v63, %v15420_v62 }
 0x65a   : > { %v15466_v4 = vadd.f32 %v15465_v2, %v15460_v3 }
 0x65c   : > { %15468 = vst.msk [vmem:[#allocation5] sm:$0x3] %vm15467_vm1, %v15466_v4 }
 0x65d   : > { %20254 = shalt.err (!%p20251_p1)
}
 0x65e   : > { %s20255_s15 = scalar_lea.hbm %s22072_s2, 32 }
 0x65f   : > { %p20256_p2 = scmp.ne.s32.totalorder %s22072_s2, %s20255_s15  ;;  %p20261_p3 = scmp.lt.u32.totalorder %s20255_s15, %s22072_s2 }
 0x661   : > { %p20257_p11 = pnand %p20256_p2, %p22026_p7 }
 0x663   : > { %p20258_p13 = pneg %p20257_p11 }
 0x665   : > { %p20263_p4 = pnand %p20261_p3, %p20258_p13 }
 0x667   : > { %20266 = shalt.err (!%p20263_p4)
}
 0x668   : > { %18762 = dma.vmem_to_hbm [thread:$0]  (%p22026_p7), %s15479_s19, 32, %s22072_s2, [#allocation4]  }
 0x669   : > { %20296 = dma.done.wait (%p22026_p7), [#allocation4], 32  }
 0x66a   : > { %20298 = vsyncadd (%p22026_p7), [#allocation4], 4294967264 }
 0x66b PF: > { %s16_s14 = sadd.s32 1, %s20321_s14   ;;  %s22076_s9 = smov %s20305_s10 }
 0x66c   : > { %p13_p9 = scmp.ge.s32.totalorder %s16_s14, 9   ;;  %s22077_s10 = smov %s20309_s11 }
 0x66d   : > { %s22078_s11 = smov %s20391_s20  ;;  %s22079_s12 = smov %s20317_s13 }
 0x66e   : > { %s22080_s13 = smov %s22082_s16  ;;  %15 = sbr.rel (!%p13_p9) target bundleno = 5 (0x5), region = 73 }
 0x675   :  { %15491 = vsyncpa [#allocation3], 1 }
 0x676   :  { %15493 = vsyncpa [#allocation3 + $0x1], 1 }
 0x677   :  { %15494 = vsyncpa [#allocation4], 1 }
 0x678   :  { %15496 = vsyncpa [#allocation4 + $0x1], 1 }

</bundles_post_ra>
